<compile_context>
chip_gen: v5e
topology: v5e:2x2
jax: 0.10.0
libtpu: 0.0.40
codegen_flags: <defaults>
</compile_context>

<pallas_src>
import functools

import jax
import jax.numpy as jnp
from jax.experimental import pallas as pl
from jax.experimental.pallas import tpu as pltpu


def _round_up(a: int, b: int) -> int:
    return ((a + b - 1) // b) * b


def adamole_kernel(x_ref, wc_ref, bc_ref, a_ref, b_ref, o_ref, *,
                   num_experts, rank, scaling, max_threshold, out_pad):
    x = x_ref[...]                                                    # (tm, D_pad) bf16

    # --- one fused MXU pass: columns = [base | pad | gate | thresh | pad] ---
    big = jnp.dot(x, wc_ref[...], preferred_element_type=jnp.float32) + bc_ref[...]
    base = big[:, :out_pad]                                           # (tm, out_pad) f32
    logits = big[:, out_pad:out_pad + num_experts]                    # (tm, E)
    t_pre = big[:, out_pad + num_experts:out_pad + num_experts + 1]   # (tm, 1)

    # --- gating: softmax over experts (f32) ---
    m = jnp.max(logits, axis=-1, keepdims=True)
    e = jnp.exp(logits - m)
    gate = e / jnp.sum(e, axis=-1, keepdims=True)

    # --- adaptive threshold, expert selection, weight normalization ---
    thresh = jax.nn.sigmoid(t_pre) * max_threshold
    adapted = gate - thresh
    w = jnp.where(adapted >= 0.0, adapted, 0.0)
    wsum = jnp.sum(w, axis=-1, keepdims=True)
    w = w / jnp.where(wsum == 0.0, jnp.ones_like(wsum), wsum)
    w = w * scaling                                                   # fold LoRA scaling once

    # --- batched LoRA experts: two matmuls instead of an E-way loop ---
    h = jnp.dot(x, a_ref[...], preferred_element_type=jnp.float32)    # (tm, r*E) f32
    # A_all / B_all use rank-major column order (c = j*E + i), so the per-lane expert
    # weight is w[:, c % E]; expand via iota + select (robust, pure VPU).
    ncols = rank * num_experts
    col_expert = jax.lax.broadcasted_iota(jnp.int32, (h.shape[0], ncols), 1) % num_experts
    w_rep = jnp.zeros_like(h)
    for i in range(num_experts):                                      # E is small & static
        w_rep = w_rep + jnp.where(col_expert == i, w[:, i:i + 1], 0.0)
    hs = (h * w_rep).astype(b_ref.dtype)
    moe = jnp.dot(hs, b_ref[...], preferred_element_type=jnp.float32)  # (tm, out_pad)

    o_ref[...] = (base + moe).astype(o_ref.dtype)                     # lane-dense store


def linear_adamole_forward(x, params, *, tm=256, compute_dtype=jnp.bfloat16):
    """x: (B, S, D) float32. Returns (B, S, out_features)."""
    B, S, D = x.shape
    N = B * S
    out_f = params["w_base"].shape[1]
    E = params["w_gate"].shape[1]
    r = params["lora_A"].shape[2]

    f32 = jnp.float32
    D_pad = _round_up(D, 128)                 # full MXU contraction depth
    out_pad = _round_up(out_f, 128)           # lane-dense output stores
    gt_pad = _round_up(E + 1, 128)            # gate+threshold column block (lane aligned)
    C = out_pad + gt_pad

    tm = min(tm, _round_up(N, 8))
    N_pad = _round_up(N, tm)                  # tail rows zero-padded (sliced off below)

    # --- pack query-side weights/biases: [base | pad | gate | thresh | pad] columns ---
    wc = jnp.zeros((D_pad, C), f32)
    wc = wc.at[:D, :out_f].set(params["w_base"])
    wc = wc.at[:D, out_pad:out_pad + E].set(params["w_gate"])
    wc = wc.at[:D, out_pad + E:out_pad + E + 1].set(params["w_thresh"])
    wc = wc.astype(compute_dtype)

    bc = jnp.zeros((1, C), f32)
    bc = bc.at[:, :out_f].set(params["b_base"])
    bc = bc.at[:, out_pad + E:out_pad + E + 1].set(params["b_thresh"])

    # --- pack LoRA experts into two matmul operands (rank-major column order c = j*E+i) ---
    a = jnp.zeros((E, D_pad, r), f32).at[:, :D, :].set(params["lora_A"])
    a_all = jnp.transpose(a, (1, 2, 0)).reshape(D_pad, r * E).astype(compute_dtype)
    b = jnp.zeros((E, r, out_pad), f32).at[:, :, :out_f].set(params["lora_B"])
    b_all = jnp.transpose(b, (1, 0, 2)).reshape(r * E, out_pad).astype(compute_dtype)

    xf = jnp.zeros((N_pad, D_pad), f32).at[:N, :D].set(x.reshape(N, D))
    xf = xf.astype(compute_dtype)

    kernel = functools.partial(
        adamole_kernel,
        num_experts=E,
        rank=r,
        scaling=float(params["scaling"]),
        max_threshold=float(params["max_threshold"]),
        out_pad=out_pad,
    )

    out = pl.pallas_call(
        kernel,
        out_shape=jax.ShapeDtypeStruct((N_pad, out_pad), x.dtype),
        grid_spec=pltpu.PrefetchScalarGridSpec(
            num_scalar_prefetch=0,
            grid=(N_pad // tm,),
            in_specs=[
                pl.BlockSpec((tm, D_pad), lambda i: (i, 0)),        # x rows
                pl.BlockSpec((D_pad, C), lambda i: (0, 0)),         # fused base/gate/thresh W
                pl.BlockSpec((1, C), lambda i: (0, 0)),             # fused bias (f32)
                pl.BlockSpec((D_pad, r * E), lambda i: (0, 0)),     # lora_A packed
                pl.BlockSpec((r * E, out_pad), lambda i: (0, 0)),   # lora_B packed
            ],
            out_specs=pl.BlockSpec((tm, out_pad), lambda i: (i, 0)),
        ),
        compiler_params=pltpu.CompilerParams(dimension_semantics=("parallel",)),
    )(xf, wc, bc, a_all, b_all)

    return out[:N, :out_f].reshape(B, S, out_f)


def reference_forward(x, params, compute_dtype=jnp.bfloat16):
    """Pure-JAX reference mirroring the PyTorch module semantics (bf16 MXU operands,
    f32 accumulation / elementwise math — same precision recipe as the kernel)."""
    B, S, D = x.shape
    f32 = jnp.float32
    xf = x.reshape(-1, D)
    xc = xf.astype(compute_dtype)

    base = jnp.dot(xc, params["w_base"].astype(compute_dtype),
                   preferred_element_type=f32) + params["b_base"]
    logits = jnp.dot(xc, params["w_gate"].astype(compute_dtype), preferred_element_type=f32)
    gate = jax.nn.softmax(logits, axis=-1)
    t = jax.nn.sigmoid(jnp.dot(xc, params["w_thresh"].astype(compute_dtype),
                               preferred_element_type=f32)
                       + params["b_thresh"]) * params["max_threshold"]
    adapted = gate - t
    w = jnp.where(adapted >= 0.0, adapted, 0.0)
    wsum = jnp.sum(w, axis=-1, keepdims=True)
    w = w / jnp.where(wsum == 0.0, jnp.ones_like(wsum), wsum)

    moe = jnp.zeros_like(base)
    E = params["w_gate"].shape[1]
    for i in range(E):
        h = jnp.dot(xc, params["lora_A"][i].astype(compute_dtype), preferred_element_type=f32)
        hs = (h * (w[:, i:i + 1] * params["scaling"])).astype(compute_dtype)
        moe = moe + jnp.dot(hs, params["lora_B"][i].astype(compute_dtype),
                            preferred_element_type=f32)
    return (base + moe).reshape(B, S, -1)


if __name__ == "__main__":
    # Shapes consistent with the module:
    #   base_layer = nn.Linear(in_features=32, out_features=64)
    #   lora_rank=8, lora_alpha=1, num_experts=4, max_threshold=None -> 1/4
    B, S, D, OUT, R, E = 2, 256, 32, 64, 8, 4
    lora_alpha = 1
    scaling = lora_alpha / R
    max_threshold = 1.0 / E

    key = jax.random.PRNGKey(0)
    ks = jax.random.split(key, 8)
    x = jax.random.normal(ks[0], (B, S, D), dtype=jnp.float32)

    # Deterministic parameter init (module's reset_parameters zeroes lora_B;
    # we use small nonzero values so the MoE path is actually exercised).
    params = {
        "w_base": jax.random.normal(ks[1], (D, OUT), jnp.float32) * 0.05,
        "b_base": jax.random.normal(ks[2], (1, OUT), jnp.float32) * 0.05,
        "w_gate": jax.random.normal(ks[3], (D, E), jnp.float32) * 0.1,
        "w_thresh": jax.random.normal(ks[4], (D, 1), jnp.float32) * 0.1,
        "b_thresh": jax.random.normal(ks[5], (1, 1), jnp.float32) * 0.1,
        "lora_A": jax.random.normal(ks[6], (E, D, R), jnp.float32) * 0.1,
        "lora_B": jax.random.normal(ks[7], (E, R, OUT), jnp.float32) * 0.1,
        "scaling": scaling,
        "max_threshold": max_threshold,
    }

    out = linear_adamole_forward(x, params)
    out = jax.block_until_ready(out)

    ref = reference_forward(x, params)
    assert out.shape == (B, S, OUT)
    assert jnp.allclose(out, ref, atol=2e-3, rtol=2e-3), "mismatch vs reference"
    print("KERNEL_OK")
</pallas_src>

<mosaic_0001>
module attributes {stable_mosaic.version = 11 : i64} {
  func.func @adamole_kernel(%arg0: i32, %arg1: memref<256x128xbf16, #tpu.memory_space<vmem>>, %arg2: memref<128x256xbf16, #tpu.memory_space<vmem>>, %arg3: memref<1x256xf32, #tpu.memory_space<vmem>>, %arg4: memref<128x32xbf16, #tpu.memory_space<vmem>>, %arg5: memref<32x128xbf16, #tpu.memory_space<vmem>>, %arg6: memref<256x128xf32, #tpu.memory_space<vmem>>) attributes {dimension_semantics = [#tpu.dimension_semantics<parallel>], iteration_bounds = array<i64: 2>, scalar_prefetch = 0 : i64, scratch_operands = 0 : i64, tpu.core_type = #tpu.core_type<tc>, window_params = [{transform_indices = @transform_0, window_bounds = array<i64: 256, 128>}, {pipeline_mode = #tpu.pipeline_mode<synchronous>, transform_indices = @transform_1, window_bounds = array<i64: 128, 256>}, {pipeline_mode = #tpu.pipeline_mode<synchronous>, transform_indices = @transform_2, window_bounds = array<i64: 1, 256>}, {pipeline_mode = #tpu.pipeline_mode<synchronous>, transform_indices = @transform_3, window_bounds = array<i64: 128, 32>}, {pipeline_mode = #tpu.pipeline_mode<synchronous>, transform_indices = @transform_4, window_bounds = array<i64: 32, 128>}, {transform_indices = @transform_5, window_bounds = array<i64: 256, 128>}]} {
    %c0 = arith.constant 0 : index
    %c0_0 = arith.constant 0 : index
    %0 = vector.load %arg1[%c0, %c0_0] : memref<256x128xbf16, #tpu.memory_space<vmem>>, vector<256x128xbf16>
    %c0_1 = arith.constant 0 : index
    %c0_2 = arith.constant 0 : index
    %1 = vector.load %arg2[%c0_1, %c0_2] : memref<128x256xbf16, #tpu.memory_space<vmem>>, vector<128x256xbf16>
    %cst = arith.constant dense<0.000000e+00> : vector<256x256xf32>
    %2 = tpu.matmul %0, %1, %cst {dimension_numbers = #tpu.dot_dimension_numbers<[1], [0], [0], [1], [0, 0, 1, 1], [], []>} : vector<256x128xbf16>, vector<128x256xbf16>, vector<256x256xf32> -> vector<256x256xf32>
    %c0_3 = arith.constant 0 : index
    %c0_4 = arith.constant 0 : index
    %3 = vector.load %arg3[%c0_3, %c0_4] : memref<1x256xf32, #tpu.memory_space<vmem>>, vector<1x256xf32>
    %4 = vector.broadcast %3 : vector<1x256xf32> to vector<256x256xf32>
    %5 = arith.addf %2, %4 : vector<256x256xf32>
    %6 = vector.extract_strided_slice %5 {offsets = [0, 0], sizes = [256, 128], strides = [1, 1]} : vector<256x256xf32> to vector<256x128xf32>
    %7 = vector.extract_strided_slice %5 {offsets = [0, 128], sizes = [256, 4], strides = [1, 1]} : vector<256x256xf32> to vector<256x4xf32>
    %8 = vector.extract_strided_slice %5 {offsets = [0, 132], sizes = [256, 1], strides = [1, 1]} : vector<256x256xf32> to vector<256x1xf32>
    %cst_5 = arith.constant dense<0xFF800000> : vector<256xf32>
    %9 = vector.multi_reduction <maximumf>, %7, %cst_5 [1] : vector<256x4xf32> to vector<256xf32>
    %10 = vector.shape_cast %9 : vector<256xf32> to vector<256x1xf32>
    %11 = vector.broadcast %10 : vector<256x1xf32> to vector<256x4xf32>
    %12 = arith.subf %7, %11 : vector<256x4xf32>
    %13 = math.exp %12 : vector<256x4xf32>
    %cst_6 = arith.constant dense<0.000000e+00> : vector<256xf32>
    %14 = vector.multi_reduction <add>, %13, %cst_6 [1] : vector<256x4xf32> to vector<256xf32>
    %15 = vector.shape_cast %14 : vector<256xf32> to vector<256x1xf32>
    %16 = vector.broadcast %15 : vector<256x1xf32> to vector<256x4xf32>
    %17 = arith.divf %13, %16 : vector<256x4xf32>
    %18 = arith.negf %8 : vector<256x1xf32>
    %19 = math.exp %18 : vector<256x1xf32>
    %cst_7 = arith.constant 1.000000e+00 : f32
    %20 = vector.broadcast %cst_7 : f32 to vector<256x1xf32>
    %21 = arith.addf %20, %19 : vector<256x1xf32>
    %22 = arith.divf %20, %21 : vector<256x1xf32>
    %cst_8 = arith.constant 2.500000e-01 : f32
    %23 = vector.broadcast %cst_8 : f32 to vector<256x1xf32>
    %24 = arith.mulf %22, %23 : vector<256x1xf32>
    %25 = vector.broadcast %24 : vector<256x1xf32> to vector<256x4xf32>
    %26 = arith.subf %17, %25 : vector<256x4xf32>
    %cst_9 = arith.constant 0.000000e+00 : f32
    %27 = vector.broadcast %cst_9 : f32 to vector<256x4xf32>
    %28 = arith.cmpf oge, %26, %27 : vector<256x4xf32>
    %cst_10 = arith.constant 0.000000e+00 : f32
    %29 = vector.broadcast %cst_10 : f32 to vector<256x4xf32>
    %30 = arith.select %28, %26, %29 : vector<256x4xi1>, vector<256x4xf32>
    %cst_11 = arith.constant dense<0.000000e+00> : vector<256xf32>
    %31 = vector.multi_reduction <add>, %30, %cst_11 [1] : vector<256x4xf32> to vector<256xf32>
    %32 = vector.shape_cast %31 : vector<256xf32> to vector<256x1xf32>
    %cst_12 = arith.constant 0.000000e+00 : f32
    %33 = vector.broadcast %cst_12 : f32 to vector<256x1xf32>
    %34 = arith.cmpf oeq, %32, %33 : vector<256x1xf32>
    %cst_13 = arith.constant 1.000000e+00 : f32
    %35 = vector.broadcast %cst_13 : f32 to vector<256x1xf32>
    %36 = arith.select %34, %35, %32 : vector<256x1xi1>, vector<256x1xf32>
    %37 = vector.broadcast %36 : vector<256x1xf32> to vector<256x4xf32>
    %38 = arith.divf %30, %37 : vector<256x4xf32>
    %cst_14 = arith.constant 1.250000e-01 : f32
    %39 = vector.broadcast %cst_14 : f32 to vector<256x4xf32>
    %40 = arith.mulf %38, %39 : vector<256x4xf32>
    %c0_15 = arith.constant 0 : index
    %c0_16 = arith.constant 0 : index
    %41 = vector.load %arg4[%c0_15, %c0_16] : memref<128x32xbf16, #tpu.memory_space<vmem>>, vector<128x32xbf16>
    %cst_17 = arith.constant dense<0.000000e+00> : vector<256x32xf32>
    %42 = tpu.matmul %0, %41, %cst_17 {dimension_numbers = #tpu.dot_dimension_numbers<[1], [0], [0], [1], [0, 0, 1, 1], [], []>} : vector<256x128xbf16>, vector<128x32xbf16>, vector<256x32xf32> -> vector<256x32xf32>
    %43 = tpu.iota {dimensions = array<i32: 1>} : vector<256x32xi32>
    %c4_i32 = arith.constant 4 : i32
    %c0_i32 = arith.constant 0 : i32
    %44 = arith.cmpi eq, %c4_i32, %c0_i32 : i32
    %c1_i32 = arith.constant 1 : i32
    %45 = arith.select %44, %c1_i32, %c4_i32 : i32
    %46 = vector.broadcast %45 : i32 to vector<256x32xi32>
    %47 = arith.remsi %43, %46 : vector<256x32xi32>
    %c0_i32_18 = arith.constant 0 : i32
    %48 = vector.broadcast %c0_i32_18 : i32 to vector<256x32xi32>
    %49 = arith.cmpi ne, %47, %48 : vector<256x32xi32>
    %c0_i32_19 = arith.constant 0 : i32
    %50 = vector.broadcast %c0_i32_19 : i32 to vector<256x32xi32>
    %51 = arith.cmpi slt, %47, %50 : vector<256x32xi32>
    %c0_i32_20 = arith.constant 0 : i32
    %52 = arith.cmpi slt, %45, %c0_i32_20 : i32
    %53 = vector.broadcast %52 : i1 to vector<256x32xi1>
    %54 = vector.broadcast %53 : vector<256x32xi1> to vector<256x32xi1>
    %55 = arith.xori %51, %54 : vector<256x32xi1>
    %56 = arith.andi %55, %49 : vector<256x32xi1>
    %57 = vector.broadcast %45 : i32 to vector<256x32xi32>
    %58 = arith.addi %47, %57 : vector<256x32xi32>
    %59 = arith.select %56, %58, %47 : vector<256x32xi1>, vector<256x32xi32>
    %cst_21 = arith.constant 0.000000e+00 : f32
    %60 = vector.broadcast %cst_21 : f32 to vector<256x32xf32>
    %c0_i32_22 = arith.constant 0 : i32
    %61 = vector.broadcast %c0_i32_22 : i32 to vector<256x32xi32>
    %62 = arith.cmpi eq, %59, %61 : vector<256x32xi32>
    %63 = vector.extract_strided_slice %40 {offsets = [0, 0], sizes = [256, 1], strides = [1, 1]} : vector<256x4xf32> to vector<256x1xf32>
    %cst_23 = arith.constant 0.000000e+00 : f32
    %64 = vector.shape_cast %63 : vector<256x1xf32> to vector<256x1xf32>
    %65 = vector.broadcast %64 : vector<256x1xf32> to vector<256x32xf32>
    %66 = vector.broadcast %cst_23 : f32 to vector<256x32xf32>
    %67 = arith.select %62, %65, %66 : vector<256x32xi1>, vector<256x32xf32>
    %68 = arith.addf %60, %67 : vector<256x32xf32>
    %c1_i32_24 = arith.constant 1 : i32
    %69 = vector.broadcast %c1_i32_24 : i32 to vector<256x32xi32>
    %70 = arith.cmpi eq, %59, %69 : vector<256x32xi32>
    %71 = vector.extract_strided_slice %40 {offsets = [0, 1], sizes = [256, 1], strides = [1, 1]} : vector<256x4xf32> to vector<256x1xf32>
    %cst_25 = arith.constant 0.000000e+00 : f32
    %72 = vector.shape_cast %71 : vector<256x1xf32> to vector<256x1xf32>
    %73 = vector.broadcast %72 : vector<256x1xf32> to vector<256x32xf32>
    %74 = vector.broadcast %cst_25 : f32 to vector<256x32xf32>
    %75 = arith.select %70, %73, %74 : vector<256x32xi1>, vector<256x32xf32>
    %76 = arith.addf %68, %75 : vector<256x32xf32>
    %c2_i32 = arith.constant 2 : i32
    %77 = vector.broadcast %c2_i32 : i32 to vector<256x32xi32>
    %78 = arith.cmpi eq, %59, %77 : vector<256x32xi32>
    %79 = vector.extract_strided_slice %40 {offsets = [0, 2], sizes = [256, 1], strides = [1, 1]} : vector<256x4xf32> to vector<256x1xf32>
    %cst_26 = arith.constant 0.000000e+00 : f32
    %80 = vector.shape_cast %79 : vector<256x1xf32> to vector<256x1xf32>
    %81 = vector.broadcast %80 : vector<256x1xf32> to vector<256x32xf32>
    %82 = vector.broadcast %cst_26 : f32 to vector<256x32xf32>
    %83 = arith.select %78, %81, %82 : vector<256x32xi1>, vector<256x32xf32>
    %84 = arith.addf %76, %83 : vector<256x32xf32>
    %c3_i32 = arith.constant 3 : i32
    %85 = vector.broadcast %c3_i32 : i32 to vector<256x32xi32>
    %86 = arith.cmpi eq, %59, %85 : vector<256x32xi32>
    %87 = vector.extract_strided_slice %40 {offsets = [0, 3], sizes = [256, 1], strides = [1, 1]} : vector<256x4xf32> to vector<256x1xf32>
    %cst_27 = arith.constant 0.000000e+00 : f32
    %88 = vector.shape_cast %87 : vector<256x1xf32> to vector<256x1xf32>
    %89 = vector.broadcast %88 : vector<256x1xf32> to vector<256x32xf32>
    %90 = vector.broadcast %cst_27 : f32 to vector<256x32xf32>
    %91 = arith.select %86, %89, %90 : vector<256x32xi1>, vector<256x32xf32>
    %92 = arith.addf %84, %91 : vector<256x32xf32>
    %93 = arith.mulf %42, %92 : vector<256x32xf32>
    %94 = arith.truncf %93 : vector<256x32xf32> to vector<256x32xbf16>
    %c0_28 = arith.constant 0 : index
    %c0_29 = arith.constant 0 : index
    %95 = vector.load %arg5[%c0_28, %c0_29] : memref<32x128xbf16, #tpu.memory_space<vmem>>, vector<32x128xbf16>
    %cst_30 = arith.constant dense<0.000000e+00> : vector<256x128xf32>
    %96 = tpu.matmul %94, %95, %cst_30 {dimension_numbers = #tpu.dot_dimension_numbers<[1], [0], [0], [1], [0, 0, 1, 1], [], []>} : vector<256x32xbf16>, vector<32x128xbf16>, vector<256x128xf32> -> vector<256x128xf32>
    %97 = arith.addf %6, %96 : vector<256x128xf32>
    %c0_31 = arith.constant 0 : index
    %c0_32 = arith.constant 0 : index
    %98 = vector.load %arg6[%c0_31, %c0_32] : memref<256x128xf32, #tpu.memory_space<vmem>>, vector<256x128xf32>
    tpu.vector_store %arg6[%c0_31, %c0_32], %97 {strides = array<i32>} : memref<256x128xf32, #tpu.memory_space<vmem>>, vector<256x128xf32>,
    return
  }
  func.func @transform_0(%arg0: i32) -> (i32, i32) {
    %c0_i32 = arith.constant 0 : i32
    %c0_i32_0 = arith.constant 0 : i32
    return %arg0, %c0_i32 : i32, i32
  }
  func.func @transform_1(%arg0: i32) -> (i32, i32) {
    %c0_i32 = arith.constant 0 : i32
    %c0_i32_0 = arith.constant 0 : i32
    %c0_i32_1 = arith.constant 0 : i32
    return %c0_i32, %c0_i32_0 : i32, i32
  }
  func.func @transform_2(%arg0: i32) -> (i32, i32) {
    %c0_i32 = arith.constant 0 : i32
    %c0_i32_0 = arith.constant 0 : i32
    %c0_i32_1 = arith.constant 0 : i32
    return %c0_i32, %c0_i32_0 : i32, i32
  }
  func.func @transform_3(%arg0: i32) -> (i32, i32) {
    %c0_i32 = arith.constant 0 : i32
    %c0_i32_0 = arith.constant 0 : i32
    %c0_i32_1 = arith.constant 0 : i32
    return %c0_i32, %c0_i32_0 : i32, i32
  }
  func.func @transform_4(%arg0: i32) -> (i32, i32) {
    %c0_i32 = arith.constant 0 : i32
    %c0_i32_0 = arith.constant 0 : i32
    %c0_i32_1 = arith.constant 0 : i32
    return %c0_i32, %c0_i32_0 : i32, i32
  }
  func.func @transform_5(%arg0: i32) -> (i32, i32) {
    %c0_i32 = arith.constant 0 : i32
    %c0_i32_0 = arith.constant 0 : i32
    return %arg0, %c0_i32 : i32, i32
  }
}

</mosaic_0001>

<bundles_post_ra>
// kernel: tpu_custom_call.1
= control target key start
LH: loop header
LB: loop body
LE: loop exit
PB: predicated region body
PF: predicated region fallthrough
CT: control target
= control target key end

     0   :  { %10 = vsyncpa [#allocation3], 0  ;;  %s7880_s0 = inlined_call_operand.hbm [shape: bf16[512,128], index: 0, kind: input, shape index: {}]   ;;  %s7881_s1 = inlined_call_operand.hbm [shape: bf16[128,256], index: 1, kind: input, shape index: {}]   ;;  %s7882_s2 = inlined_call_operand.vmem [shape: f32[1,256], index: 2, kind: input, shape index: {}]   ;;  %s7883_s3 = inlined_call_operand.vmem [shape: bf16[128,32], index: 3, kind: input, shape index: {}]   ;;  %s7884_s4 = inlined_call_operand.vmem [shape: bf16[32,128], index: 4, kind: input, shape index: {}]   ;;  %s7885_s5 = inlined_call_operand.hbm [shape: f32[512,128], index: 5, kind: output, shape index: {}]  }
   0x1   :  { %12 = vsyncpa [#allocation3 + $0x1], 0 }
   0x2   :  { %13 = vsyncpa [#allocation6], 0 }
   0x3   :  { %14 = vsyncpa [#allocation4], 0 }
   0x4   :  { %16 = vsyncpa [#allocation4 + $0x1], 0  ;;  %s5320_s18 = smov 0   ;;  %s5322_s19 = smov 0  }
   0x5   :  { %s5324_s20 = smov 0   ;;  %s5326_s21 = smov 0  }
   0x6 LB: > { %s5341_s22 = sadd.s32 4294967295, %s5276_s21   ;;  %s4346_s23 = sadd.s32 4294967294, %s5276_s21   ;;  %s5276_s21 = sphi %s5326_s21, %s8084_s21   ;;  %s5272_s20 = sphi %s5324_s20, %s8083_s20   ;;  %s5268_s19 = sphi %s5322_s19, %s8082_s19   ;;  %s5264_s18 = sphi %s5320_s18, %s8081_s18  }
   0x7   : > { %p42_p0 = scmp.ne.s32.totalorder %s5268_s19, %s5264_s18  ;;  %p43_p1 = scmp.eq.s32.totalorder %s5341_s22, 0 }
   0x8   : > { %p150_p2 = scmp.eq.s32.totalorder %s5341_s22, 1  ;;  %p156_p3 = scmp.eq.s32.totalorder %s4346_s23, 1 }
   0x9   : > { %p5350_p4 = por %p43_p1, %p42_p0  ;;  %p4347_p5 = scmp.ge.s32.totalorder %s5276_s21, 1 }
   0xa   : > { %p5355_p6 = por %p156_p3, %p42_p0  ;;  %p163_p7 = scmp.lt.s32.totalorder %s5276_s21, 3 }
   0xb   : > { %s174_s28 = sshll.u32 %s7881_s1, 4  ;;  %s5278_s30 = smov [#allocation5]   ;;  %s175_s28 = int_to_ptr.hbm [resolvable:$true] %s174_s28 }
   0xc   : > { %p5363_p8 = pnand %p4347_p5, %p163_p7  ;;  %s176_s6 = sshll.u32 %s5278_s30, 4  ;;  %s177_s6 = int_to_ptr.vmem [resolvable:$true] %s176_s6 }
   0xd   : > { %s5373_s7 = sadd.s32 1, %s5276_s21   ;;  %s5279_s8 = smov 128  }
   0xe   : > { %p4630_p9 = pneg %p5363_p8  ;;  %s5280_s9 = smov 8  }
   0xf   : > { %s26_s10 = ssub.s32 %s5276_s21, %s5373_s7  ;;  %s29_s11 = sadd.s32 1, %s5272_s20 }
  0x10   : > { %p4631_p10 = pnand %p4630_p9, %p43_p1  ;;  %p27_p12 = scmp.eq.s32.totalorder %s26_s10, 0 }
  0x11   : > { %p36_p13 = scmp.ne.s32.totalorder %s5272_s20, %s5268_s19  ;;  %p37_p0 = scmp.eq.s32.totalorder %s5276_s21, 0 }
  0x12   : > { %4633 = dma.hbm_to_vmem [thread:$0]  (!%p4631_p10), %s175_s28, 2048, %s177_s6, [#allocation6], %s5279_s8, %s5279_s8, %s5280_s9  }
  0x13   : > { %p4643_p3 = scmp.lt.s32.totalorder %s5276_s21, 2  ;;  %p38_p5 = por %p37_p0, %p36_p13 }
  0x14   : > { %s5383_s12 = scalar_select %p27_p12, %s5272_s20, %s29_s11  }
  0x15   : > { %p5387_p7 = por %p150_p2, %p36_p13  ;;  %s199_s14 = sand.u32 1, %s5272_s20  }
  0x16   : > { %s4578_s15 = sshll.u32 %s5276_s21, 7  ;;  %s4350_s16 = sshll.u32 %s199_s14, 7 }
  0x17   : > { %s208_s26 = scalar_lea.hbm %s7880_s0, %s4578_s15  ;;  %s203_s28 = scalar_lea.vmem [#allocation2], %s4350_s16 }
  0x18   : > { %s209_s27 = sshll.u32 %s208_s26, 4  ;;  %s211_s30 = sshll.u32 %s203_s28, 4  ;;  %s210_s27 = int_to_ptr.hbm [resolvable:$true] %s209_s27  ;;  %s212_s30 = int_to_ptr.vmem [resolvable:$true] %s211_s30 }
  0x19   : > { %p5398_p9 = pnand %p4643_p3, %p38_p5  ;;  %s200_s8 = scalar_lea.sflag [#allocation3], %s199_s14 }
  0x1a   : > { %s5176_s9 = sshra.s32 %s210_s27, 4  ;;  %s5183_s16 = scalar_lea.hbm %s7880_s0, 256  ;;  %s5177_s9 = int_to_ptr.hbm [resolvable:$true] %s5176_s9 }
  0x1b   : > { %s5178_s10 = scalar_lea.hbm %s5177_s9, 128  ;;  %p5180_p10 = pneg %p5398_p9 }
  0x1c   : > { %p5179_p2 = scmp.ne.s32.totalorder %s5177_s9, %s5178_s10  ;;  %p5184_p0 = scmp.lt.s32.totalorder %s5177_s9, %s7880_s0 }
  0x1d   : > { %p5185_p3 = scmp.lt.s32.totalorder %s5183_s16, %s5178_s10 }
  0x1e   : > { %p5181_p12 = pnand %p5180_p10, %p5179_p2 }
  0x1f   : > { %p5186_p5 = por %p5185_p3, %p5184_p0 }
  0x20   : > { %p5182_p13 = pneg %p5181_p12 }
  0x22   : > { %p5187_p11 = pnand %p5186_p5, %p5182_p13 }
  0x24   : > { %5190 = shalt.err (!%p5187_p11)
}
  0x25   : > { %s5281_s14 = smov 64   ;;  %s5282_s26 = smov 4  }
  0x26   : > { %4637 = dma.hbm_to_vmem [thread:$0]  (!%p5398_p9), %s210_s27, 2048, %s212_s30, %s200_s8, %s5281_s14, %s5281_s14, %s5282_s26  }
  0x27   : > { %223 = sbr.rel (%p5363_p8) target bundleno = 2069 (0x815), region = 40 }
  0x2c   : > { %s5415_s28 = sand.u32 1, %s5268_s19  }
  0x2d   : > { %s4354_s11 = sshll.u32 %s5415_s28, 7  ;;  %s226_s9 = scalar_lea.sflag [#allocation3], %s5415_s28 }
  0x2e   : > { %s5419_s10 = scalar_lea.vmem [#allocation2], %s4354_s11 }
  0x2f   : > { %5251 = dma.done.wait (%p5350_p4), %s226_s9, 2048  }
  0x30   : > { %5253 = vsyncadd (%p5350_p4), %s226_s9, 4294965248 }
  0x31   : > { %5255 = dma.done.wait (%p43_p1), [#allocation6], 2048  }
  0x32   : > { %5257 = vsyncadd (%p43_p1), [#allocation6], 4294965248  ;;  %v4609_v0 = vld [vmem:[#allocation5 + $0x74] sm:$0xf]  ;;  %v4481_v1 = vld [vmem:[#allocation5 + $0x78] sm:$0xf0] }
  0x33   : > { %v4607_v2 = vld [vmem:[#allocation5 + $0x64] sm:$0xf]  ;;  %v4484_v3 = vor.u32 %v4609_v0, %v4481_v1  ;;  %v4473_v4 = vld [vmem:[#allocation5 + $0x68] sm:$0xf0]  ;;  %v4605_v6 = vld [vmem:[#allocation5 + $0x54] sm:$0xf] }
  0x34   : > { %v4476_v5 = vor.u32 %v4607_v2, %v4473_v4  ;;  %v4465_v7 = vld [vmem:[#allocation5 + $0x58] sm:$0xf0]  ;;  %v4603_v9 = vld [vmem:[#allocation5 + $0x44] sm:$0xf]  ;;  %v4457_v10 = vld [vmem:[#allocation5 + $0x48] sm:$0xf0] }
  0x35   : > { %584 = vmatpush.bf16.msra.mxu1 %v4484_v3  ;;  %v4468_v8 = vor.u32 %v4605_v6, %v4465_v7  ;;  %v4460_v11 = vor.u32 %v4603_v9, %v4457_v10  ;;  %v4601_v12 = vld [vmem:[#allocation5 + $0x34] sm:$0xf]  ;;  %v4449_v13 = vld [vmem:[#allocation5 + $0x38] sm:$0xf0]  ;;  %v4599_v15 = vld [vmem:[#allocation5 + $0x24] sm:$0xf] }
  0x36   : > { %v4452_v14 = vor.u32 %v4601_v12, %v4449_v13  ;;  %v4441_v16 = vld [vmem:[#allocation5 + $0x28] sm:$0xf0]  ;;  %v4597_v18 = vld [vmem:[#allocation5 + $0x14] sm:$0xf]  ;;  %v4433_v19 = vld [vmem:[#allocation5 + $0x18] sm:$0xf0] }
  0x37   : > { %v4444_v17 = vor.u32 %v4599_v15, %v4441_v16  ;;  %v4436_v20 = vor.u32 %v4597_v18, %v4433_v19  ;;  %v4595_v21 = vld [vmem:[#allocation5 + $0x4] sm:$0xf]  ;;  %v4425_v22 = vld [vmem:[#allocation5 + $0x8] sm:$0xf0]  ;;  %v4581_v26 = vld [vmem:[%s5419_s10 + $0x10] sm:$0xff]  ;;  %vm673_vm0 = vcmask 31744  }
  0x38   : > { %v4428_v23 = vor.u32 %v4595_v21, %v4425_v22  ;;  %v4579_v24 = vld [vmem:[%s5419_s10] sm:$0xff]  ;;  %v4580_v25 = vld [vmem:[%s5419_s10 + $0x8] sm:$0xff]  ;;  %v4582_v27 = vld [vmem:[%s5419_s10 + $0x18] sm:$0xff]  ;;  %v5283_v45 = vmov 4   ;;  %s4356_s14 = sshll.u32 %s5415_s28, 8  ;;  %s4248_s30 = scalar_lea.sflag [#allocation4], %s5415_s28 }
  0x39   : > { %585 = vmatpush.bf16.msra.mxu1 %v4476_v5  ;;  %v4583_v28 = vld [vmem:[%s5419_s10 + $0x20] sm:$0xff]  ;;  %v4584_v29 = vld [vmem:[%s5419_s10 + $0x28] sm:$0xff]  ;;  %v4585_v30 = vld [vmem:[%s5419_s10 + $0x30] sm:$0xff]  ;;  %4692 = vset.pattern.permute.xlu0 %v5283_v45  ;;  %s6956_s26 = scalar_lea.vmem [#allocation7], %s4356_s14  ;;  %s5226_s16 = scalar_lea.hbm %s7885_s5, 512 }
  0x3a   : > { %v313_v31 = vld [vmem:[%s7882_s2] sm:$0x3]  ;;  %v4586_v33 = vld [vmem:[%s5419_s10 + $0x38] sm:$0xff]  ;;  %4690 = vset.pattern.permute.xlu1 %v5283_v45  ;;  %4691 = vset.pattern.permute.xlu2 %v5283_v45  ;;  %s4260_s29 = sshll.u32 %s6956_s26, 4  ;;  %s4261_s29 = int_to_ptr.vmem [resolvable:$true] %s4260_s29 }
  0x3b   : > { %v5439_v32 = vperm.slane %v313_v31, 1  ;;  %v4587_v31 = vld [vmem:[%s5419_s10 + $0x40] sm:$0xff] }
  0x3d   : > { %586 = vmatpush.bf16.msra.mxu1 %v4468_v8 }
  0x41   : > { %587 = vmatpush.bf16.msra.mxu1 %v4460_v11 }
  0x45   : > { %588 = vmatpush.bf16.msra.mxu1 %v4452_v14 }
  0x49   : > { %589 = vmatpush.bf16.msra.mxu1 %v4444_v17 }
  0x4d   : > { %590 = vmatpush.bf16.msra.mxu1 %v4436_v20 }
  0x51   : > { %591 = vmatpush.bf16.msra.mxu1 %v4428_v23 }
  0x54   : > { %592 = vmatmul.bf16.vlgmr.msra.gmra.mxu1 %v4579_v24 }
  0x64   : > { %597 = vmatmul.bf16.gmra.mxu1 %v4580_v25 }
  0x74   : > { %602 = vmatmul.bf16.gmra.mxu1 %v4581_v26 }
  0x84   : > { %607 = vmatmul.bf16.gmra.mxu1 %v4582_v27 }
  0x94   : > { %612 = vmatmul.bf16.gmra.mxu1 %v4583_v28 }
  0xa4   : > { %617 = vmatmul.bf16.gmra.mxu1 %v4584_v29 }
  0xb4   : > { %622 = vmatmul.bf16.gmra.mxu1 %v4585_v30 }
  0xc4   : > { %627 = vmatmul.bf16.gmra.mxu1 %v4586_v33 }
  0xd1   : > { %v593_v34 = vpop.f32.mrf.mxu1 }
  0xd2   : > { %v5443_v35 = vadd.f32 %v593_v34, %v5439_v32 }
  0xd4   : > { %v4485_v36 = vmul.f32 -1.442695, %v5443_v35  ;;  %v674_v37 = vsel %vm673_vm0, %v5443_v35, -inf  ;;  %632 = vmatmul.bf16.gmra.mxu1 %v4587_v31 }
  0xd5   : > { %675 = vmax.xlane.f32.xlu0 %v674_v37 }
  0xd6   : > { %4807 = vpow2.f32 %v4485_v36 }
  0xd9   : > { %v595_v38 = vpop.f32.mrf.mxu1 }
  0xda   : > { %v5449_v39 = vadd.f32 %v595_v38, %v5439_v32 }
  0xdc   : > { %v4486_v40 = vmul.f32 -1.442695, %v5449_v39  ;;  %v677_v41 = vsel %vm673_vm0, %v5449_v39, -inf  ;;  %v4808_v42 = vpop.eup %4807 }
  0xdd   : > { %678 = vmax.xlane.f32.xlu0 %v677_v41  ;;  %v1538_v43 = vadd.f32 1.0, %v4808_v42  ;;  %v4588_v42 = vld [vmem:[%s5419_s10 + $0x48] sm:$0xff] }
  0xde   : > { %4809 = vpow2.f32 %v4486_v40 }
  0xdf   : > { %4811 = vrcp.f32 %v1538_v43  ;;  %vm1575_vm3 = vweird.f32 %v1538_v43  ;;  %v1581_v10 = vand.u32 2147483648, %v1538_v43  ;;  %v1579_v12 = vand.u32 2147483647, %v1538_v43 }
  0xe1   : > { %v598_v44 = vpop.f32.mrf.mxu1  ;;  %v1582_v18 = vor.u32 1.1754944e-38, %v1581_v10  ;;  %vm1580_vm8 = vcmp.eq.f32.partialorder %v1579_v12, 8.507059e+37 }
  0xe2   : > { %v5455_v46 = vadd.f32 %v598_v44, %v5439_v32 }
  0xe4   : > { %v4487_v47 = vmul.f32 -1.442695, %v5455_v46  ;;  %v680_v48 = vsel %vm673_vm0, %v5455_v46, -inf  ;;  %v4810_v49 = vpop.eup %4809  ;;  %637 = vmatmul.bf16.gmra.mxu1 %v4588_v42 }
  0xe5   : > { %681 = vmax.xlane.f32.xlu1 %v680_v48  ;;  %v1539_v50 = vadd.f32 1.0, %v4810_v49  ;;  %v4812_v53 = vpop.eup %4811 }
  0xe6   : > { %4813 = vpow2.f32 %v4487_v47  ;;  %v1571_v57 = vmul.f32 %v4812_v53, %v1538_v43  ;;  %vm1576_vm1 = vweird.f32 %v4812_v53 }
  0xe7   : > { %4815 = vrcp.f32 %v1539_v50  ;;  %vm1577_vm5 = vmor %vm1575_vm3, %vm1576_vm1  ;;  %v1596_v23 = vand.u32 2147483648, %v1539_v50  ;;  %vm1590_vm10 = vweird.f32 %v1539_v50  ;;  %v1594_v24 = vand.u32 2147483647, %v1539_v50 }
  0xe8   : > { %v1572_v61 = vsub.f32 1.0, %v1571_v57 }
  0xe9   : > { %v600_v51 = vpop.f32.mrf.mxu1  ;;  %v1597_v27 = vor.u32 1.1754944e-38, %v1596_v23  ;;  %vm1595_vm12 = vcmp.eq.f32.partialorder %v1594_v24, 8.507059e+37 }
  0xea   : > { %v5461_v52 = vadd.f32 %v600_v51, %v5439_v32  ;;  %v1573_v2 = vmul.f32 %v4812_v53, %v1572_v61 }
  0xec   : > { %v4814_v54 = vpop.eup %4813  ;;  %v683_v55 = vsel %vm673_vm0, %v5461_v52, -inf  ;;  %v1574_v9 = vadd.f32 %v4812_v53, %v1573_v2  ;;  %v4488_v38 = vmul.f32 -1.442695, %v5461_v52 }
  0xed   : > { %v1540_v56 = vadd.f32 1.0, %v4814_v54  ;;  %684 = vmax.xlane.f32.xlu1 %v683_v55  ;;  %v4816_v59 = vpop.eup %4815 }
  0xee   : > { %v1586_v0 = vmul.f32 %v4816_v59, %v1539_v50  ;;  %v1578_v16 = vsel %vm1577_vm5, %v4812_v53, %v1574_v9  ;;  %vm1591_vm9 = vweird.f32 %v4816_v59 }
  0xef   : > { %4817 = vrcp.f32 %v1540_v56  ;;  %v1611_v5 = vand.u32 2147483648, %v1540_v56  ;;  %v1609_v8 = vand.u32 2147483647, %v1540_v56  ;;  %vm1605_vm4 = vweird.f32 %v1540_v56  ;;  %vm1592_vm11 = vmor %vm1590_vm10, %vm1591_vm9 }
  0xf0   : > { %v1587_v6 = vsub.f32 1.0, %v1586_v0  ;;  %v1583_v20 = vsel %vm1580_vm8, %v1582_v18, %v1578_v16 }
  0xf1   : > { %v603_v58 = vpop.f32.mrf.mxu1  ;;  %v1612_v13 = vor.u32 1.1754944e-38, %v1611_v5  ;;  %vm1610_vm7 = vcmp.eq.f32.partialorder %v1609_v8, 8.507059e+37  ;;  %v2050_v25 = vmul.f32 0.25, %v1583_v20 }
  0xf2   : > { %v5466_v60 = vadd.f32 %v603_v58, %v5439_v32  ;;  %v1588_v14 = vmul.f32 %v4816_v59, %v1587_v6 }
  0xf4   : > { %v686_v62 = vsel %vm673_vm0, %v5466_v60, -inf  ;;  %v1589_v22 = vadd.f32 %v4816_v59, %v1588_v14  ;;  %v4489_v34 = vmul.f32 -1.442695, %v5466_v60 }
  0xf5   : > { %v4818_v63 = vpop.eup %4817  ;;  %687 = vmax.xlane.f32.xlu2 %v686_v62 }
  0xf6   : > { %v1601_v1 = vmul.f32 %v4818_v63, %v1540_v56  ;;  %vm1606_vm2 = vweird.f32 %v4818_v63  ;;  %v1593_v26 = vsel %vm1592_vm11, %v4816_v59, %v1589_v22  ;;  %4819 = vpow2.f32 %v4489_v34 }
  0xf7   : > { %vm1607_vm6 = vmor %vm1605_vm4, %vm1606_vm2  ;;  %v1598_v28 = vsel %vm1595_vm12, %v1597_v27, %v1593_v26  ;;  %4821 = vpow2.f32 %v4488_v38 }
  0xf8   : > { %v1602_v3 = vsub.f32 1.0, %v1601_v1  ;;  %v2051_v30 = vmul.f32 0.25, %v1598_v28 }
  0xf9   : > { %v5470_v4 = vpop.f32.mrf.mxu1 }
  0xfa   : > { %v1603_v7 = vmul.f32 %v4818_v63, %v1602_v3  ;;  %v5510_v2 = vadd.f32 %v5470_v4, %v5439_v32 }
  0xfc   : > { %v1604_v11 = vadd.f32 %v4818_v63, %v1603_v7  ;;  %v4820_v44 = vpop.eup %4819  ;;  %v689_v3 = vsel %vm673_vm0, %v5510_v2, -inf }
  0xfd   : > { %v1542_v47 = vadd.f32 1.0, %v4820_v44  ;;  %v4822_v48 = vpop.eup %4821 }
  0xfe   : > { %v1608_v15 = vsel %vm1607_vm6, %v4818_v63, %v1604_v11  ;;  %v5488_v50 = vadd.f32 1.0, %v4822_v48 }
  0xff   : > { %v1613_v17 = vsel %vm1610_vm7, %v1612_v13, %v1608_v15  ;;  %vm1635_vm13 = vweird.f32 %v1542_v47  ;;  %v1641_v14 = vand.u32 2147483648, %v1542_v47  ;;  %v1639_v16 = vand.u32 2147483647, %v1542_v47 }
 0x100   : > { %v2052_v19 = vmul.f32 0.25, %v1613_v17  ;;  %v1626_v28 = vand.u32 2147483648, %v5488_v50  ;;  %vm1620_vm8 = vweird.f32 %v5488_v50  ;;  %v1624_v31 = vand.u32 2147483647, %v5488_v50 }
 0x101   : > { %v608_v21 = vpop.f32.mrf.mxu1  ;;  %vm1640_vm3 = vcmp.eq.f32.partialorder %v1639_v16, 8.507059e+37 }
 0x102   : > { %2094 = vperm.xlu0 %4692, %v2052_v19   ;;  %v5481_v40 = vadd.f32 %v608_v21, %v5439_v32  ;;  %v1642_v21 = vor.u32 1.1754944e-38, %v1641_v14  ;;  %vm1625_vm12 = vcmp.eq.f32.partialorder %v1624_v31, 8.507059e+37 }
 0x104   : > { %v4491_v43 = vmul.f32 -1.442695, %v5481_v40  ;;  %v692_v55 = vsel %vm673_vm0, %v5481_v40, -inf }
 0x106   : > { %2084 = vperm.xlu1 %4690, %v2050_v25  }
 0x109   : > { %v610_v29 = vpop.f32.mrf.mxu1 }
 0x10a   : > { %v5500_v57 = vadd.f32 %v610_v29, %v5439_v32 }
 0x10c   : > { %v695_v59 = vsel %vm673_vm0, %v5500_v57, -inf }
 0x10d   : > { %2089 = vperm.xlu2 %4691, %v2051_v30  }
 0x111   : > { %v5473_v33 = vpop.f32.mrf.mxu1 }
 0x119   : > { %v615_v36 = vpop.f32.mrf.mxu1 }
 0x11a   : > { %v5477_v37 = vadd.f32 %v615_v36, %v5439_v32 }
 0x11c   : > { %v4494_v41 = vmul.f32 -1.442695, %v5477_v37  ;;  %v701_v61 = vsel %vm673_vm0, %v5477_v37, -inf }
 0x11e   : > { %4823 = vpow2.f32 %v4494_v41 }
 0x11f   : > { %4825 = vpow2.f32 %v4491_v43 }
 0x120   : > { %4827 = vrcp.f32 %v1542_v47 }
 0x121   : > { %v5486_v45 = vpop.f32.mrf.mxu1  ;;  %4829 = vrcp.f32 %v5488_v50 }
 0x122   : > { %v5567_v18 = vadd.f32 %v5486_v45, %v5439_v32 }
 0x124   : > { %v4824_v49 = vpop.eup %4823 }
 0x125   : > { %v4826_v51 = vpop.eup %4825  ;;  %v5490_v53 = vadd.f32 1.0, %v4824_v49 }
 0x126   : > { %v5497_v56 = vadd.f32 1.0, %v4826_v51  ;;  %v4828_v58 = vpop.eup %4827 }
 0x127   : > { %4831 = vrcp.f32 %v5490_v53  ;;  %v1631_v62 = vmul.f32 %v4828_v58, %v1542_v47  ;;  %v4830_v63 = vpop.eup %4829  ;;  %vm1636_vm14 = vweird.f32 %v4828_v58  ;;  %vm1710_vm1 = vweird.f32 %v5490_v53 }
 0x128   : > { %4833 = vrcp.f32 %v5497_v56  ;;  %v1616_v8 = vmul.f32 %v4830_v63, %v5488_v50  ;;  %vm5522_vm15 = vmor %vm1635_vm13, %vm1636_vm14  ;;  %v1716_v23 = vand.u32 2147483648, %v5490_v53  ;;  %vm1621_vm4 = vweird.f32 %v4830_v63 }
 0x129   : > { %v5492_v54 = vpop.f32.mrf.mxu1  ;;  %v1632_v6 = vsub.f32 1.0, %v1631_v62  ;;  %v1714_v27 = vand.u32 2147483647, %v5490_v53  ;;  %vm1665_vm6 = vweird.f32 %v5497_v56  ;;  %v1671_v34 = vand.u32 2147483648, %v5497_v56  ;;  %vm1622_vm9 = vmor %vm1620_vm8, %vm1621_vm4 }
 0x12a   : > { %v1617_v12 = vsub.f32 1.0, %v1616_v8  ;;  %v1717_v36 = vor.u32 1.1754944e-38, %v1716_v23  ;;  %v1669_v41 = vand.u32 2147483647, %v5497_v56  ;;  %v1627_v47 = vor.u32 1.1754944e-38, %v1626_v28 }
 0x12b   : > { %v1633_v11 = vmul.f32 %v4828_v58, %v1632_v6  ;;  %vm1715_vm10 = vcmp.eq.f32.partialorder %v1714_v27, 8.507059e+37  ;;  %v1672_v48 = vor.u32 1.1754944e-38, %v1671_v34  ;;  %v4492_v6 = vmul.f32 -1.442695, %v5500_v57 }
 0x12c   : > { %693 = vmax.xlane.f32.xlu0 %v692_v55  ;;  %v1618_v19 = vmul.f32 %v4830_v63, %v1617_v12  ;;  %vm1670_vm13 = vcmp.eq.f32.partialorder %v1669_v41, 8.507059e+37 }
 0x12d   : > { %v4832_v1 = vpop.eup %4831  ;;  %v1634_v15 = vadd.f32 %v4828_v58, %v1633_v11 }
 0x12e   : > { %v4834_v7 = vpop.eup %4833  ;;  %v1706_v9 = vmul.f32 %v4832_v1, %v5490_v53  ;;  %vm1711_vm2 = vweird.f32 %v4832_v1  ;;  %v1619_v25 = vadd.f32 %v4830_v63, %v1618_v19 }
 0x12f   : > { %v1661_v4 = vmul.f32 %v4834_v7, %v5497_v56  ;;  %v1638_v22 = vsel %vm5522_vm15, %v4828_v58, %v1634_v15  ;;  %vm5532_vm5 = vmor %vm1710_vm1, %vm1711_vm2  ;;  %vm1666_vm7 = vweird.f32 %v4834_v7 }
 0x130   : > { %696 = vmax.xlane.f32.xlu1 %v695_v59  ;;  %v1707_v13 = vsub.f32 1.0, %v1706_v9  ;;  %v1643_v30 = vsel %vm1640_vm3, %v1642_v21, %v1638_v22  ;;  %v1623_v42 = vsel %vm1622_vm9, %v4830_v63, %v1619_v25  ;;  %vm1667_vm11 = vmor %vm1665_vm6, %vm1666_vm7  ;;  %v4490_v63 = vmul.f32 -1.442695, %v5510_v2 }
 0x131   : > { %v623_v0 = vpop.f32.mrf.mxu1  ;;  %v1662_v17 = vsub.f32 1.0, %v1661_v4  ;;  %v2054_v44 = vmul.f32 0.25, %v1643_v30  ;;  %v1628_v49 = vsel %vm1625_vm12, %v1627_v47, %v1623_v42  ;;  %v704_v22 = vsel %vm673_vm0, %v5567_v18, -inf }
 0x132   : > { %v5515_v5 = vadd.f32 %v623_v0, %v5439_v32  ;;  %v1708_v20 = vmul.f32 %v4832_v1, %v1707_v13  ;;  %v2053_v53 = vmul.f32 0.25, %v1628_v49  ;;  %v5550_v0 = vadd.f32 %v5473_v33, %v5439_v32 }
 0x133   : > { %v1663_v24 = vmul.f32 %v4834_v7, %v1662_v17 }
 0x134   : > { %702 = vmax.xlane.f32.xlu0 %v701_v61  ;;  %v710_v10 = vsel %vm673_vm0, %v5515_v5, -inf  ;;  %v1709_v26 = vadd.f32 %v4832_v1, %v1708_v20  ;;  %v4497_v59 = vmul.f32 -1.442695, %v5515_v5  ;;  %v4589_v61 = vld [vmem:[%s5419_s10 + $0x50] sm:$0xff]  ;;  %v698_v19 = vsel %vm673_vm0, %v5550_v0, -inf }
 0x135   : > { %v1664_v38 = vadd.f32 %v4834_v7, %v1663_v24  ;;  %642 = vmatmul.bf16.gmra.mxu1 %v4589_v61 }
 0x136   : > { %690 = vmax.xlane.f32.xlu2 %v689_v3  ;;  %v1713_v43 = vsel %vm5532_vm5, %v4832_v1, %v1709_v26  ;;  %4835 = vpow2.f32 %v4497_v59  ;;  %v4493_v1 = vmul.f32 -1.442695, %v5550_v0 }
 0x137   : > { %v1718_v50 = vsel %vm1715_vm10, %v1717_v36, %v1713_v43  ;;  %v1668_v51 = vsel %vm1667_vm11, %v4834_v7, %v1664_v38  ;;  %4837 = vpow2.f32 %v4490_v63 }
 0x138   : > { %v2059_v55 = vmul.f32 0.25, %v1718_v50  ;;  %v1673_v58 = vsel %vm1670_vm13, %v1672_v48, %v1668_v51  ;;  %4839 = vpow2.f32 %v4493_v1 }
 0x139   : > { %v2056_v56 = vmul.f32 0.25, %v1673_v58  ;;  %v5545_v62 = vpop.f32.mrf.mxu1  ;;  %4841 = vpow2.f32 %v4492_v6 }
 0x13c   : > { %711 = vmax.xlane.f32.xlu0 %v710_v10  ;;  %v4836_v3 = vpop.eup %4835 }
 0x13d   : > { %v4838_v8 = vpop.eup %4837  ;;  %v1550_v9 = vadd.f32 1.0, %v4836_v3 }
 0x13e   : > { %v1543_v10 = vadd.f32 1.0, %v4838_v8  ;;  %v4840_v11 = vpop.eup %4839 }
 0x13f   : > { %4843 = vrcp.f32 %v1550_v9  ;;  %v4842_v4 = vpop.eup %4841  ;;  %v5556_v33 = vadd.f32 1.0, %v4840_v11  ;;  %vm1755_vm14 = vweird.f32 %v1550_v9  ;;  %v1761_v28 = vand.u32 2147483648, %v1550_v9 }
 0x140   : > { %4845 = vrcp.f32 %v1543_v10  ;;  %v5558_v14 = vadd.f32 1.0, %v4842_v4  ;;  %v1759_v34 = vand.u32 2147483647, %v1550_v9  ;;  %vm1650_vm2 = vweird.f32 %v1543_v10 }
 0x141   : > { %v5554_v7 = vpop.f32.mrf.mxu1  ;;  %4847 = vrcp.f32 %v5556_v33  ;;  %v1654_v41 = vand.u32 2147483647, %v1543_v10  ;;  %v1656_v42 = vand.u32 2147483648, %v1543_v10  ;;  %v1762_v43 = vor.u32 1.1754944e-38, %v1761_v28 }
 0x142   : > { %4849 = vrcp.f32 %v5558_v14  ;;  %vm1760_vm4 = vcmp.eq.f32.partialorder %v1759_v34, 8.507059e+37  ;;  %vm1695_vm7 = vweird.f32 %v5556_v33  ;;  %v1701_v58 = vand.u32 2147483648, %v5556_v33 }
 0x143   : > { %vm1655_vm6 = vcmp.eq.f32.partialorder %v1654_v41, 8.507059e+37  ;;  %v1657_v51 = vor.u32 1.1754944e-38, %v1656_v42  ;;  %v1699_v61 = vand.u32 2147483647, %v5556_v33  ;;  %vm1680_vm10 = vweird.f32 %v5558_v14 }
 0x144   : > { %v1686_v6 = vand.u32 2147483648, %v5558_v14  ;;  %v1702_v8 = vor.u32 1.1754944e-38, %v1701_v58 }
 0x145   : > { %v4844_v13 = vpop.eup %4843  ;;  %vm1700_vm12 = vcmp.eq.f32.partialorder %v1699_v61, 8.507059e+37 }
 0x146   : > { %v4846_v16 = vpop.eup %4845  ;;  %v1751_v17 = vmul.f32 %v4844_v13, %v1550_v9  ;;  %vm1756_vm15 = vweird.f32 %v4844_v13 }
 0x147   : > { %v1646_v21 = vmul.f32 %v4846_v16, %v1543_v10  ;;  %v4848_v24 = vpop.eup %4847  ;;  %vm5577_vm1 = vmor %vm1755_vm14, %vm1756_vm15  ;;  %vm1651_vm3 = vweird.f32 %v4846_v16  ;;  %v1684_v10 = vand.u32 2147483647, %v5558_v14 }
 0x148   : > { %v1752_v23 = vsub.f32 1.0, %v1751_v17  ;;  %v4850_v26 = vpop.eup %4849  ;;  %v1691_v45 = vmul.f32 %v4848_v24, %v5556_v33  ;;  %vm5583_vm5 = vmor %vm1650_vm2, %vm1651_vm3  ;;  %vm1696_vm8 = vweird.f32 %v4848_v24  ;;  %v1687_v33 = vor.u32 1.1754944e-38, %v1686_v6 }
 0x149   : > { %2104 = vperm.xlu1 %4690, %v2054_v44   ;;  %v630_v12 = vpop.f32.mrf.mxu1  ;;  %v1647_v25 = vsub.f32 1.0, %v1646_v21  ;;  %v1676_v30 = vmul.f32 %v4850_v26, %v5558_v14  ;;  %vm5592_vm9 = vmor %vm1695_vm7, %vm1696_vm8  ;;  %vm1681_vm11 = vweird.f32 %v4850_v26  ;;  %vm1685_vm14 = vcmp.eq.f32.partialorder %v1684_v10, 8.507059e+37  ;;  %v4590_v14 = vld [vmem:[%s5419_s10 + $0x58] sm:$0xff] }
 0x14a   : > { %v5562_v15 = vadd.f32 %v630_v12, %v5439_v32  ;;  %v1753_v27 = vmul.f32 %v4844_v13, %v1752_v23  ;;  %v1692_v36 = vsub.f32 1.0, %v1691_v45  ;;  %vm1682_vm13 = vmor %vm1680_vm10, %vm1681_vm11  ;;  %647 = vmatmul.bf16.gmra.mxu1 %v4590_v14  ;;  %v4591_v45 = vld [vmem:[%s5419_s10 + $0x60] sm:$0xff] }
 0x14b   : > { %v1648_v29 = vmul.f32 %v4846_v16, %v1647_v25  ;;  %v1677_v47 = vsub.f32 1.0, %v1676_v30 }
 0x14c   : > { %v719_v20 = vsel %vm673_vm0, %v5562_v15, -inf  ;;  %v1754_v31 = vadd.f32 %v4844_v13, %v1753_v27  ;;  %v1693_v50 = vmul.f32 %v4848_v24, %v1692_v36  ;;  %v4500_v21 = vmul.f32 -1.442695, %v5562_v15 }
 0x14d   : > { %v1649_v44 = vadd.f32 %v4846_v16, %v1648_v29 }
 0x14e   : > { %2099 = vperm.xlu2 %4691, %v2053_v53   ;;  %v1758_v48 = vsel %vm5577_vm1, %v4844_v13, %v1754_v31  ;;  %v1694_v59 = vadd.f32 %v4848_v24, %v1693_v50  ;;  %4851 = vpow2.f32 %v4500_v21 }
 0x14f   : > { %v1763_v53 = vsel %vm1760_vm4, %v1762_v43, %v1758_v48  ;;  %v5626_v48 = vadd.f32 %v5545_v62, %v5439_v32 }
 0x150   : > { %2129 = vperm.xlu0 %4692, %v2059_v55   ;;  %v1653_v55 = vsel %vm5583_vm5, %v4846_v16, %v1649_v44  ;;  %v2062_v1 = vmul.f32 0.25, %v1763_v53  ;;  %v1698_v11 = vsel %vm5592_vm9, %v4848_v24, %v1694_v59 }
 0x151   : > { %2114 = vperm.xlu1 %4690, %v2056_v56   ;;  %v1678_v56 = vmul.f32 %v4850_v26, %v1677_v47  ;;  %v1658_v3 = vsel %vm1655_vm6, %v1657_v51, %v1653_v55  ;;  %v1703_v12 = vsel %vm1700_vm12, %v1702_v8, %v1698_v11  ;;  %v5609_v23 = vpop.f32.mrf.mxu1  ;;  %v713_v51 = vsel %vm673_vm0, %v5626_v48, -inf }
 0x152   : > { %v2055_v4 = vmul.f32 0.25, %v1658_v3  ;;  %v2058_v16 = vmul.f32 0.25, %v1703_v12 }
 0x153   : > { %v1679_v9 = vadd.f32 %v4850_v26, %v1678_v56 }
 0x154   : > { %v4852_v28 = vpop.eup %4851 }
 0x155   : > { %v1683_v13 = vsel %vm1682_vm13, %v4850_v26, %v1679_v9  ;;  %v4495_v26 = vmul.f32 -1.442695, %v5567_v18 }
 0x156   : > { %v1688_v17 = vsel %vm1685_vm14, %v1687_v33, %v1683_v13 }
 0x159   : > { %v5615_v30 = vpop.f32.mrf.mxu1 }
 0x15a   : > { %652 = vmatmul.bf16.gmra.mxu1 %v4591_v45 }
 0x161   : > { %v638_v42 = vpop.f32.mrf.mxu1 }
 0x162   : > { %v5622_v44 = vadd.f32 %v638_v42, %v5439_v32 }
 0x164   : > { %v728_v53 = vsel %vm673_vm0, %v5622_v44, -inf }
 0x169   : > { %v5647_v42 = vpop.f32.mrf.mxu1 }
 0x177   : > { %699 = vmax.xlane.f32.xlu2 %v698_v19  ;;  %v2057_v19 = vmul.f32 0.25, %v1688_v17 }
 0x17a   : > { %720 = vmax.xlane.f32.xlu0 %v719_v20  ;;  %v5602_v20 = vpop.xlane.xlu0 %675 }
 0x17b   : > { %705 = vmax.xlane.f32.xlu1 %v704_v22  ;;  %v5607_v22 = vadd.f32 %v5492_v54, %v5439_v32  ;;  %v1553_v54 = vadd.f32 1.0, %v4852_v28 }
 0x17d   : > { %v4496_v25 = vmul.f32 -1.442695, %v5607_v22  ;;  %v707_v58 = vsel %vm673_vm0, %v5607_v22, -inf  ;;  %vm1800_vm15 = vweird.f32 %v1553_v54  ;;  %v1804_v6 = vand.u32 2147483647, %v1553_v54 }
 0x17f   : > { %4853 = vpow2.f32 %v4496_v25  ;;  %vm1805_vm5 = vcmp.eq.f32.partialorder %v1804_v6, 8.507059e+37 }
 0x180   : > { %4855 = vpow2.f32 %v4495_v26 }
 0x182   : > { %v679_v24 = vpop.xlane.xlu0 %678 }
 0x183   : > { %v771_v27 = vsub.f32 %v5449_v39, %v679_v24 }
 0x185   : > { %v804_v29 = vmul.f32 1.442695, %v771_v27  ;;  %v4854_v31 = vpop.eup %4853 }
 0x186   : > { %v4856_v34 = vpop.eup %4855  ;;  %v1549_v36 = vadd.f32 1.0, %v4854_v31  ;;  %v5642_v31 = vadd.f32 %v5554_v7, %v5439_v32 }
 0x187   : > { %4857 = vpow2.f32 %v804_v29  ;;  %v1548_v38 = vadd.f32 1.0, %v4856_v34  ;;  %v4503_v34 = vmul.f32 -1.442695, %v5622_v44 }
 0x188   : > { %4859 = vrcp.f32 %v1553_v54  ;;  %vm1740_vm3 = vweird.f32 %v1549_v36  ;;  %v1744_v13 = vand.u32 2147483647, %v1549_v36  ;;  %v716_v8 = vsel %vm673_vm0, %v5642_v31, -inf }
 0x189   : > { %4861 = vrcp.f32 %v1549_v36  ;;  %vm1725_vm6 = vweird.f32 %v1548_v38 }
 0x18a   : > { %4863 = vrcp.f32 %v1548_v38  ;;  %vm1745_vm10 = vcmp.eq.f32.partialorder %v1744_v13, 8.507059e+37 }
 0x18b   : > { %4865 = vpow2.f32 %v4503_v34 }
 0x18d   : > { %v5617_v41 = vpop.eup %4857 }
 0x18e   : > { %2144 = vperm.xlu0 %4692, %v2062_v1   ;;  %v4860_v39 = vpop.eup %4859  ;;  %v869_v43 = vsel %vm673_vm0, %v5617_v41, 0.0  ;;  %v1806_v1 = vand.u32 2147483648, %v1553_v54 }
 0x18f   : > { %2109 = vperm.xlu2 %4691, %v2055_v4   ;;  %v1796_v47 = vmul.f32 %v4860_v39, %v1553_v54  ;;  %v4862_v49 = vpop.eup %4861  ;;  %vm1801_vm1 = vweird.f32 %v4860_v39  ;;  %v1746_v4 = vand.u32 2147483648, %v1549_v36 }
 0x190   : > { %v4864_v50 = vpop.eup %4863  ;;  %v1736_v56 = vmul.f32 %v4862_v49, %v1549_v36  ;;  %vm5634_vm2 = vmor %vm1800_vm15, %vm1801_vm1  ;;  %v1807_v11 = vor.u32 1.1754944e-38, %v1806_v1  ;;  %vm1741_vm4 = vweird.f32 %v4862_v49  ;;  %v4592_v36 = vld [vmem:[%s5419_s10 + $0x68] sm:$0xff] }
 0x191   : > { %v1797_v55 = vsub.f32 1.0, %v1796_v47  ;;  %v1721_v59 = vmul.f32 %v4864_v50, %v1548_v38  ;;  %vm1726_vm7 = vweird.f32 %v4864_v50  ;;  %vm1742_vm8 = vmor %vm1740_vm3, %vm1741_vm4  ;;  %v1747_v21 = vor.u32 1.1754944e-38, %v1746_v4  ;;  %657 = vmatmul.bf16.gmra.mxu1 %v4592_v36 }
 0x192   : > { %v1737_v62 = vsub.f32 1.0, %v1736_v56  ;;  %vm1727_vm9 = vmor %vm1725_vm6, %vm1726_vm7  ;;  %v4498_v47 = vmul.f32 -1.442695, %v5626_v48 }
 0x193   : > { %v1798_v61 = vmul.f32 %v4860_v39, %v1797_v55  ;;  %v1722_v63 = vsub.f32 1.0, %v1721_v59 }
 0x194   : > { %2124 = vperm.xlu1 %4690, %v2058_v16   ;;  %v1738_v9 = vmul.f32 %v4862_v49, %v1737_v62  ;;  %v1731_v16 = vand.u32 2147483648, %v1548_v38  ;;  %v5659_v62 = vadd.f32 %v5609_v23, %v5439_v32 }
 0x195   : > { %v1799_v3 = vadd.f32 %v4860_v39, %v1798_v61  ;;  %v1723_v10 = vmul.f32 %v4864_v50, %v1722_v63 }
 0x196   : > { %v1739_v12 = vadd.f32 %v4862_v49, %v1738_v9  ;;  %v1732_v25 = vor.u32 1.1754944e-38, %v1731_v16 }
 0x197   : > { %2119 = vperm.xlu2 %4691, %v2057_v19   ;;  %v1803_v33 = vsel %vm5634_vm2, %v4860_v39, %v1799_v3  ;;  %v1724_v17 = vadd.f32 %v4864_v50, %v1723_v10  ;;  %v1729_v19 = vand.u32 2147483647, %v1548_v38  ;;  %v4499_v38 = vmul.f32 -1.442695, %v5642_v31  ;;  %v688_v39 = vpop.xlane.xlu2 %687 }
 0x198   : > { %v1808_v14 = vsel %vm1805_vm5, %v1807_v11, %v1803_v33  ;;  %v1743_v24 = vsel %vm1742_vm8, %v4862_v49, %v1739_v12  ;;  %v4866_v49 = vpop.eup %4865 }
 0x199   : > { %v2065_v26 = vmul.f32 0.25, %v1808_v14  ;;  %v1728_v27 = vsel %vm1727_vm9, %v4864_v50, %v1724_v17  ;;  %vm1730_vm11 = vcmp.eq.f32.partialorder %v1729_v19, 8.507059e+37  ;;  %v1748_v45 = vsel %vm1745_vm10, %v1747_v21, %v1743_v24 }
 0x19a   : > { %v1733_v28 = vsel %vm1730_vm11, %v1732_v25, %v1728_v27  ;;  %v2061_v29 = vmul.f32 0.25, %v1748_v45  ;;  %4867 = vpow2.f32 %v4499_v38 }
 0x19b   : > { %v2060_v54 = vmul.f32 0.25, %v1733_v28  ;;  %4869 = vpow2.f32 %v4498_v47 }
 0x1b2   : > { %v5651_v7 = vpop.f32.mrf.mxu1 }
 0x1b8   : > { %870 = vadd.xlane.f32.xlu0 %v869_v43  ;;  %v774_v43 = vsub.f32 %v5466_v60, %v688_v39 }
 0x1ba   : > { %v810_v50 = vmul.f32 1.442695, %v774_v43  ;;  %v645_v63 = vpop.f32.mrf.mxu1  ;;  %v682_v43 = vpop.xlane.xlu1 %681 }
 0x1bb   : > { %v5666_v6 = vadd.f32 %v645_v63, %v5439_v32 }
 0x1bc   : > { %4871 = vpow2.f32 %v810_v50 }
 0x1bd   : > { %v737_v10 = vsel %vm673_vm0, %v5666_v6, -inf }
 0x1be   : > { %714 = vmax.xlane.f32.xlu1 %v713_v51  ;;  %v4868_v51 = vpop.eup %4867 }
 0x1bf   : > { %v1552_v55 = vadd.f32 1.0, %v4868_v51  ;;  %v4870_v56 = vpop.eup %4869 }
 0x1c0   : > { %708 = vmax.xlane.f32.xlu2 %v707_v58  ;;  %729 = vmax.xlane.f32.xlu0 %v728_v53  ;;  %v1556_v53 = vadd.f32 1.0, %v4866_v49  ;;  %v770_v58 = vsub.f32 %v5443_v35, %v5602_v20  ;;  %v1551_v61 = vadd.f32 1.0, %v4870_v56  ;;  %v722_v35 = vsel %vm673_vm0, %v5659_v62, -inf }
 0x1c1   : > { %vm1785_vm14 = vweird.f32 %v1552_v55  ;;  %v1791_v25 = vand.u32 2147483648, %v1552_v55  ;;  %v1789_v45 = vand.u32 2147483647, %v1552_v55 }
 0x1c2   : > { %4873 = vrcp.f32 %v1556_v53  ;;  %v5655_v59 = vpop.eup %4871  ;;  %v802_v60 = vmul.f32 1.442695, %v770_v58  ;;  %vm1845_vm12 = vweird.f32 %v1556_v53  ;;  %v1851_v14 = vand.u32 2147483648, %v1556_v53 }
 0x1c3   : > { %4875 = vrcp.f32 %v1552_v55  ;;  %7944 = vst [vmem:[#allocation11_spill] sm:$0xff] %v5655_v59  ;;  %v878_v3 = vsel %vm673_vm0, %v5655_v59, 0.0  ;;  %v1849_v24 = vand.u32 2147483647, %v1556_v53  ;;  %vm1790_vm4 = vcmp.eq.f32.partialorder %v1789_v45, 8.507059e+37 }
 0x1c4   : > { %4877 = vpow2.f32 %v802_v60  ;;  %v1852_v28 = vor.u32 1.1754944e-38, %v1851_v14  ;;  %vm1770_vm5 = vweird.f32 %v1551_v61  ;;  %v1776_v39 = vand.u32 2147483648, %v1551_v61  ;;  %v685_v60 = vpop.xlane.xlu1 %684 }
 0x1c5   : > { %4879 = vrcp.f32 %v1551_v61  ;;  %vm1850_vm3 = vcmp.eq.f32.partialorder %v1849_v24, 8.507059e+37  ;;  %v1774_v50 = vand.u32 2147483647, %v1551_v61  ;;  %v773_v14 = vsub.f32 %v5461_v52, %v685_v60 }
 0x1c6   : > { %v5707_v52 = vadd.f32 %v5647_v42, %v5439_v32 }
 0x1c7   : > { %vm1775_vm8 = vcmp.eq.f32.partialorder %v1774_v50, 8.507059e+37 }
 0x1c8   : > { %v4874_v1 = vpop.eup %4873 }
 0x1c9   : > { %v4876_v20 = vpop.eup %4875  ;;  %v1841_v23 = vmul.f32 %v4874_v1, %v1556_v53  ;;  %vm1846_vm13 = vweird.f32 %v4874_v1 }
 0x1ca   : > { %v1781_v9 = vmul.f32 %v4876_v20, %v1552_v55  ;;  %v5672_v4 = vpop.eup %4877  ;;  %vm1786_vm15 = vweird.f32 %v4876_v20  ;;  %vm1847_vm1 = vmor %vm1845_vm12, %vm1846_vm13  ;;  %v1777_v55 = vor.u32 1.1754944e-38, %v1776_v39 }
 0x1cb   : > { %v1842_v11 = vsub.f32 1.0, %v1841_v23  ;;  %v4880_v33 = vpop.eup %4879  ;;  %v866_v13 = vsel %vm673_vm0, %v5672_v4, 0.0  ;;  %vm1787_vm2 = vmor %vm1785_vm14, %vm1786_vm15  ;;  %v772_v23 = vsub.f32 %v5455_v46, %v682_v43 }
 0x1cc   : > { %v1782_v12 = vsub.f32 1.0, %v1781_v9  ;;  %v1766_v17 = vmul.f32 %v4880_v33, %v1551_v61  ;;  %vm1771_vm6 = vweird.f32 %v4880_v33  ;;  %v5680_v61 = vpop.f32.mrf.mxu1 }
 0x1cd   : > { %v1843_v16 = vmul.f32 %v4874_v1, %v1842_v11  ;;  %vm1772_vm7 = vmor %vm1770_vm5, %vm1771_vm6  ;;  %v4594_v11 = vld [vmem:[%s5419_s10 + $0x78] sm:$0xff] }
 0x1ce   : > { %v1783_v19 = vmul.f32 %v4876_v20, %v1782_v12 }
 0x1cf   : > { %v1844_v21 = vadd.f32 %v4874_v1, %v1843_v16  ;;  %v4501_v16 = vmul.f32 -1.442695, %v5659_v62 }
 0x1d0   : > { %v1784_v27 = vadd.f32 %v4876_v20, %v1783_v19 }
 0x1d2   : > { %v1788_v36 = vsel %vm1787_vm2, %v4876_v20, %v1784_v27 }
 0x1d4   : > { %2159 = vperm.xlu0 %4692, %v2065_v26   ;;  %v1767_v26 = vsub.f32 1.0, %v1766_v17  ;;  %v5691_v17 = vpop.f32.mrf.mxu1 }
 0x1d6   : > { %v1768_v34 = vmul.f32 %v4880_v33, %v1767_v26 }
 0x1d7   : > { %2139 = vperm.xlu1 %4690, %v2061_v29   ;;  %v1848_v29 = vsel %vm1847_vm1, %v4874_v1, %v1844_v21  ;;  %v4593_v1 = vld [vmem:[%s5419_s10 + $0x70] sm:$0xff] }
 0x1d8   : > { %2134 = vperm.xlu2 %4691, %v2060_v54   ;;  %v1792_v54 = vor.u32 1.1754944e-38, %v1791_v25  ;;  %v1853_v38 = vsel %vm1850_vm3, %v1852_v28, %v1848_v29  ;;  %v1769_v49 = vadd.f32 %v4880_v33, %v1768_v34  ;;  %662 = vmatmul.bf16.gmra.mxu1 %v4593_v1  ;;  %v808_v28 = vmul.f32 1.442695, %v773_v14 }
 0x1d9   : > { %v2068_v51 = vmul.f32 0.25, %v1853_v38 }
 0x1da   : > { %v1793_v47 = vsel %vm1790_vm4, %v1792_v54, %v1788_v36  ;;  %v1773_v58 = vsel %vm1772_vm7, %v4880_v33, %v1769_v49  ;;  %v806_v33 = vmul.f32 1.442695, %v772_v23 }
 0x1db   : > { %v2064_v53 = vmul.f32 0.25, %v1793_v47  ;;  %v1778_v56 = vsel %vm1775_vm8, %v1777_v55, %v1773_v58  ;;  %v731_v47 = vsel %vm673_vm0, %v5707_v52, -inf }
 0x1dc   : > { %v2063_v63 = vmul.f32 0.25, %v1778_v56  ;;  %v653_v25 = vpop.f32.mrf.mxu1 }
 0x1dd   : > { %v5703_v54 = vadd.f32 %v653_v25, %v5439_v32 }
 0x1df   : > { %7946 = vst [vmem:[#allocation13_spill] sm:$0xff] %v5703_v54  ;;  %v746_v38 = vsel %vm673_vm0, %v5703_v54, -inf }
 0x1e8   : > { %667 = vmatmul.bf16.gmra.mxu1 %v4594_v11 }
 0x1fe   : > { %879 = vadd.xlane.f32.xlu0 %v878_v3  ;;  %v5677_v3 = vpop.permute.xlu1 %2084 }
 0x201   : > { %717 = vmax.xlane.f32.xlu2 %v716_v8  ;;  %723 = vmax.xlane.f32.xlu1 %v722_v35  ;;  %v4506_v35 = vmul.f32 -1.442695, %v5666_v6  ;;  %v5684_v8 = vadd.f32 %v5615_v30, %v5439_v32 }
 0x203   : > { %4881 = vpow2.f32 %v4506_v35  ;;  %v725_v36 = vsel %vm673_vm0, %v5684_v8, -inf }
 0x206   : > { %738 = vmax.xlane.f32.xlu0 %v737_v10  ;;  %v697_v20 = vpop.xlane.xlu1 %696  ;;  %v4502_v10 = vmul.f32 -1.442695, %v5684_v8 }
 0x207   : > { %v777_v9 = vsub.f32 %v5500_v57, %v697_v20 }
 0x208   : > { %4883 = vpow2.f32 %v4502_v10 }
 0x209   : > { %867 = vadd.xlane.f32.xlu2 %v866_v13  ;;  %v4882_v12 = vpop.eup %4881  ;;  %v816_v13 = vmul.f32 1.442695, %v777_v9  ;;  %4885 = vpow2.f32 %v806_v33 }
 0x20a   : > { %v1559_v30 = vadd.f32 1.0, %v4882_v12 }
 0x20b   : > { %4887 = vpow2.f32 %v816_v13 }
 0x20c   : > { %4889 = vpow2.f32 %v4501_v16  ;;  %vm1890_vm9 = vweird.f32 %v1559_v30  ;;  %v1896_v55 = vand.u32 2147483648, %v1559_v30  ;;  %v1894_v60 = vand.u32 2147483647, %v1559_v30 }
 0x20d   : > { %4891 = vrcp.f32 %v1559_v30 }
 0x20e   : > { %v4884_v19 = vpop.eup %4883  ;;  %v1897_v1 = vor.u32 1.1754944e-38, %v1896_v55  ;;  %vm1895_vm12 = vcmp.eq.f32.partialorder %v1894_v60, 8.507059e+37 }
 0x20f   : > { %v5693_v46 = vpop.eup %4885  ;;  %v1555_v21 = vadd.f32 1.0, %v4884_v19 }
 0x210   : > { %v872_v27 = vsel %vm673_vm0, %v5693_v46, 0.0 }
 0x211   : > { %v5695_v57 = vpop.eup %4887  ;;  %4893 = vrcp.f32 %v1555_v21  ;;  %vm1830_vm13 = vweird.f32 %v1555_v21  ;;  %v1836_v9 = vand.u32 2147483648, %v1555_v21  ;;  %v1834_v33 = vand.u32 2147483647, %v1555_v21 }
 0x212   : > { %7945 = vst [vmem:[#allocation12_spill] sm:$0xff] %v5695_v57  ;;  %v4890_v24 = vpop.eup %4889  ;;  %v887_v45 = vsel %vm673_vm0, %v5695_v57, 0.0  ;;  %4895 = vpow2.f32 %v808_v28 }
 0x213   : > { %v4892_v26 = vpop.eup %4891  ;;  %v1554_v29 = vadd.f32 1.0, %v4890_v24  ;;  %v1837_v16 = vor.u32 1.1754944e-38, %v1836_v9  ;;  %vm1835_vm3 = vcmp.eq.f32.partialorder %v1834_v33, 8.507059e+37 }
 0x214   : > { %v1886_v34 = vmul.f32 %v4892_v26, %v1559_v30  ;;  %vm1891_vm10 = vweird.f32 %v4892_v26 }
 0x215   : > { %4897 = vrcp.f32 %v1554_v29  ;;  %vm1892_vm11 = vmor %vm1890_vm9, %vm1891_vm10  ;;  %vm1815_vm1 = vweird.f32 %v1554_v29  ;;  %v1821_v19 = vand.u32 2147483648, %v1554_v29  ;;  %v1819_v24 = vand.u32 2147483647, %v1554_v29 }
 0x216   : > { %v1887_v43 = vsub.f32 1.0, %v1886_v34 }
 0x217   : > { %v4894_v39 = vpop.eup %4893  ;;  %vm1820_vm5 = vcmp.eq.f32.partialorder %v1819_v24, 8.507059e+37 }
 0x218   : > { %v1826_v49 = vmul.f32 %v4894_v39, %v1555_v21  ;;  %v5715_v50 = vpop.eup %4895  ;;  %vm1831_vm14 = vweird.f32 %v4894_v39 }
 0x219   : > { %vm1832_vm15 = vmor %vm1830_vm13, %vm1831_vm14 }
 0x21a   : > { %2154 = vperm.xlu1 %4690, %v2064_v53   ;;  %2174 = vperm.xlu0 %4692, %v2068_v51   ;;  %v1888_v51 = vmul.f32 %v4892_v26, %v1887_v43  ;;  %v875_v53 = vsel %vm673_vm0, %v5715_v50, 0.0  ;;  %v1827_v58 = vsub.f32 1.0, %v1826_v49 }
 0x21b   : > { %v4898_v42 = vpop.eup %4897 }
 0x21c   : > { %v1889_v56 = vadd.f32 %v4892_v26, %v1888_v51  ;;  %v1828_v35 = vmul.f32 %v4894_v39, %v1827_v58  ;;  %vm1816_vm2 = vweird.f32 %v4898_v42  ;;  %v5731_v51 = vadd.f32 %v5651_v7, %v5439_v32  ;;  %v5734_v58 = vpop.permute.xlu0 %2094 }
 0x21d   : > { %vm1817_vm4 = vmor %vm1815_vm1, %vm1816_vm2 }
 0x21e   : > { %v1893_v20 = vsel %vm1892_vm11, %v4892_v26, %v1889_v56  ;;  %v1829_v11 = vadd.f32 %v4894_v39, %v1828_v35  ;;  %v1822_v26 = vor.u32 1.1754944e-38, %v1821_v19  ;;  %v4505_v56 = vmul.f32 -1.442695, %v5731_v51 }
 0x21f   : > { %v1898_v10 = vsel %vm1895_vm12, %v1897_v1, %v1893_v20 }
 0x220   : > { %v2071_v13 = vmul.f32 0.25, %v1898_v10  ;;  %v1833_v30 = vsel %vm1832_vm15, %v4894_v39, %v1829_v11  ;;  %v4509_v39 = vmul.f32 -1.442695, %v5703_v54 }
 0x221   : > { %2149 = vperm.xlu2 %4691, %v2063_v63   ;;  %v1811_v63 = vmul.f32 %v4898_v42, %v1554_v29  ;;  %v1838_v25 = vsel %vm1835_vm3, %v1837_v16, %v1833_v30  ;;  %v5726_v29 = vpop.f32.mrf.mxu1 }
 0x222   : > { %v2067_v21 = vmul.f32 0.25, %v1838_v25  ;;  %4899 = vpow2.f32 %v4509_v39  ;;  %v5756_v25 = vadd.f32 %v5680_v61, %v5439_v32 }
 0x223   : > { %v1812_v23 = vsub.f32 1.0, %v1811_v63 }
 0x224   : > { %v694_v35 = vpop.xlane.xlu0 %693 }
 0x225   : > { %v1813_v12 = vmul.f32 %v4898_v42, %v1812_v23  ;;  %v776_v9 = vsub.f32 %v5481_v40, %v694_v35 }
 0x227   : > { %v1814_v14 = vadd.f32 %v4898_v42, %v1813_v12  ;;  %v814_v30 = vmul.f32 1.442695, %v776_v9 }
 0x229   : > { %v5737_v60 = vpop.f32.mrf.mxu1 }
 0x231   : > { %v660_v20 = vpop.f32.mrf.mxu1 }
 0x244   : > { %873 = vadd.xlane.f32.xlu1 %v872_v27  ;;  %888 = vadd.xlane.f32.xlu0 %v887_v45  ;;  %v1818_v27 = vsel %vm1817_vm4, %v4898_v42, %v1814_v14  ;;  %v5719_v45 = vpop.permute.xlu1 %2104  ;;  %v4900_v42 = vpop.eup %4899 }
 0x245   : > { %7947 = vst [vmem:[#allocation14_spill] sm:$0xff] %v5719_v45  ;;  %v1823_v28 = vsel %vm1820_vm5, %v1822_v26, %v1818_v27  ;;  %v1562_v63 = vadd.f32 1.0, %v4900_v42  ;;  %v734_v26 = vsel %vm673_vm0, %v5731_v51, -inf  ;;  %v740_v27 = vsel %vm673_vm0, %v5756_v25, -inf }
 0x246   : > { %v2066_v34 = vmul.f32 0.25, %v1823_v28 }
 0x247   : > { %vm1935_vm6 = vweird.f32 %v1562_v63  ;;  %v1941_v39 = vand.u32 2147483648, %v1562_v63  ;;  %v1939_v61 = vand.u32 2147483647, %v1562_v63 }
 0x249   : > { %vm1940_vm9 = vcmp.eq.f32.partialorder %v1939_v61, 8.507059e+37 }
 0x24a   : > { %726 = vmax.xlane.f32.xlu2 %v725_v36 }
 0x24c   : > { %732 = vmax.xlane.f32.xlu1 %v731_v47  ;;  %747 = vmax.xlane.f32.xlu0 %v746_v38  ;;  %v5721_v36 = vpop.permute.xlu1 %2114  ;;  %v5723_v38 = vpop.permute.xlu2 %2089 }
 0x252   : > { %876 = vadd.xlane.f32.xlu2 %v875_v53 }
 0x254   : > { %v706_v43 = vpop.xlane.xlu1 %705  ;;  %v691_v49 = vpop.xlane.xlu2 %690 }
 0x255   : > { %v780_v47 = vsub.f32 %v5567_v18, %v706_v43  ;;  %v775_v53 = vsub.f32 %v5510_v2, %v691_v49  ;;  %v4504_v18 = vmul.f32 -1.442695, %v5707_v52 }
 0x257   : > { %v822_v55 = vmul.f32 1.442695, %v780_v47  ;;  %v812_v1 = vmul.f32 1.442695, %v775_v53  ;;  %v1942_v53 = vor.u32 1.1754944e-38, %v1941_v39 }
 0x259   : > { %4901 = vpow2.f32 %v822_v55 }
 0x25a   : > { %4903 = vpow2.f32 %v4505_v56 }
 0x25b   : > { %4905 = vrcp.f32 %v1562_v63 }
 0x25c   : > { %4907 = vpow2.f32 %v812_v1 }
 0x25d   : > { %4909 = vpow2.f32 %v4504_v18 }
 0x25f   : > { %v5740_v7 = vpop.eup %4901 }
 0x260   : > { %2189 = vperm.xlu0 %4692, %v2071_v13   ;;  %7948 = vst [vmem:[#allocation15_spill] sm:$0xff] %v5740_v7  ;;  %v4904_v2 = vpop.eup %4903  ;;  %v896_v10 = vsel %vm673_vm0, %v5740_v7, 0.0  ;;  %v5748_v13 = vadd.f32 %v660_v20, %v5439_v32 }
 0x261   : > { %v4906_v23 = vpop.eup %4905  ;;  %v1558_v12 = vadd.f32 1.0, %v4904_v2 }
 0x262   : > { %v5745_v11 = vpop.eup %4907  ;;  %7949 = vst [vmem:[#allocation16_spill] sm:$0xff] %v5748_v13  ;;  %v1931_v16 = vmul.f32 %v4906_v23, %v1562_v63  ;;  %v755_v40 = vsel %vm673_vm0, %v5748_v13, -inf  ;;  %vm1936_vm7 = vweird.f32 %v4906_v23  ;;  %v4512_v61 = vmul.f32 -1.442695, %v5748_v13 }
 0x263   : > { %v4910_v33 = vpop.eup %4909  ;;  %v881_v14 = vsel %vm673_vm0, %v5745_v11, 0.0  ;;  %4911 = vrcp.f32 %v1558_v12  ;;  %vm1937_vm8 = vmor %vm1935_vm6, %vm1936_vm7  ;;  %vm1875_vm10 = vweird.f32 %v1558_v12  ;;  %v1881_v9 = vand.u32 2147483648, %v1558_v12 }
 0x264   : > { %v1557_v19 = vadd.f32 1.0, %v4910_v33  ;;  %v1932_v24 = vsub.f32 1.0, %v1931_v16  ;;  %4913 = vpow2.f32 %v814_v30  ;;  %v1879_v33 = vand.u32 2147483647, %v1558_v12 }
 0x265   : > { %2169 = vperm.xlu1 %4690, %v2067_v21   ;;  %v1882_v30 = vor.u32 1.1754944e-38, %v1881_v9 }
 0x266   : > { %4915 = vrcp.f32 %v1557_v19  ;;  %v1933_v21 = vmul.f32 %v4906_v23, %v1932_v24  ;;  %vm1860_vm13 = vweird.f32 %v1557_v19  ;;  %v1866_v16 = vand.u32 2147483648, %v1557_v19 }
 0x267   : > { %vm1880_vm15 = vcmp.eq.f32.partialorder %v1879_v33, 8.507059e+37  ;;  %4917 = vpow2.f32 %v4512_v61 }
 0x268   : > { %v1934_v47 = vadd.f32 %v4906_v23, %v1933_v21  ;;  %v1867_v24 = vor.u32 1.1754944e-38, %v1866_v16 }
 0x269   : > { %v4912_v28 = vpop.eup %4911 }
 0x26a   : > { %2164 = vperm.xlu2 %4691, %v2066_v34   ;;  %v5762_v34 = vpop.eup %4913  ;;  %v1871_v49 = vmul.f32 %v4912_v28, %v1558_v12  ;;  %v1938_v56 = vsel %vm1937_vm8, %v4906_v23, %v1934_v47  ;;  %vm1876_vm11 = vweird.f32 %v4912_v28  ;;  %v1864_v23 = vand.u32 2147483647, %v1557_v19  ;;  %v5766_v12 = vpop.permute.xlu1 %2124 }
 0x26b   : > { %v884_v42 = vsel %vm673_vm0, %v5762_v34, 0.0  ;;  %v1943_v18 = vsel %vm1940_vm9, %v1942_v53, %v1938_v56  ;;  %vm1877_vm12 = vmor %vm1875_vm10, %vm1876_vm11 }
 0x26c   : > { %v4916_v43 = vpop.eup %4915  ;;  %v1872_v1 = vsub.f32 1.0, %v1871_v49  ;;  %v2074_v20 = vmul.f32 0.25, %v1943_v18  ;;  %vm1865_vm2 = vcmp.eq.f32.partialorder %v1864_v23, 8.507059e+37  ;;  %v5769_v49 = vpop.f32.mrf.mxu1 }
 0x26d   : > { %v1856_v55 = vmul.f32 %v4916_v43, %v1557_v19  ;;  %vm1861_vm14 = vweird.f32 %v4916_v43  ;;  %v5771_v19 = vpop.permute.xlu2 %2099  ;;  %v4918_v53 = vpop.eup %4917 }
 0x26e   : > { %v1873_v2 = vmul.f32 %v4912_v28, %v1872_v1  ;;  %vm1862_vm1 = vmor %vm1860_vm13, %vm1861_vm14  ;;  %v5778_v1 = vadd.f32 %v5691_v17, %v5439_v32  ;;  %v1565_v18 = vadd.f32 1.0, %v4918_v53 }
 0x26f   : > { %v1857_v35 = vsub.f32 1.0, %v1856_v55 }
 0x270   : > { %v1874_v63 = vadd.f32 %v4912_v28, %v1873_v2  ;;  %v4508_v2 = vmul.f32 -1.442695, %v5778_v1  ;;  %v743_v61 = vsel %vm673_vm0, %v5778_v1, -inf  ;;  %vm1980_vm3 = vweird.f32 %v1565_v18 }
 0x271   : > { %v1984_v53 = vand.u32 2147483647, %v1565_v18 }
 0x273   : > { %vm1985_vm6 = vcmp.eq.f32.partialorder %v1984_v53, 8.507059e+37 }
 0x274   : > { %v5774_v55 = vpop.f32.mrf.mxu1 }
 0x275   : > { %v700_v56 = vpop.xlane.xlu2 %699 }
 0x28a   : > { %897 = vadd.xlane.f32.xlu0 %v896_v10  ;;  %v1858_v10 = vmul.f32 %v4916_v43, %v1857_v35  ;;  %v778_v35 = vsub.f32 %v5550_v0, %v700_v56  ;;  %v5803_v56 = vadd.f32 %v5726_v29, %v5439_v32 }
 0x28f   : > { %882 = vadd.xlane.f32.xlu1 %v881_v14  ;;  %v1859_v14 = vadd.f32 %v4916_v43, %v1858_v10  ;;  %v703_v10 = vpop.xlane.xlu0 %702 }
 0x290   : > { %v779_v0 = vsub.f32 %v5477_v37, %v703_v10 }
 0x292   : > { %756 = vmax.xlane.f32.xlu0 %v755_v40  ;;  %v1878_v40 = vsel %vm1877_vm12, %v4912_v28, %v1874_v63  ;;  %v668_v63 = vpop.f32.mrf.mxu1 }
 0x293   : > { %735 = vmax.xlane.f32.xlu2 %v734_v26  ;;  %v1883_v26 = vsel %vm1880_vm15, %v1882_v30, %v1878_v40  ;;  %v5789_v16 = vadd.f32 %v668_v63, %v5439_v32  ;;  %v820_v40 = vmul.f32 1.442695, %v779_v0 }
 0x294   : > { %v2070_v21 = vmul.f32 0.25, %v1883_v26 }
 0x295   : > { %7951 = vst [vmem:[#allocation18_spill] sm:$0xff] %v5789_v16 }
 0x297   : > { %741 = vmax.xlane.f32.xlu1 %v740_v27  ;;  %v1863_v27 = vsel %vm1862_vm1, %v4916_v43, %v1859_v14 }
 0x298   : > { %v1868_v39 = vsel %vm1865_vm2, %v1867_v24, %v1863_v27  ;;  %v764_v24 = vsel %vm673_vm0, %v5789_v16, -inf }
 0x299   : > { %v2069_v47 = vmul.f32 0.25, %v1868_v39 }
 0x29b   : > { %885 = vadd.xlane.f32.xlu2 %v884_v42  ;;  %v715_v42 = vpop.xlane.xlu1 %714 }
 0x29c   : > { %v783_v28 = vsub.f32 %v5626_v48, %v715_v42  ;;  %v818_v48 = vmul.f32 1.442695, %v778_v35  ;;  %v1986_v42 = vand.u32 2147483648, %v1565_v18 }
 0x29e   : > { %v828_v43 = vmul.f32 1.442695, %v783_v28 }
 0x2a0   : > { %4919 = vpow2.f32 %v828_v43 }
 0x2a1   : > { %4921 = vrcp.f32 %v1565_v18 }
 0x2a2   : > { %4923 = vpow2.f32 %v4508_v2 }
 0x2a6   : > { %2204 = vperm.xlu0 %4692, %v2074_v20   ;;  %v4507_v20 = vmul.f32 -1.442695, %v5756_v25  ;;  %v5783_v9 = vpop.eup %4919 }
 0x2a7   : > { %7950 = vst [vmem:[#allocation17_spill] sm:$0xff] %v5783_v9  ;;  %v4922_v33 = vpop.eup %4921  ;;  %v905_v17 = vsel %vm673_vm0, %v5783_v9, 0.0 }
 0x2a8   : > { %4925 = vpow2.f32 %v4507_v20  ;;  %v1976_v30 = vmul.f32 %v4922_v33, %v1565_v18  ;;  %v4924_v14 = vpop.eup %4923  ;;  %vm1981_vm4 = vweird.f32 %v4922_v33  ;;  %v749_v20 = vsel %vm673_vm0, %v5803_v56, -inf }
 0x2a9   : > { %4927 = vpow2.f32 %v818_v48  ;;  %v1561_v27 = vadd.f32 1.0, %v4924_v14  ;;  %vm1982_vm5 = vmor %vm1980_vm3, %vm1981_vm4  ;;  %v1987_v48 = vor.u32 1.1754944e-38, %v1986_v42 }
 0x2aa   : > { %4929 = vpow2.f32 %v820_v40 }
 0x2ab   : > { %4931 = vrcp.f32 %v1561_v27  ;;  %vm1920_vm7 = vweird.f32 %v1561_v27 }
 0x2ae   : > { %v4926_v23 = vpop.eup %4925 }
 0x2af   : > { %v5793_v26 = vpop.eup %4927  ;;  %v1560_v39 = vadd.f32 1.0, %v4926_v23 }
 0x2b0   : > { %2184 = vperm.xlu1 %4690, %v2070_v21   ;;  %v1977_v21 = vsub.f32 1.0, %v1976_v30  ;;  %v890_v37 = vsel %vm673_vm0, %v5793_v26, 0.0  ;;  %v5799_v43 = vpop.eup %4929 }
 0x2b1   : > { %4933 = vrcp.f32 %v1560_v39  ;;  %v4932_v35 = vpop.eup %4931  ;;  %v893_v63 = vsel %vm673_vm0, %v5799_v43, 0.0  ;;  %vm1905_vm9 = vweird.f32 %v1560_v39 }
 0x2b2   : > { %v1916_v18 = vmul.f32 %v4932_v35, %v1561_v27  ;;  %vm1921_vm8 = vweird.f32 %v4932_v35 }
 0x2b3   : > { %2179 = vperm.xlu2 %4691, %v2069_v47   ;;  %v1978_v47 = vmul.f32 %v4922_v33, %v1977_v21  ;;  %v1924_v21 = vand.u32 2147483647, %v1561_v27  ;;  %vm1922_vm11 = vmor %vm1920_vm7, %vm1921_vm8 }
 0x2b4   : > { %v1917_v30 = vsub.f32 1.0, %v1916_v18  ;;  %v5810_v18 = vpop.permute.xlu1 %2139 }
 0x2b5   : > { %v1979_v28 = vadd.f32 %v4922_v33, %v1978_v47  ;;  %vm1925_vm13 = vcmp.eq.f32.partialorder %v1924_v21, 8.507059e+37  ;;  %v5821_v21 = vadd.f32 %v5737_v60, %v5439_v32 }
 0x2b6   : > { %v1918_v23 = vmul.f32 %v4932_v35, %v1917_v30  ;;  %v712_v30 = vpop.xlane.xlu0 %711 }
 0x2b7   : > { %v4934_v2 = vpop.eup %4933  ;;  %v1983_v10 = vsel %vm1982_vm5, %v4922_v33, %v1979_v28 }
 0x2b8   : > { %v1988_v0 = vsel %vm1985_vm6, %v1987_v48, %v1983_v10  ;;  %vm1906_vm10 = vweird.f32 %v4934_v2  ;;  %v1919_v33 = vadd.f32 %v4932_v35, %v1918_v23  ;;  %v4515_v48 = vmul.f32 -1.442695, %v5789_v16 }
 0x2b9   : > { %v2077_v29 = vmul.f32 0.25, %v1988_v0  ;;  %vm1907_vm12 = vmor %vm1905_vm9, %vm1906_vm10  ;;  %v5812_v0 = vpop.permute.xlu2 %2109 }
 0x2ba   : > { %v1923_v28 = vsel %vm1922_vm11, %v4932_v35, %v1919_v33  ;;  %4935 = vpow2.f32 %v4515_v48 }
 0x2bc   : > { %v724_v35 = vpop.xlane.xlu1 %723 }
 0x2d0   : > { %906 = vadd.xlane.f32.xlu0 %v905_v17  ;;  %v1901_v17 = vmul.f32 %v4934_v2, %v1560_v39 }
 0x2d2   : > { %v1902_v14 = vsub.f32 1.0, %v1901_v17 }
 0x2d4   : > { %v1903_v40 = vmul.f32 %v4934_v2, %v1902_v14  ;;  %v5815_v14 = vpop.permute.xlu2 %2119 }
 0x2d5   : > { %7952 = vst [vmem:[#allocation19_spill] sm:$0xff] %v5815_v14 }
 0x2d6   : > { %v1904_v47 = vadd.f32 %v4934_v2, %v1903_v40  ;;  %v5817_v40 = vpop.permute.xlu0 %2129 }
 0x2d8   : > { %765 = vmax.xlane.f32.xlu0 %v764_v24  ;;  %v1926_v24 = vand.u32 2147483648, %v1561_v27 }
 0x2da   : > { %891 = vadd.xlane.f32.xlu1 %v890_v37  ;;  %v1911_v37 = vand.u32 2147483648, %v1560_v39  ;;  %v1927_v42 = vor.u32 1.1754944e-38, %v1926_v24 }
 0x2dc   : > { %744 = vmax.xlane.f32.xlu2 %v743_v61  ;;  %v1909_v61 = vand.u32 2147483647, %v1560_v39  ;;  %v1912_v53 = vor.u32 1.1754944e-38, %v1911_v37  ;;  %v1928_v10 = vsel %vm1925_vm13, %v1927_v42, %v1923_v28  ;;  %v4936_v39 = vpop.eup %4935  ;;  %v709_v33 = vpop.xlane.xlu2 %708  ;;  %v4510_v28 = vmul.f32 -1.442695, %v5803_v56 }
 0x2dd   : > { %v2073_v17 = vmul.f32 0.25, %v1928_v10 }
 0x2de   : > { %vm1910_vm14 = vcmp.eq.f32.partialorder %v1909_v61, 8.507059e+37  ;;  %v5827_v42 = vpop.xlane.xlu0 %720 }
 0x2e2   : > { %750 = vmax.xlane.f32.xlu1 %v749_v20  ;;  %v1908_v20 = vsel %vm1907_vm12, %v4934_v2, %v1904_v47  ;;  %v786_v2 = vsub.f32 %v5659_v62, %v724_v35  ;;  %v5823_v47 = vpop.permute.xlu1 %2154  ;;  %v781_v62 = vsub.f32 %v5607_v22, %v709_v33 }
 0x2e4   : > { %894 = vadd.xlane.f32.xlu2 %v893_v63  ;;  %v1913_v63 = vsel %vm1910_vm14, %v1912_v53, %v1908_v20  ;;  %v834_v23 = vmul.f32 1.442695, %v786_v2  ;;  %v4511_v53 = vmul.f32 -1.442695, %v5821_v21  ;;  %v824_v60 = vmul.f32 1.442695, %v781_v62 }
 0x2e5   : > { %v2072_v27 = vmul.f32 0.25, %v1913_v63 }
 0x2e6   : > { %v5837_v22 = vpop.permute.xlu0 %2144 }
 0x2ea   : > { %v5834_v63 = vpop.xlane.xlu1 %873 }
 0x2ec   : > { %2219 = vperm.xlu0 %4692, %v2077_v29   ;;  %v1568_v29 = vadd.f32 1.0, %v4936_v39 }
 0x2ee   : > { %4937 = vrcp.f32 %v1568_v29  ;;  %vm2025_vm15 = vweird.f32 %v1568_v29  ;;  %v2029_v35 = vand.u32 2147483647, %v1568_v29 }
 0x2ef   : > { %4939 = vpow2.f32 %v834_v23 }
 0x2f0   : > { %4941 = vpow2.f32 %v4510_v28  ;;  %vm2030_vm3 = vcmp.eq.f32.partialorder %v2029_v35, 8.507059e+37 }
 0x2f1   : > { %4943 = vpow2.f32 %v4511_v53 }
 0x2f2   : > { %4945 = vpow2.f32 %v824_v60  ;;  %v752_v60 = vsel %vm673_vm0, %v5821_v21, -inf }
 0x2f4   : > { %v4938_v24 = vpop.eup %4937 }
 0x2f5   : > { %v2021_v37 = vmul.f32 %v4938_v24, %v1568_v29  ;;  %v5825_v61 = vpop.eup %4939  ;;  %vm2026_vm1 = vweird.f32 %v4938_v24 }
 0x2f6   : > { %7953 = vst [vmem:[#allocation20_spill] sm:$0xff] %v5825_v61  ;;  %v914_v48 = vsel %vm673_vm0, %v5825_v61, 0.0  ;;  %v4942_v2 = vpop.eup %4941  ;;  %vm2027_vm2 = vmor %vm2025_vm15, %vm2026_vm1 }
 0x2f7   : > { %v2022_v20 = vsub.f32 1.0, %v2021_v37  ;;  %v4944_v23 = vpop.eup %4943  ;;  %v1563_v62 = vadd.f32 1.0, %v4942_v2 }
 0x2f8   : > { %v5839_v53 = vpop.eup %4945 }
 0x2f9   : > { %v2023_v10 = vmul.f32 %v4938_v24, %v2022_v20  ;;  %v1564_v20 = vadd.f32 1.0, %v4944_v23  ;;  %vm1950_vm4 = vweird.f32 %v1563_v62 }
 0x2fb   : > { %2199 = vperm.xlu1 %4690, %v2073_v17   ;;  %v782_v17 = vsub.f32 %v5515_v5, %v712_v30  ;;  %v2024_v39 = vadd.f32 %v4938_v24, %v2023_v10  ;;  %v5843_v5 = vpop.xlane.xlu1 %732  ;;  %v5852_v10 = vadd.f32 %v5769_v49, %v5439_v32  ;;  %vm1965_vm6 = vweird.f32 %v1564_v20 }
 0x2fc   : > { %2194 = vperm.xlu2 %4691, %v2072_v27   ;;  %v2031_v27 = vand.u32 2147483648, %v1568_v29  ;;  %v899_v29 = vsel %vm673_vm0, %v5839_v53, 0.0 }
 0x2fd   : > { %v826_v33 = vmul.f32 1.442695, %v782_v17  ;;  %v2028_v28 = vsel %vm2027_vm2, %v4938_v24, %v2024_v39  ;;  %v758_v39 = vsel %vm673_vm0, %v5852_v10, -inf }
 0x2fe   : > { %v2032_v37 = vor.u32 1.1754944e-38, %v2031_v27 }
 0x2ff   : > { %4947 = vpow2.f32 %v826_v33 }
 0x300   : > { %v2033_v30 = vsel %vm2030_vm3, %v2032_v37, %v2028_v28  ;;  %4949 = vrcp.f32 %v1563_v62 }
 0x301   : > { %4951 = vrcp.f32 %v1564_v20  ;;  %v2080_v24 = vmul.f32 0.25, %v2033_v30 }
 0x303   : > { %v5858_v2 = vpop.permute.xlu1 %2169 }
 0x304   : > { %7954 = vst [vmem:[#allocation21_spill] sm:$0xff] %v5858_v2  ;;  %v1956_v2 = vand.u32 2147483648, %v1563_v62 }
 0x305   : > { %v5854_v17 = vpop.eup %4947 }
 0x306   : > { %v4950_v27 = vpop.eup %4949  ;;  %v902_v33 = vsel %vm673_vm0, %v5854_v17, 0.0 }
 0x307   : > { %v4952_v35 = vpop.eup %4951  ;;  %v1946_v37 = vmul.f32 %v4950_v27, %v1563_v62  ;;  %vm1951_vm5 = vweird.f32 %v4950_v27 }
 0x308   : > { %v1961_v28 = vmul.f32 %v4952_v35, %v1564_v20  ;;  %vm1966_vm7 = vweird.f32 %v4952_v35  ;;  %vm5865_vm8 = vmor %vm1950_vm4, %vm1951_vm5 }
 0x309   : > { %v1947_v30 = vsub.f32 1.0, %v1946_v37  ;;  %vm5869_vm9 = vmor %vm1965_vm6, %vm1966_vm7 }
 0x30b   : > { %v1948_v61 = vmul.f32 %v4950_v27, %v1947_v30 }
 0x30d   : > { %v1949_v7 = vadd.f32 %v4950_v27, %v1948_v61 }
 0x316   : > { %915 = vadd.xlane.f32.xlu0 %v914_v48  ;;  %v5841_v48 = vpop.xlane.xlu0 %870 }
 0x317   : > { %4953 = vrcp.f32 %v5841_v48  ;;  %vm982_vm11 = vweird.f32 %v5841_v48 }
 0x31d   : > { %v4954_v23 = vpop.eup %4953 }
 0x31e   : > { %v978_v49 = vmul.f32 %v4954_v23, %v5841_v48  ;;  %vm983_vm10 = vweird.f32 %v4954_v23 }
 0x31f   : > { %vm984_vm14 = vmor %vm982_vm11, %vm983_vm10 }
 0x325   : > { %900 = vadd.xlane.f32.xlu1 %v899_v29  ;;  %753 = vmax.xlane.f32.xlu2 %v752_v60  ;;  %v1962_v29 = vsub.f32 1.0, %v1961_v28  ;;  %v979_v60 = vsub.f32 1.0, %v978_v49  ;;  %v1969_v28 = vand.u32 2147483647, %v1564_v20 }
 0x327   : > { %v1963_v9 = vmul.f32 %v4952_v35, %v1962_v29  ;;  %v980_v16 = vmul.f32 %v4954_v23, %v979_v60  ;;  %v1957_v29 = vor.u32 1.1754944e-38, %v1956_v2  ;;  %v988_v60 = vand.u32 2147483648, %v5841_v48 }
 0x328   : > { %vm1970_vm13 = vcmp.eq.f32.partialorder %v1969_v28, 8.507059e+37 }
 0x329   : > { %v1964_v37 = vadd.f32 %v4952_v35, %v1963_v9  ;;  %v981_v30 = vadd.f32 %v4954_v23, %v980_v16  ;;  %v986_v9 = vand.u32 2147483647, %v5841_v48  ;;  %v989_v2 = vor.u32 1.1754944e-38, %v988_v60 }
 0x32a   : > { %2234 = vperm.xlu0 %4692, %v2080_v24   ;;  %v5863_v24 = vpop.xlane.xlu1 %882 }
 0x32b   : > { %4955 = vrcp.f32 %v5863_v24  ;;  %v985_v16 = vsel %vm984_vm14, %v4954_v23, %v981_v30  ;;  %vm987_vm15 = vcmp.eq.f32.partialorder %v986_v9, 8.507059e+37  ;;  %v789_v23 = vsub.f32 %v5707_v52, %v5843_v5 }
 0x32c   : > { %v990_v45 = vsel %vm987_vm15, %v989_v2, %v985_v16  ;;  %v1048_v5 = vand.u32 2147483648, %v5863_v24  ;;  %vm1042_vm3 = vweird.f32 %v5863_v24  ;;  %v1046_v49 = vand.u32 2147483647, %v5863_v24 }
 0x32d   : > { %759 = vmax.xlane.f32.xlu1 %v758_v39  ;;  %903 = vadd.xlane.f32.xlu2 %v902_v33  ;;  %v1954_v39 = vand.u32 2147483647, %v1563_v62  ;;  %v1971_v33 = vand.u32 2147483648, %v1564_v20  ;;  %v1953_v62 = vsel %vm5865_vm8, %v4950_v27, %v1949_v7  ;;  %v1968_v20 = vsel %vm5869_vm9, %v4952_v35, %v1964_v37 }
 0x32e   : > { %v991_v48 = vmul.f32 %v5617_v41, %v990_v45  ;;  %vm1047_vm5 = vcmp.eq.f32.partialorder %v1046_v49, 8.507059e+37  ;;  %v5906_v9 = vadd.f32 %v5774_v55, %v5439_v32 }
 0x32f   : > { %vm1955_vm12 = vcmp.eq.f32.partialorder %v1954_v39, 8.507059e+37  ;;  %v1972_v14 = vor.u32 1.1754944e-38, %v1971_v33 }
 0x330   : > { %v1958_v57 = vsel %vm1955_vm12, %v1957_v29, %v1953_v62  ;;  %v2243_v35 = vsub.f32 %v991_v48, %v5723_v38  ;;  %v4514_v48 = vmul.f32 -1.442695, %v5906_v9 }
 0x331   : > { %v1973_v54 = vsel %vm1970_vm13, %v1972_v14, %v1968_v20  ;;  %v2075_v59 = vmul.f32 0.25, %v1958_v57  ;;  %v4956_v13 = vpop.eup %4955  ;;  %v5888_v14 = vpop.permute.xlu2 %2134  ;;  %v840_v57 = vmul.f32 1.442695, %v789_v23 }
 0x332   : > { %v742_v61 = vpop.xlane.xlu1 %741  ;;  %v2076_v7 = vmul.f32 0.25, %v1973_v54  ;;  %v1038_v39 = vmul.f32 %v4956_v13, %v5863_v24  ;;  %vm2275_vm1 = vcmp.ge.f32.partialorder %v2243_v35, 0.0  ;;  %vm1043_vm2 = vweird.f32 %v4956_v13 }
 0x333   : > { %v5893_v54 = vsel %vm2275_vm1, %v2243_v35, 0.0  ;;  %v792_v41 = vsub.f32 %v5756_v25, %v742_v61  ;;  %vm1044_vm4 = vmor %vm1042_vm3, %vm1043_vm2  ;;  %v1049_v61 = vor.u32 1.1754944e-38, %v1048_v5  ;;  %v4513_v24 = vmul.f32 -1.442695, %v5852_v10 }
 0x334   : > { %v1039_v33 = vsub.f32 1.0, %v1038_v39  ;;  %v2341_v45 = vsel %vm673_vm0, %v5893_v54, 0.0 }
 0x335   : > { %v846_v30 = vmul.f32 1.442695, %v792_v41 }
 0x339   : > { %v718_v28 = vpop.xlane.xlu2 %717 }
 0x33a   : > { %v5881_v27 = vpop.permute.xlu1 %2184 }
 0x345   : > { %2209 = vperm.xlu2 %4691, %v2075_v59   ;;  %v1040_v59 = vmul.f32 %v4956_v13, %v1039_v33 }
 0x346   : > { %2214 = vperm.xlu1 %4690, %v2076_v7   ;;  %v5913_v7 = vpop.xlane.xlu2 %867 }
 0x347   : > { %v1041_v38 = vadd.f32 %v4956_v13, %v1040_v59 }
 0x349   : > { %v1045_v60 = vsel %vm1044_vm4, %v4956_v13, %v1041_v38  ;;  %v784_v13 = vsub.f32 %v5642_v31, %v718_v28  ;;  %v785_v31 = vsub.f32 %v5562_v15, %v5827_v42 }
 0x34a   : > { %v1050_v62 = vsel %vm1047_vm5, %v1049_v61, %v1045_v60 }
 0x34b   : > { %v1051_v2 = vmul.f32 %v5745_v11, %v1050_v62  ;;  %v830_v33 = vmul.f32 1.442695, %v784_v13  ;;  %v832_v5 = vmul.f32 1.442695, %v785_v31 }
 0x34d   : > { %v5890_v37 = vpop.xlane.xlu1 %891  ;;  %v2247_v55 = vsub.f32 %v1051_v2, %v5812_v0 }
 0x34e   : > { %4957 = vrcp.f32 %v5890_v37  ;;  %v1093_v41 = vand.u32 2147483648, %v5890_v37  ;;  %vm1087_vm7 = vweird.f32 %v5890_v37  ;;  %v1091_v0 = vand.u32 2147483647, %v5890_v37 }
 0x34f   : > { %4959 = vpow2.f32 %v840_v57  ;;  %vm2279_vm8 = vcmp.ge.f32.partialorder %v2247_v55, 0.0 }
 0x350   : > { %4961 = vpow2.f32 %v846_v30  ;;  %v5927_v28 = vsel %vm2279_vm8, %v2247_v55, 0.0  ;;  %v1094_v49 = vor.u32 1.1754944e-38, %v1093_v41  ;;  %vm1092_vm10 = vcmp.eq.f32.partialorder %v1091_v0, 8.507059e+37 }
 0x351   : > { %4963 = vpow2.f32 %v4513_v24  ;;  %v2353_v60 = vsel %vm673_vm0, %v5927_v28, 0.0 }
 0x352   : > { %4965 = vpow2.f32 %v4514_v48  ;;  %v670_v48 = vpop.f32.mrf.mxu1 }
 0x353   : > { %4967 = vpow2.f32 %v830_v33 }
 0x354   : > { %v4958_v52 = vpop.eup %4957  ;;  %2342 = vadd.xlane.f32.xlu0 %v2341_v45 }
 0x355   : > { %v1083_v29 = vmul.f32 %v4958_v52, %v5890_v37  ;;  %v5902_v25 = vpop.eup %4959  ;;  %v751_v35 = vpop.xlane.xlu1 %750  ;;  %vm1088_vm6 = vweird.f32 %v4958_v52 }
 0x356   : > { %v923_v16 = vsel %vm673_vm0, %v5902_v25, 0.0  ;;  %v5916_v23 = vpop.eup %4961  ;;  %v795_v57 = vsub.f32 %v5803_v56, %v751_v35  ;;  %vm1089_vm9 = vmor %vm1087_vm7, %vm1088_vm6 }
 0x357   : > { %v1084_v20 = vsub.f32 1.0, %v1083_v29  ;;  %v932_v11 = vsel %vm673_vm0, %v5916_v23, 0.0  ;;  %v4964_v45 = vpop.eup %4963  ;;  %v5929_v29 = vpop.permute.xlu2 %2149 }
 0x358   : > { %v852_v56 = vmul.f32 1.442695, %v795_v57  ;;  %v4966_v30 = vpop.eup %4965  ;;  %v1566_v15 = vadd.f32 1.0, %v4964_v45 }
 0x359   : > { %v1085_v39 = vmul.f32 %v4958_v52, %v1084_v20  ;;  %v5933_v37 = vpop.eup %4967  ;;  %v1567_v61 = vadd.f32 1.0, %v4966_v30 }
 0x35a   : > { %4969 = vpow2.f32 %v852_v56  ;;  %v908_v20 = vsel %vm673_vm0, %v5933_v37, 0.0  ;;  %vm1995_vm12 = vweird.f32 %v1566_v15  ;;  %v2001_v56 = vand.u32 2147483648, %v1566_v15 }
 0x35b   : > { %v1086_v59 = vadd.f32 %v4958_v52, %v1085_v39  ;;  %4971 = vpow2.f32 %v832_v5  ;;  %vm2010_vm15 = vweird.f32 %v1567_v61  ;;  %v2016_v30 = vand.u32 2147483648, %v1567_v61 }
 0x35c   : > { %924 = vadd.xlane.f32.xlu0 %v923_v16  ;;  %4973 = vrcp.f32 %v1566_v15 }
 0x35d   : > { %v1090_v38 = vsel %vm1089_vm9, %v4958_v52, %v1086_v59  ;;  %v761_v52 = vsel %vm673_vm0, %v5906_v9, -inf  ;;  %4975 = vrcp.f32 %v1567_v61 }
 0x35e   : > { %v1095_v42 = vsel %vm1092_vm10, %v1094_v49, %v1090_v38  ;;  %v1999_v49 = vand.u32 2147483647, %v1566_v15  ;;  %4977 = vrcp.f32 %v5913_v7  ;;  %vm967_vm10 = vweird.f32 %v5913_v7 }
 0x35f   : > { %v1096_v62 = vmul.f32 %v5793_v26, %v1095_v42  ;;  %v5942_v24 = vpop.xlane.xlu2 %726  ;;  %v5950_v26 = vadd.f32 %v670_v48, %v5439_v32 }
 0x360   : > { %v5940_v16 = vpop.eup %4969  ;;  %vm2000_vm2 = vcmp.eq.f32.partialorder %v1999_v49, 8.507059e+37 }
 0x361   : > { %7959 = vst [vmem:[#allocation22_spill] sm:$0xff] %v5940_v16  ;;  %v2250_v2 = vsub.f32 %v1096_v62, %v5766_v12  ;;  %v5945_v13 = vpop.eup %4971  ;;  %v941_v35 = vsel %vm673_vm0, %v5940_v16, 0.0  ;;  %v767_v12 = vsel %vm673_vm0, %v5950_v26, -inf  ;;  %v2014_v62 = vand.u32 2147483647, %v1567_v61 }
 0x362   : > { %v4974_v39 = vpop.eup %4973  ;;  %v911_v55 = vsel %vm673_vm0, %v5945_v13, 0.0 }
 0x363   : > { %vm2282_vm11 = vcmp.ge.f32.partialorder %v2250_v2, 0.0  ;;  %v4976_v33 = vpop.eup %4975  ;;  %v1991_v57 = vmul.f32 %v4974_v39, %v1566_v15  ;;  %vm1996_vm13 = vweird.f32 %v4974_v39  ;;  %vm2015_vm4 = vcmp.eq.f32.partialorder %v2014_v62, 8.507059e+37 }
 0x364   : > { %933 = vadd.xlane.f32.xlu0 %v932_v11  ;;  %v5956_v11 = vsel %vm2282_vm11, %v2250_v2, 0.0  ;;  %v2006_v59 = vmul.f32 %v4976_v33, %v1567_v61  ;;  %vm1997_vm14 = vmor %vm1995_vm12, %vm1996_vm13  ;;  %vm2011_vm1 = vweird.f32 %v4976_v33  ;;  %v2017_v2 = vor.u32 1.1754944e-38, %v2016_v30 }
 0x365   : > { %v1992_v31 = vsub.f32 1.0, %v1991_v57  ;;  %v2362_v32 = vsel %vm673_vm0, %v5956_v11, 0.0  ;;  %vm2012_vm3 = vmor %vm2010_vm15, %vm2011_vm1 }
 0x366   : > { %v2007_v0 = vsub.f32 1.0, %v2006_v59 }
 0x367   : > { %v5958_v41 = vpop.xlane.xlu2 %876  ;;  %v1993_v45 = vmul.f32 %v4974_v39, %v1992_v31  ;;  %v730_v31 = vpop.xlane.xlu0 %729 }
 0x368   : > { %v2008_v38 = vmul.f32 %v4976_v33, %v2007_v0  ;;  %vm1012_vm15 = vweird.f32 %v5958_v41 }
 0x369   : > { %v1994_v5 = vadd.f32 %v4974_v39, %v1993_v45 }
 0x36c   : > { %2354 = vadd.xlane.f32.xlu0 %v2353_v60  ;;  %v2002_v60 = vor.u32 1.1754944e-38, %v2001_v56 }
 0x36d   : > { %v5966_v59 = vpop.permute.xlu1 %2199 }
 0x36e   : > { %762 = vmax.xlane.f32.xlu2 %v761_v52  ;;  %v2009_v52 = vadd.f32 %v4976_v33, %v2008_v38 }
 0x36f   : > { %v5962_v42 = vpop.permute.xlu2 %2164  ;;  %v5973_v56 = vpop.permute.xlu0 %2159 }
 0x370   : > { %909 = vadd.xlane.f32.xlu1 %v908_v20  ;;  %v1998_v20 = vsel %vm1997_vm14, %v4974_v39, %v1994_v5 }
 0x371   : > { %v2003_v48 = vsel %vm2000_vm2, %v2002_v60, %v1998_v20 }
 0x374   : > { %942 = vadd.xlane.f32.xlu0 %v941_v35  ;;  %v2013_v35 = vsel %vm2012_vm3, %v4976_v33, %v2009_v52  ;;  %v4516_v33 = vmul.f32 -1.442695, %v5950_v26 }
 0x375   : > { %v2018_v57 = vsel %vm2015_vm4, %v2017_v2, %v2013_v35  ;;  %v788_v35 = vsub.f32 %v5622_v44, %v730_v31 }
 0x376   : > { %912 = vadd.xlane.f32.xlu2 %v911_v55  ;;  %v2078_v55 = vmul.f32 0.25, %v2003_v48  ;;  %v2079_v15 = vmul.f32 0.25, %v2018_v57 }
 0x377   : > { %v5980_v16 = vpop.xlane.xlu0 %879 }
 0x378   : > { %768 = vmax.xlane.f32.xlu1 %v767_v12  ;;  %v5964_v12 = vpop.xlane.xlu2 %735 }
 0x37c   : > { %2363 = vadd.xlane.f32.xlu0 %v2362_v32  ;;  %v4978_v32 = vpop.eup %4977 }
 0x37d   : > { %v963_v0 = vmul.f32 %v4978_v32, %v5913_v7  ;;  %vm968_vm9 = vweird.f32 %v4978_v32 }
 0x37e   : > { %vm969_vm11 = vmor %vm967_vm10, %vm968_vm9 }
 0x37f   : > { %v964_v60 = vsub.f32 1.0, %v963_v0  ;;  %v838_v0 = vmul.f32 1.442695, %v788_v35 }
 0x380   : > { %v5969_v61 = vpop.xlane.xlu2 %885 }
 0x381   : > { %vm1057_vm9 = vweird.f32 %v5969_v61 }
 0x388   : > { %v5975_v49 = vpop.permute.xlu2 %2179 }
 0x38e   : > { %2224 = vperm.xlu2 %4691, %v2078_v55   ;;  %v965_v55 = vmul.f32 %v4978_v32, %v964_v60 }
 0x391   : > { %2229 = vperm.xlu1 %4690, %v2079_v15  }
 0x398   : > { %v901_v39 = vpop.xlane.xlu1 %900 }
 0x399   : > { %4979 = vrcp.f32 %v901_v39  ;;  %v1138_v20 = vand.u32 2147483648, %v901_v39  ;;  %v1136_v48 = vand.u32 2147483647, %v901_v39  ;;  %vm1132_vm6 = vweird.f32 %v901_v39 }
 0x39a   : > { %4981 = vpow2.f32 %v4516_v33 }
 0x39b   : > { %4983 = vrcp.f32 %v5958_v41  ;;  %vm1137_vm8 = vcmp.eq.f32.partialorder %v1136_v48, 8.507059e+37  ;;  %v6002_v48 = vpop.xlane.xlu0 %738 }
 0x39f   : > { %v4980_v45 = vpop.eup %4979 }
 0x3a0   : > { %v1128_v38 = vmul.f32 %v4980_v45, %v901_v39  ;;  %v760_v5 = vpop.xlane.xlu1 %759  ;;  %vm1133_vm5 = vweird.f32 %v4980_v45  ;;  %v4982_v15 = vpop.eup %4981  ;;  %v966_v39 = vadd.f32 %v4978_v32, %v965_v55 }
 0x3a1   : > { %v798_v30 = vsub.f32 %v5852_v10, %v760_v5  ;;  %vm1134_vm7 = vmor %vm1132_vm6, %vm1133_vm5  ;;  %v1139_v10 = vor.u32 1.1754944e-38, %v1138_v20  ;;  %v5984_v5 = vpop.xlane.xlu2 %744  ;;  %v5988_v44 = vadd.f32 1.0, %v4982_v15 }
 0x3a2   : > { %v1129_v52 = vsub.f32 1.0, %v1128_v38  ;;  %v787_v38 = vsub.f32 %v5684_v8, %v5942_v24 }
 0x3a3   : > { %v858_v62 = vmul.f32 1.442695, %v798_v30  ;;  %vm2040_vm4 = vweird.f32 %v5988_v44 }
 0x3a4   : > { %v1130_v2 = vmul.f32 %v4980_v45, %v1129_v52  ;;  %v5986_v52 = vpop.eup %4983  ;;  %v836_v20 = vmul.f32 1.442695, %v787_v38 }
 0x3a5   : > { %4985 = vpow2.f32 %v858_v62  ;;  %v971_v62 = vand.u32 2147483647, %v5913_v7  ;;  %vm1013_vm14 = vweird.f32 %v5986_v52 }
 0x3a6   : > { %v1131_v57 = vadd.f32 %v4980_v45, %v1130_v2  ;;  %4987 = vpow2.f32 %v838_v0  ;;  %v970_v2 = vsel %vm969_vm11, %v4978_v32, %v966_v39  ;;  %vm1014_vm2 = vmor %vm1012_vm15, %vm1013_vm14 }
 0x3a7   : > { %4989 = vrcp.f32 %v5988_v44  ;;  %vm972_vm13 = vcmp.eq.f32.partialorder %v971_v62, 8.507059e+37 }
 0x3a8   : > { %v1135_v33 = vsel %vm1134_vm7, %v4980_v45, %v1131_v57  ;;  %v973_v45 = vand.u32 2147483648, %v5913_v7  ;;  %4991 = vpow2.f32 %v836_v20 }
 0x3a9   : > { %v1140_v30 = vsel %vm1137_vm8, %v1139_v10, %v1135_v33  ;;  %v6008_v15 = vpop.xlane.xlu2 %894  ;;  %4993 = vrcp.f32 %v5969_v61 }
 0x3aa   : > { %v1141_v31 = vmul.f32 %v5839_v53, %v1140_v30  ;;  %v1008_v53 = vmul.f32 %v5986_v52, %v5958_v41  ;;  %v974_v35 = vor.u32 1.1754944e-38, %v973_v45  ;;  %v6021_v45 = vpop.permute.xlu0 %2174  ;;  %vm1102_vm14 = vweird.f32 %v6008_v15 }
 0x3ab   : > { %v5991_v60 = vpop.eup %4985 }
 0x3ac   : > { %7960 = vst [vmem:[#allocation23_spill] sm:$0xff] %v5991_v60  ;;  %v950_v8 = vsel %vm673_vm0, %v5991_v60, 0.0  ;;  %v2253_v24 = vsub.f32 %v1141_v31, %v5810_v18  ;;  %v975_v18 = vsel %vm972_vm13, %v974_v35, %v970_v2  ;;  %v1009_v7 = vsub.f32 1.0, %v1008_v53  ;;  %v6006_v57 = vpop.eup %4987 }
 0x3ad   : > { %951 = vadd.xlane.f32.xlu0 %v950_v8  ;;  %v4990_v10 = vpop.eup %4989  ;;  %v976_v0 = vmul.f32 %v5672_v4, %v975_v18  ;;  %v920_v38 = vsel %vm673_vm0, %v6006_v57, 0.0  ;;  %v790_v4 = vsub.f32 %v5731_v51, %v5964_v12  ;;  %v1018_v53 = vand.u32 2147483648, %v5958_v41 }
 0x3ae   : > { %vm2285_vm12 = vcmp.ge.f32.partialorder %v2253_v24, 0.0  ;;  %v1010_v32 = vmul.f32 %v5986_v52, %v1009_v7  ;;  %v6017_v30 = vpop.eup %4991  ;;  %v2036_v31 = vmul.f32 %v4990_v10, %v5988_v44  ;;  %vm2041_vm5 = vweird.f32 %v4990_v10 }
 0x3af   : > { %v6004_v55 = vsel %vm2285_vm12, %v2253_v24, 0.0  ;;  %v2242_v39 = vsub.f32 %v976_v0, %v5677_v3  ;;  %v917_v8 = vsel %vm673_vm0, %v6017_v30, 0.0  ;;  %v6029_v62 = vpop.eup %4993  ;;  %v1016_v3 = vand.u32 2147483647, %v5958_v41  ;;  %vm2042_vm6 = vmor %vm2040_vm4, %vm2041_vm5 }
 0x3b0   : > { %7961 = vst [vmem:[#allocation24_spill] sm:$0xff] %v6004_v55  ;;  %v2371_v33 = vsel %vm673_vm0, %v6004_v55, 0.0  ;;  %v1011_v24 = vadd.f32 %v5986_v52, %v1010_v32  ;;  %v2037_v20 = vsub.f32 1.0, %v2036_v31  ;;  %v842_v2 = vmul.f32 1.442695, %v790_v4 }
 0x3b1   : > { %vm2274_vm1 = vcmp.ge.f32.partialorder %v2242_v39, 0.0  ;;  %v6034_v51 = vpop.permute.xlu2 %2194  ;;  %v1053_v12 = vmul.f32 %v6029_v62, %v5969_v61  ;;  %vm1017_vm3 = vcmp.eq.f32.partialorder %v1016_v3, 8.507059e+37  ;;  %v2046_v31 = vand.u32 2147483648, %v5988_v44 }
 0x3b2   : > { %v1015_v35 = vsel %vm1014_vm2, %v5986_v52, %v1011_v24  ;;  %v6039_v18 = vsel %vm2274_vm1, %v2242_v39, 0.0  ;;  %v2038_v7 = vmul.f32 %v4990_v10, %v2037_v20  ;;  %v6041_v0 = vpop.xlane.xlu0 %888  ;;  %4995 = vpow2.f32 %v842_v2 }
 0x3b3   : > { %v1054_v32 = vsub.f32 1.0, %v1053_v12  ;;  %v2044_v39 = vand.u32 2147483647, %v5988_v44  ;;  %4997 = vrcp.f32 %v6008_v15  ;;  %v2047_v20 = vor.u32 1.1754944e-38, %v2046_v31 }
 0x3b4   : > { %v2039_v52 = vadd.f32 %v4990_v10, %v2038_v7  ;;  %4999 = vrcp.f32 %v5834_v63  ;;  %v793_v44 = vsub.f32 %v5778_v1, %v5984_v5  ;;  %vm1058_vm8 = vweird.f32 %v6029_v62 }
 0x3b5   : > { %2372 = vadd.xlane.f32.xlu0 %v2371_v33  ;;  %v1019_v33 = vor.u32 1.1754944e-38, %v1018_v53  ;;  %v1055_v24 = vmul.f32 %v6029_v62, %v1054_v32  ;;  %vm2045_vm7 = vcmp.eq.f32.partialorder %v2044_v39, 8.507059e+37  ;;  %vm1059_vm11 = vmor %vm1057_vm9, %vm1058_vm8  ;;  %vm997_vm4 = vweird.f32 %v5834_v63 }
 0x3b6   : > { %v2043_v3 = vsel %vm2042_vm6, %v4990_v10, %v2039_v52  ;;  %v1061_v10 = vand.u32 2147483647, %v5969_v61 }
 0x3b7   : > { %921 = vadd.xlane.f32.xlu2 %v920_v38  ;;  %v1020_v41 = vsel %vm1017_vm3, %v1019_v33, %v1015_v35  ;;  %v2338_v38 = vsel %vm673_vm0, %v6039_v18, 0.0  ;;  %v2048_v7 = vsel %vm2045_vm7, %v2047_v20, %v2043_v3  ;;  %v1056_v33 = vadd.f32 %v6029_v62, %v1055_v24 }
 0x3b8   : > { %v1021_v4 = vmul.f32 %v5715_v50, %v1020_v41  ;;  %v6051_v53 = vpop.eup %4995  ;;  %v848_v41 = vmul.f32 1.442695, %v793_v44  ;;  %v2081_v5 = vmul.f32 0.25, %v2048_v7  ;;  %vm1062_vm12 = vcmp.eq.f32.partialorder %v1061_v10, 8.507059e+37 }
 0x3b9   : > { %v6059_v35 = vpop.eup %4997  ;;  %v926_v50 = vsel %vm673_vm0, %v6051_v53, 0.0  ;;  %v1060_v32 = vsel %vm1059_vm11, %v6029_v62, %v1056_v33  ;;  %vm1027_vm7 = vweird.f32 %v5980_v16 }
 0x3ba   : > { %v2245_v2 = vsub.f32 %v1021_v4, %v5771_v19  ;;  %v6055_v12 = vpop.xlane.xlu0 %747  ;;  %v1063_v19 = vand.u32 2147483648, %v5969_v61  ;;  %v1098_v1 = vmul.f32 %v6059_v35, %v6008_v15  ;;  %5001 = vpow2.f32 %v848_v41 }
 0x3bb   : > { %918 = vadd.xlane.f32.xlu1 %v917_v8  ;;  %v754_v8 = vpop.xlane.xlu2 %753  ;;  %vm1103_vm13 = vweird.f32 %v6059_v35 }
 0x3bc   : > { %vm2277_vm10 = vcmp.ge.f32.partialorder %v2245_v2, 0.0  ;;  %v1064_v39 = vor.u32 1.1754944e-38, %v1063_v19  ;;  %v1099_v4 = vsub.f32 1.0, %v1098_v1  ;;  %v796_v33 = vsub.f32 %v5821_v21, %v754_v8  ;;  %vm1104_vm1 = vmor %vm1102_vm14, %vm1103_vm13 }
 0x3bd   : > { %v6075_v52 = vsel %vm2277_vm10, %v2245_v2, 0.0  ;;  %v1106_v21 = vand.u32 2147483647, %v6008_v15 }
 0x3be   : > { %v1065_v61 = vsel %vm1062_vm12, %v1064_v39, %v1060_v32  ;;  %v2347_v20 = vsel %vm673_vm0, %v6075_v52, 0.0  ;;  %v1100_v2 = vmul.f32 %v6059_v35, %v1099_v4  ;;  %v854_v39 = vmul.f32 1.442695, %v796_v33 }
 0x3bf   : > { %v1066_v62 = vmul.f32 %v5762_v34, %v1065_v61  ;;  %vm1107_vm3 = vcmp.eq.f32.partialorder %v1106_v21, 8.507059e+37  ;;  %v1001_v33 = vand.u32 2147483647, %v5834_v63 }
 0x3c0   : > { %v1101_v10 = vadd.f32 %v6059_v35, %v1100_v2 }
 0x3c1   : > { %v2248_v7 = vsub.f32 %v1066_v62, %v5721_v36  ;;  %v6104_v36 = vpop.permute.xlu1 %2214  ;;  %vm1002_vm6 = vcmp.eq.f32.partialorder %v1001_v33, 8.507059e+37 }
 0x3c2   : > { %v6081_v3 = vpop.permute.xlu0 %2189  ;;  %v1105_v61 = vsel %vm1104_vm1, %v6059_v35, %v1101_v10 }
 0x3c3   : > { %2339 = vadd.xlane.f32.xlu1 %v2338_v38  ;;  %v6071_v38 = vpop.eup %4999  ;;  %v6073_v31 = vpop.xlane.xlu2 %903  ;;  %vm2280_vm15 = vcmp.ge.f32.partialorder %v2248_v7, 0.0 }
 0x3c4   : > { %v993_v24 = vmul.f32 %v6071_v38, %v5834_v63  ;;  %5003 = vrcp.f32 %v6073_v31  ;;  %vm998_vm2 = vweird.f32 %v6071_v38  ;;  %v6114_v62 = vsel %vm2280_vm15, %v2248_v7, 0.0 }
 0x3c5   : > { %5005 = vrcp.f32 %v5980_v16  ;;  %vm999_vm5 = vmor %vm997_vm4, %vm998_vm2  ;;  %vm1147_vm9 = vweird.f32 %v6073_v31 }
 0x3c6   : > { %v994_v44 = vsub.f32 1.0, %v993_v24  ;;  %5007 = vpow2.f32 %v854_v39 }
 0x3c8   : > { %v995_v34 = vmul.f32 %v6071_v38, %v994_v44 }
 0x3ca   : > { %v6101_v32 = vpop.xlane.xlu0 %897 }
 0x3cb   : > { %927 = vadd.xlane.f32.xlu1 %v926_v50  ;;  %v6086_v50 = vpop.eup %5001  ;;  %v6091_v19 = vpop.permute.xlu2 %2209 }
 0x3cc   : > { %v6095_v41 = vpop.eup %5003  ;;  %v935_v1 = vsel %vm673_vm0, %v6086_v50, 0.0 }
 0x3cd   : > { %v6107_v8 = vpop.eup %5005  ;;  %v1143_v4 = vmul.f32 %v6095_v41, %v6073_v31  ;;  %vm1148_vm8 = vweird.f32 %v6095_v41 }
 0x3ce   : > { %v1023_v2 = vmul.f32 %v6107_v8, %v5980_v16  ;;  %vm6158_vm11 = vmor %vm1147_vm9, %vm1148_vm8  ;;  %vm1028_vm12 = vweird.f32 %v6107_v8 }
 0x3cf   : > { %2239 = vperm.xlu2 %4691, %v2081_v5   ;;  %v1108_v5 = vand.u32 2147483648, %v6008_v15  ;;  %v1003_v15 = vand.u32 2147483648, %v5834_v63  ;;  %v1144_v35 = vsub.f32 1.0, %v1143_v4  ;;  %v1033_v4 = vand.u32 2147483648, %v5980_v16 }
 0x3d1   : > { %v1109_v24 = vor.u32 1.1754944e-38, %v1108_v5  ;;  %v1004_v60 = vor.u32 1.1754944e-38, %v1003_v15  ;;  %v1145_v63 = vmul.f32 %v6095_v41, %v1144_v35  ;;  %v1031_v15 = vand.u32 2147483647, %v5980_v16 }
 0x3d2   : > { %v1034_v35 = vor.u32 1.1754944e-38, %v1033_v4 }
 0x3d3   : > { %2348 = vadd.xlane.f32.xlu1 %v2347_v20  ;;  %v996_v20 = vadd.f32 %v6071_v38, %v995_v34  ;;  %v1110_v44 = vsel %vm1107_vm3, %v1109_v24, %v1105_v61  ;;  %v2356_v34 = vsel %vm673_vm0, %v6114_v62, 0.0  ;;  %v1024_v61 = vsub.f32 1.0, %v1023_v2  ;;  %v6132_v24 = vpop.eup %5007  ;;  %vm6185_vm3 = vmor %vm1027_vm7, %vm1028_vm12 }
 0x3d4   : > { %v1111_v21 = vmul.f32 %v5799_v43, %v1110_v44  ;;  %vm6169_vm13 = vcmp.eq.f32.partialorder %v1031_v15, 8.507059e+37 }
 0x3d5   : > { %v1000_v7 = vsel %vm999_vm5, %v6071_v38, %v996_v20  ;;  %v1025_v20 = vmul.f32 %v6107_v8, %v1024_v61 }
 0x3d6   : > { %v1005_v39 = vsel %vm1002_vm6, %v1004_v60, %v1000_v7  ;;  %v2251_v38 = vsub.f32 %v1111_v21, %v5817_v40  ;;  %v1146_v60 = vadd.f32 %v6095_v41, %v1145_v63  ;;  %v944_v40 = vsel %vm673_vm0, %v6132_v24, 0.0 }
 0x3d7   : > { %v1006_v43 = vmul.f32 %v5693_v46, %v1005_v39  ;;  %v1153_v46 = vand.u32 2147483648, %v6073_v31  ;;  %v791_v7 = vsub.f32 %v5666_v6, %v6002_v48 }
 0x3d8   : > { %vm2283_vm10 = vcmp.ge.f32.partialorder %v2251_v38, 0.0  ;;  %v1150_v6 = vsel %vm6158_vm11, %v6095_v41, %v1146_v60 }
 0x3d9   : > { %v2244_v61 = vsub.f32 %v1006_v43, %v5734_v58  ;;  %v844_v60 = vmul.f32 1.442695, %v791_v7 }
 0x3db   : > { %936 = vadd.xlane.f32.xlu1 %v935_v1  ;;  %v6124_v1 = vpop.xlane.xlu0 %756  ;;  %vm2276_vm1 = vcmp.ge.f32.partialorder %v2244_v61, 0.0 }
 0x3dc   : > { %v6197_v16 = vsel %vm2276_vm1, %v2244_v61, 0.0 }
 0x3e1   : > { %v763_v10 = vpop.xlane.xlu2 %762 }
 0x3e2   : > { %v799_v2 = vsub.f32 %v5906_v9, %v763_v10  ;;  %v1151_v10 = vand.u32 2147483647, %v6073_v31  ;;  %v6173_v31 = vsel %vm2283_vm10, %v2251_v38, 0.0 }
 0x3e3   : > { %v6126_v5 = vpop.xlane.xlu1 %909  ;;  %2357 = vadd.xlane.f32.xlu1 %v2356_v34  ;;  %v6163_v39 = vpop.permute.xlu0 %2204  ;;  %v2365_v7 = vsel %vm673_vm0, %v6173_v31, 0.0 }
 0x3e4   : > { %5009 = vrcp.f32 %v6126_v5  ;;  %v860_v4 = vmul.f32 1.442695, %v799_v2  ;;  %v1183_v43 = vand.u32 2147483648, %v6126_v5  ;;  %vm1152_vm15 = vcmp.eq.f32.partialorder %v1151_v10, 8.507059e+37 }
 0x3e5   : > { %5011 = vrcp.f32 %v6041_v0  ;;  %vm1177_vm2 = vweird.f32 %v6126_v5 }
 0x3e9   : > { %v6141_v44 = vpop.xlane.xlu2 %912 }
 0x3ea   : > { %v5010_v33 = vpop.eup %5009  ;;  %5013 = vrcp.f32 %v6141_v44  ;;  %vm1192_vm7 = vweird.f32 %v6141_v44 }
 0x3eb   : > { %v1173_v34 = vmul.f32 %v5010_v33, %v6126_v5  ;;  %v769_v9 = vpop.xlane.xlu1 %768  ;;  %945 = vadd.xlane.f32.xlu1 %v944_v40  ;;  %v6176_v55 = vpop.eup %5011  ;;  %vm1178_vm14 = vweird.f32 %v5010_v33 }
 0x3ec   : > { %v801_v21 = vsub.f32 %v5950_v26, %v769_v9  ;;  %v1026_v26 = vadd.f32 %v6107_v8, %v1025_v20  ;;  %v1154_v9 = vor.u32 1.1754944e-38, %v1153_v46  ;;  %v1068_v10 = vmul.f32 %v6176_v55, %v6041_v0  ;;  %vm1179_vm4 = vmor %vm1177_vm2, %vm1178_vm14  ;;  %v7969_v46 = vld [vmem:[#allocation11_spill] sm:$0xff] }
 0x3ed   : > { %v1174_v40 = vsub.f32 1.0, %v1173_v34  ;;  %v1181_v34 = vand.u32 2147483647, %v6126_v5  ;;  %v1184_v5 = vor.u32 1.1754944e-38, %v1183_v43  ;;  %vm1073_vm12 = vweird.f32 %v6176_v55 }
 0x3ee   : > { %v864_v48 = vmul.f32 1.442695, %v801_v21  ;;  %v1155_v20 = vsel %vm1152_vm15, %v1154_v9, %v1150_v6  ;;  %v1030_v21 = vsel %vm6185_vm3, %v6107_v8, %v1026_v26  ;;  %v6201_v9 = vpop.xlane.xlu0 %906  ;;  %v1196_v8 = vand.u32 2147483647, %v6141_v44 }
 0x3ef   : > { %v1175_v2 = vmul.f32 %v5010_v33, %v1174_v40  ;;  %vm1182_vm5 = vcmp.eq.f32.partialorder %v1181_v34, 8.507059e+37  ;;  %v1156_v6 = vmul.f32 %v5854_v17, %v1155_v20  ;;  %v1069_v61 = vsub.f32 1.0, %v1068_v10 }
 0x3f0   : > { %v5014_v41 = vpop.eup %5013  ;;  %5015 = vpow2.f32 %v864_v48  ;;  %v1198_v48 = vand.u32 2147483648, %v6141_v44  ;;  %v1035_v34 = vsel %vm6169_vm13, %v1034_v35, %v1030_v21  ;;  %vm1197_vm10 = vcmp.eq.f32.partialorder %v1196_v8, 8.507059e+37 }
 0x3f1   : > { %5017 = vpow2.f32 %v860_v4  ;;  %v1188_v38 = vmul.f32 %v5014_v41, %v6141_v44  ;;  %v1176_v15 = vadd.f32 %v5010_v33, %v1175_v2  ;;  %vm1193_vm6 = vweird.f32 %v5014_v41 }
 0x3f2   : > { %5019 = vpow2.f32 %v844_v60  ;;  %vm1194_vm8 = vmor %vm1192_vm7, %vm1193_vm6  ;;  %v1036_v58 = vmul.f32 %v7969_v46, %v1035_v34  ;;  %vm1072_vm13 = vweird.f32 %v6041_v0 }
 0x3f3   : > { %v1189_v63 = vsub.f32 1.0, %v1188_v38  ;;  %2366 = vadd.xlane.f32.xlu1 %v2365_v7  ;;  %v1180_v4 = vsel %vm1179_vm4, %v5010_v33, %v1176_v15  ;;  %v2344_v33 = vsel %vm673_vm0, %v6197_v16, 0.0  ;;  %v2254_v38 = vsub.f32 %v1156_v6, %v5837_v22  ;;  %vm1074_vm15 = vmor %vm1072_vm13, %vm1073_vm12 }
 0x3f4   : > { %v1185_v40 = vsel %vm1182_vm5, %v1184_v5, %v1180_v4  ;;  %v1199_v15 = vor.u32 1.1754944e-38, %v1198_v48  ;;  %5021 = vrcp.f32 %v6101_v32  ;;  %v1070_v7 = vmul.f32 %v6176_v55, %v1069_v61  ;;  %v7972_v4 = vld [vmem:[#allocation13_spill] sm:$0xff] }
 0x3f5   : > { %v1190_v2 = vmul.f32 %v5014_v41, %v1189_v63  ;;  %v1186_v43 = vmul.f32 %v5933_v37, %v1185_v40  ;;  %vm2286_vm11 = vcmp.ge.f32.partialorder %v2254_v38, 0.0  ;;  %v794_v40 = vsub.f32 %v7972_v4, %v6055_v12 }
 0x3f6   : > { %v6205_v26 = vpop.eup %5015  ;;  %v6228_v21 = vpop.xlane.xlu0 %765  ;;  %v1078_v61 = vand.u32 2147483648, %v6041_v0  ;;  %v1076_v12 = vand.u32 2147483647, %v6041_v0  ;;  %vm1117_vm4 = vweird.f32 %v6101_v32 }
 0x3f7   : > { %7968 = vst [vmem:[#allocation25_spill] sm:$0xff] %v6205_v26  ;;  %v6211_v17 = vpop.eup %5017  ;;  %v959_v60 = vsel %vm673_vm0, %v6205_v26, 0.0  ;;  %v2256_v37 = vsub.f32 %v1186_v43, %v5823_v47  ;;  %v1191_v20 = vadd.f32 %v5014_v41, %v1190_v2  ;;  %v6237_v2 = vsel %vm2286_vm11, %v2254_v38, 0.0 }
 0x3f8   : > { %960 = vadd.xlane.f32.xlu0 %v959_v60  ;;  %2345 = vadd.xlane.f32.xlu2 %v2344_v33  ;;  %v6219_v10 = vpop.eup %5019  ;;  %v953_v44 = vsel %vm673_vm0, %v6211_v17, 0.0  ;;  %v1071_v43 = vadd.f32 %v6176_v55, %v1070_v7  ;;  %v850_v33 = vmul.f32 1.442695, %v794_v40  ;;  %v2374_v34 = vsel %vm673_vm0, %v6237_v2, 0.0 }
 0x3f9   : > { %vm2288_vm9 = vcmp.ge.f32.partialorder %v2256_v37, 0.0  ;;  %v1195_v35 = vsel %vm1194_vm8, %v5014_v41, %v1191_v20  ;;  %v7971_v41 = vld [vmem:[#allocation14_spill] sm:$0xff]  ;;  %v929_v6 = vsel %vm673_vm0, %v6219_v10, 0.0  ;;  %vm1077_vm2 = vcmp.eq.f32.partialorder %v1076_v12, 8.507059e+37 }
 0x3fa   : > { %v1200_v47 = vsel %vm1197_vm10, %v1199_v15, %v1195_v35  ;;  %v6225_v5 = vsel %vm2288_vm9, %v2256_v37, 0.0  ;;  %v2246_v63 = vsub.f32 %v1036_v58, %v7971_v41  ;;  %7973 = vst [vmem:[#allocation14_spill] sm:$0xff] %v6237_v2  ;;  %v1075_v37 = vsel %vm1074_vm15, %v6176_v55, %v1071_v43  ;;  %v7976_v35 = vld [vmem:[#allocation12_spill] sm:$0xff] }
 0x3fb   : > { %954 = vadd.xlane.f32.xlu1 %v953_v44  ;;  %7970 = vst [vmem:[#allocation11_spill] sm:$0xff] %v6225_v5  ;;  %v1201_v22 = vmul.f32 %v5945_v13, %v1200_v47  ;;  %v2380_v48 = vsel %vm673_vm0, %v6225_v5, 0.0  ;;  %v5022_v13 = vpop.eup %5021  ;;  %5023 = vpow2.f32 %v850_v33  ;;  %vm1162_vm9 = vweird.f32 %v6201_v9 }
 0x3fc   : > { %vm2278_vm14 = vcmp.ge.f32.partialorder %v2246_v63, 0.0  ;;  %v1113_v60 = vmul.f32 %v5022_v13, %v6101_v32  ;;  %5025 = vrcp.f32 %v6201_v9  ;;  %vm1118_vm3 = vweird.f32 %v5022_v13 }
 0x3fd   : > { %v2257_v8 = vsub.f32 %v1201_v22, %v5973_v56  ;;  %v6249_v20 = vsel %vm2278_vm14, %v2246_v63, 0.0  ;;  %v1079_v56 = vor.u32 1.1754944e-38, %v1078_v61  ;;  %v7977_v22 = vld [vmem:[#allocation19_spill] sm:$0xff]  ;;  %v7978_v63 = vld [vmem:[#allocation16_spill] sm:$0xff]  ;;  %v1121_v61 = vand.u32 2147483647, %v6101_v32  ;;  %vm1119_vm6 = vmor %vm1117_vm4, %vm1118_vm3 }
 0x3fe   : > { %v1114_v15 = vsub.f32 1.0, %v1113_v60  ;;  %v6251_v46 = vpop.permute.xlu0 %2219  ;;  %v2350_v0 = vsel %vm673_vm0, %v6249_v20, 0.0  ;;  %v797_v4 = vsub.f32 %v7978_v63, %v6124_v1 }
 0x3ff   : > { %vm2289_vm1 = vcmp.ge.f32.partialorder %v2257_v8, 0.0  ;;  %v1080_v38 = vsel %vm1077_vm2, %v1079_v56, %v1075_v37  ;;  %7974 = vst [vmem:[#allocation13_spill] sm:$0xff] %v6251_v46  ;;  %vm1122_vm7 = vcmp.eq.f32.partialorder %v1121_v61, 8.507059e+37  ;;  %v6603_v46 = vld [vmem:[%s5419_s10 + $0x60] sm:$0xff] }
 0x400   : > { %2381 = vadd.xlane.f32.xlu0 %v2380_v48  ;;  %930 = vadd.xlane.f32.xlu2 %v929_v6  ;;  %v6255_v58 = vsel %vm2289_vm1, %v2257_v8, 0.0  ;;  %v1081_v44 = vmul.f32 %v7976_v35, %v1080_v38  ;;  %v1115_v47 = vmul.f32 %v5022_v13, %v1114_v15  ;;  %v1123_v8 = vand.u32 2147483648, %v6101_v32  ;;  %v7979_v32 = vld [vmem:[#allocation15_spill] sm:$0xff] }
 0x401   : > { %7975 = vst [vmem:[#allocation26_spill] sm:$0xff] %v6255_v58  ;;  %v2383_v55 = vsel %vm673_vm0, %v6255_v58, 0.0  ;;  %v6261_v7 = vpop.eup %5023  ;;  %v856_v12 = vmul.f32 1.442695, %v797_v4 }
 0x402   : > { %v2249_v41 = vsub.f32 %v1081_v44, %v7977_v22  ;;  %v938_v6 = vsel %vm673_vm0, %v6261_v7, 0.0  ;;  %v1116_v48 = vadd.f32 %v5022_v13, %v1115_v47  ;;  %v5026_v43 = vpop.eup %5025  ;;  %v1124_v60 = vor.u32 1.1754944e-38, %v1123_v8  ;;  %v7980_v47 = vld [vmem:[#allocation18_spill] sm:$0xff] }
 0x403   : > { %2375 = vadd.xlane.f32.xlu1 %v2374_v34  ;;  %v1158_v1 = vmul.f32 %v5026_v43, %v6201_v9  ;;  %v800_v22 = vsub.f32 %v7980_v47, %v6228_v21  ;;  %vm1163_vm8 = vweird.f32 %v5026_v43 }
 0x404   : > { %vm2281_vm5 = vcmp.ge.f32.partialorder %v2249_v41, 0.0  ;;  %v1120_v33 = vsel %vm1119_vm6, %v5022_v13, %v1116_v48  ;;  %v1166_v48 = vand.u32 2147483647, %v6201_v9  ;;  %vm1164_vm11 = vmor %vm1162_vm9, %vm1163_vm8 }
 0x405   : > { %v6275_v34 = vsel %vm2281_vm5, %v2249_v41, 0.0  ;;  %v1125_v37 = vsel %vm1122_vm7, %v1124_v60, %v1120_v33  ;;  %v1159_v56 = vsub.f32 1.0, %v1158_v1  ;;  %v862_v8 = vmul.f32 1.442695, %v800_v22  ;;  %v4618_v1 = vld [vmem:[%s7883_s3 + $0x38] sm:$0xff]  ;;  %v6296_v33 = vpop.permute.xlu1 %2229 }
 0x406   : > { %v6266_v40 = vpop.xlane.xlu0 %915  ;;  %v2359_v38 = vsel %vm673_vm0, %v6275_v34, 0.0  ;;  %vm1167_vm12 = vcmp.eq.f32.partialorder %v1166_v48, 8.507059e+37  ;;  %3074 = vmatpush.bf16.msra.mxu2 %v4618_v1 }
 0x407   : > { %5027 = vrcp.f32 %v6266_v40  ;;  %v1160_v35 = vmul.f32 %v5026_v43, %v1159_v56  ;;  %v1213_v56 = vand.u32 2147483648, %v6266_v40  ;;  %vm1207_vm14 = vweird.f32 %v6266_v40 }
 0x408   : > { %2351 = vadd.xlane.f32.xlu2 %v2350_v0  ;;  %5029 = vpow2.f32 %v856_v12  ;;  %v1126_v0 = vmul.f32 %v7979_v32, %v1125_v37 }
 0x409   : > { %v1161_v4 = vadd.f32 %v5026_v43, %v1160_v35  ;;  %5031 = vpow2.f32 %v862_v8  ;;  %v4616_v35 = vld [vmem:[%s7883_s3 + $0x28] sm:$0xff]  ;;  %v1214_v22 = vor.u32 1.1754944e-38, %v1213_v56 }
 0x40a   : > { %v2252_v13 = vsub.f32 %v1126_v0, %v5888_v14  ;;  %v1211_v0 = vand.u32 2147483647, %v6266_v40 }
 0x40b   : > { %2384 = vadd.xlane.f32.xlu1 %v2383_v55  ;;  %v1165_v61 = vsel %vm1164_vm11, %v5026_v43, %v1161_v4 }
 0x40c   : > { %vm2284_vm10 = vcmp.ge.f32.partialorder %v2252_v13, 0.0  ;;  %vm1212_vm1 = vcmp.eq.f32.partialorder %v1211_v0, 8.507059e+37 }
 0x40d   : > { %v5028_v15 = vpop.eup %5027  ;;  %v6291_v12 = vsel %vm2284_vm10, %v2252_v13, 0.0 }
 0x40e   : > { %v1203_v44 = vmul.f32 %v5028_v15, %v6266_v40  ;;  %v6281_v55 = vpop.eup %5029  ;;  %v2368_v43 = vsel %vm673_vm0, %v6291_v12, 0.0  ;;  %vm1208_vm13 = vweird.f32 %v5028_v15  ;;  %v4615_v40 = vld [vmem:[%s7883_s3 + $0x20] sm:$0xff] }
 0x40f   : > { %v947_v63 = vsel %vm673_vm0, %v6281_v55, 0.0  ;;  %vm1209_vm15 = vmor %vm1207_vm14, %vm1208_vm13  ;;  %v6312_v47 = vpop.eup %5031 }
 0x410   : > { %939 = vadd.xlane.f32.xlu2 %v938_v6  ;;  %v1204_v41 = vsub.f32 1.0, %v1203_v44  ;;  %v1168_v6 = vand.u32 2147483648, %v6201_v9  ;;  %v4617_v9 = vld [vmem:[%s7883_s3 + $0x30] sm:$0xff]  ;;  %v6310_v44 = vpop.permute.xlu0 %2234  ;;  %7983 = vst [vmem:[#allocation19_spill] sm:$0xff] %v6312_v47 }
 0x411   : > { %3075 = vmatpush.bf16.msra.mxu2 %v4617_v9  ;;  %7982 = vst [vmem:[#allocation12_spill] sm:$0xff] %v6310_v44  ;;  %v4613_v9 = vld [vmem:[%s7883_s3 + $0x10] sm:$0xff] }
 0x412   : > { %v1205_v14 = vmul.f32 %v5028_v15, %v1204_v41  ;;  %v1169_v21 = vor.u32 1.1754944e-38, %v1168_v6  ;;  %v956_v6 = vsel %vm673_vm0, %v6312_v47, 0.0 }
 0x414   : > { %v1170_v60 = vsel %vm1167_vm12, %v1169_v21, %v1165_v61  ;;  %v1206_v37 = vadd.f32 %v5028_v15, %v1205_v14 }
 0x415   : > { %3076 = vmatpush.bf16.msra.mxu2 %v4616_v35 }
 0x416   : > { %v1210_v13 = vsel %vm1209_vm15, %v5028_v15, %v1206_v37  ;;  %v7984_v15 = vld [vmem:[#allocation20_spill] sm:$0xff]  ;;  %v7897_v37 = vmov 1  }
 0x417   : > { %v1215_v4 = vsel %vm1212_vm1, %v1214_v22, %v1210_v13  ;;  %4694 = vset.pattern.permute.xlu1 %v7897_v37  ;;  %v4612_v13 = vld [vmem:[%s7883_s3 + $0x8] sm:$0xff] }
 0x418   : > { %2360 = vadd.xlane.f32.xlu2 %v2359_v38  ;;  %v7981_v38 = vld [vmem:[#allocation17_spill] sm:$0xff]  ;;  %v1216_v48 = vmul.f32 %v7984_v15, %v1215_v4  ;;  %v2343_v8 = vpop.xlane.xlu0 %2342 }
 0x419   : > { %v1171_v32 = vmul.f32 %v7981_v38, %v1170_v60  ;;  %3077 = vmatpush.bf16.msra.mxu2 %v4615_v40  ;;  %vm2435_vm3 = vcmp.eq.f32.partialorder %v2343_v8, 0.0 }
 0x41a   : > { %v2258_v21 = vsub.f32 %v1216_v48, %v5962_v42 }
 0x41b   : > { %v2255_v41 = vsub.f32 %v1171_v32, %v5929_v29  ;;  %v4614_v29 = vld [vmem:[%s7883_s3 + $0x18] sm:$0xff]  ;;  %v6333_v32 = vsel %vm2435_vm3, 1.0, %v2343_v8 }
 0x41c   : > { %vm2290_vm5 = vcmp.ge.f32.partialorder %v2258_v21, 0.0  ;;  %vm2518_vm1 = vweird.f32 %v6333_v32 }
 0x41d   : > { %vm2287_vm2 = vcmp.ge.f32.partialorder %v2255_v41, 0.0  ;;  %3078 = vmatpush.bf16.msra.mxu2 %v4614_v29  ;;  %v6339_v22 = vsel %vm2290_vm5, %v2258_v21, 0.0  ;;  %v6346_v29 = vpop.permute.xlu2 %2224 }
 0x41e   : > { %v6321_v14 = vsel %vm2287_vm2, %v2255_v41, 0.0  ;;  %7986 = vst [vmem:[#allocation15_spill] sm:$0xff] %v6339_v22  ;;  %v2386_v48 = vsel %vm673_vm0, %v6339_v22, 0.0 }
 0x41f   : > { %7985 = vst [vmem:[#allocation16_spill] sm:$0xff] %v6321_v14 }
 0x420   : > { %948 = vadd.xlane.f32.xlu2 %v947_v63  ;;  %7987 = vst [vmem:[#allocation18_spill] sm:$0xff] %v6346_v29 }
 0x421   : > { %3079 = vmatpush.bf16.msra.mxu2 %v4613_v9 }
 0x425   : > { %3080 = vmatpush.bf16.msra.mxu2 %v4612_v13 }
 0x428   : > { %2369 = vadd.xlane.f32.xlu2 %v2368_v43  ;;  %v2377_v43 = vsel %vm673_vm0, %v6321_v14, 0.0 }
 0x42e   : > { %v919_v63 = vpop.xlane.xlu1 %918 }
 0x42f   : > { %5033 = vrcp.f32 %v919_v63  ;;  %v1228_v42 = vand.u32 2147483648, %v919_v63  ;;  %v1226_v35 = vand.u32 2147483647, %v919_v63  ;;  %vm1222_vm7 = vweird.f32 %v919_v63 }
 0x430   : > { %957 = vadd.xlane.f32.xlu2 %v956_v6  ;;  %v4611_v6 = vld [vmem:[%s7883_s3] sm:$0xff] }
 0x431   : > { %v1229_v4 = vor.u32 1.1754944e-38, %v1228_v42  ;;  %vm1227_vm9 = vcmp.eq.f32.partialorder %v1226_v35, 8.507059e+37  ;;  %3081 = vmatpush.bf16.msra.mxu2 %v4611_v6  ;;  %v7901_v42 = vmov 3  }
 0x432   : > { %4696 = vset.pattern.permute.xlu2 %v7901_v42 }
 0x435   : > { %v5034_v61 = vpop.eup %5033 }
 0x436   : > { %v1218_v1 = vmul.f32 %v5034_v61, %v919_v63  ;;  %v2340_v60 = vpop.xlane.xlu1 %2339  ;;  %vm1223_vm6 = vweird.f32 %v5034_v61 }
 0x437   : > { %vm2434_vm4 = vcmp.eq.f32.partialorder %v2340_v60, 0.0  ;;  %vm1224_vm8 = vmor %vm1222_vm7, %vm1223_vm6 }
 0x438   : > { %v1219_v56 = vsub.f32 1.0, %v1218_v1  ;;  %v2466_v38 = vsel %vm2434_vm4, 1.0, %v2340_v60  ;;  %2378 = vadd.xlane.f32.xlu2 %v2377_v43  ;;  %v7988_v60 = vld [vmem:[#allocation21_spill] sm:$0xff] }
 0x439   : > { %5035 = vrcp.f32 %v2466_v38  ;;  %v2507_v35 = vand.u32 2147483647, %v2466_v38  ;;  %vm2503_vm12 = vweird.f32 %v2466_v38 }
 0x43a   : > { %v1220_v0 = vmul.f32 %v5034_v61, %v1219_v56  ;;  %5037 = vrcp.f32 %v6333_v32  ;;  %v2509_v56 = vand.u32 2147483648, %v2466_v38 }
 0x43b   : > { %vm2508_vm14 = vcmp.eq.f32.partialorder %v2507_v35, 8.507059e+37  ;;  %v6366_v35 = vld [vmem:[%s5419_s10 + $0x8] sm:$0xff] }
 0x43c   : > { %v1221_v41 = vadd.f32 %v5034_v61, %v1220_v0  ;;  %v2510_v6 = vor.u32 1.1754944e-38, %v2509_v56 }
 0x43e   : > { %v1225_v40 = vsel %vm1224_vm8, %v5034_v61, %v1221_v41  ;;  %v6355_v41 = vld [vmem:[%s5419_s10] sm:$0xff] }
 0x43f   : > { %v5036_v15 = vpop.eup %5035  ;;  %v1230_v8 = vsel %vm1227_vm9, %v1229_v4, %v1225_v40  ;;  %3082 = vmatmul.bf16.vlgmr.msra.gmra.mxu2 %v6355_v41  ;;  %v922_v40 = vpop.xlane.xlu2 %921 }
 0x440   : > { %v2499_v63 = vmul.f32 %v5036_v15, %v2466_v38  ;;  %2387 = vadd.xlane.f32.xlu2 %v2386_v48  ;;  %v1231_v21 = vmul.f32 %v6017_v30, %v1230_v8  ;;  %v5038_v1 = vpop.eup %5037  ;;  %vm2504_vm10 = vweird.f32 %v5036_v15  ;;  %v7899_v8 = vmov 0  }
 0x441   : > { %v2514_v0 = vmul.f32 %v5038_v1, %v6333_v32  ;;  %vm2505_vm13 = vmor %vm2503_vm12, %vm2504_vm10  ;;  %4693 = vset.pattern.permute.xlu0 %v7899_v8  ;;  %5039 = vrcp.f32 %v922_v40  ;;  %vm2519_vm15 = vweird.f32 %v5038_v1  ;;  %vm1237_vm5 = vweird.f32 %v922_v40 }
 0x442   : > { %v2500_v61 = vsub.f32 1.0, %v2499_v63  ;;  %v2259_v9 = vsub.f32 %v1231_v21, %v7988_v60  ;;  %vm2520_vm2 = vmor %vm2518_vm1, %vm2519_vm15 }
 0x443   : > { %v2515_v63 = vsub.f32 1.0, %v2514_v0 }
 0x444   : > { %v2501_v43 = vmul.f32 %v5036_v15, %v2500_v61  ;;  %vm2291_vm11 = vcmp.ge.f32.partialorder %v2259_v9, 0.0 }
 0x445   : > { %v6352_v13 = vsel %vm2291_vm11, %v2259_v9, 0.0  ;;  %v2516_v60 = vmul.f32 %v5038_v1, %v2515_v63 }
 0x446   : > { %7989 = vst [vmem:[#allocation17_spill] sm:$0xff] %v6352_v13  ;;  %v2502_v30 = vadd.f32 %v5036_v15, %v2501_v43  ;;  %v2389_v4 = vsel %vm673_vm0, %v6352_v13, 0.0 }
 0x447   : > { %2390 = vadd.xlane.f32.xlu0 %v2389_v4  ;;  %v5040_v9 = vpop.eup %5039  ;;  %v2517_v43 = vadd.f32 %v5038_v1, %v2516_v60  ;;  %v2524_v4 = vand.u32 2147483648, %v6333_v32 }
 0x448   : > { %v2506_v48 = vsel %vm2505_vm13, %v5036_v15, %v2502_v30  ;;  %v2522_v15 = vand.u32 2147483647, %v6333_v32  ;;  %v1233_v56 = vmul.f32 %v5040_v9, %v922_v40  ;;  %vm1238_vm4 = vweird.f32 %v5040_v9 }
 0x449   : > { %v2511_v21 = vsel %vm2508_vm14, %v2510_v6, %v2506_v48  ;;  %v2521_v0 = vsel %vm2520_vm2, %v5038_v1, %v2517_v43  ;;  %v925_v48 = vpop.xlane.xlu0 %924  ;;  %v1241_v43 = vand.u32 2147483647, %v922_v40  ;;  %vm1239_vm6 = vmor %vm1237_vm5, %vm1238_vm4 }
 0x44a   : > { %v2512_v61 = vmul.f32 %v2511_v21, %v6039_v18  ;;  %v2525_v18 = vor.u32 1.1754944e-38, %v2524_v4  ;;  %vm2523_vm3 = vcmp.eq.f32.partialorder %v2522_v15, 8.507059e+37  ;;  %v1234_v30 = vsub.f32 1.0, %v1233_v56  ;;  %v6375_v4 = vpop.permute.xlu2 %2239 }
 0x44b   : > { %5041 = vrcp.f32 %v925_v48  ;;  %7990 = vst [vmem:[#allocation20_spill] sm:$0xff] %v6375_v4  ;;  %v7904_v15 = vmov 2   ;;  %vm1242_vm7 = vcmp.eq.f32.partialorder %v1241_v43, 8.507059e+37  ;;  %vm1252_vm11 = vweird.f32 %v925_v48 }
 0x44c   : > { %v2978_v38 = vmul.f32 0.125, %v2512_v61  ;;  %v2526_v6 = vsel %vm2523_vm3, %v2525_v18, %v2521_v0  ;;  %v1235_v32 = vmul.f32 %v5040_v9, %v1234_v30  ;;  %v1243_v61 = vand.u32 2147483648, %v922_v40  ;;  %v6379_v18 = vld [vmem:[%s5419_s10 + $0x10] sm:$0xff] }
 0x44d   : > { %v2527_v63 = vmul.f32 %v2526_v6, %v5893_v54  ;;  %v1256_v43 = vand.u32 2147483647, %v925_v48 }
 0x44e   : > { %3404 = vperm.xlu1 %4694, %v2978_v38   ;;  %v1236_v1 = vadd.f32 %v5040_v9, %v1235_v32  ;;  %v1244_v0 = vor.u32 1.1754944e-38, %v1243_v61  ;;  %v1258_v61 = vand.u32 2147483648, %v925_v48 }
 0x44f   : > { %3087 = vmatmul.bf16.gmra.mxu2 %v6366_v35  ;;  %v6371_v21 = vmul.f32 0.125, %v2527_v63  ;;  %vm1257_vm13 = vcmp.eq.f32.partialorder %v1256_v43, 8.507059e+37 }
 0x450   : > { %v1240_v54 = vsel %vm1239_vm6, %v5040_v9, %v1236_v1 }
 0x451   : > { %v5042_v60 = vpop.eup %5041  ;;  %v1245_v30 = vsel %vm1242_vm7, %v1244_v0, %v1240_v54 }
 0x452   : > { %v1248_v56 = vmul.f32 %v5042_v60, %v925_v48  ;;  %v1246_v40 = vmul.f32 %v6006_v57, %v1245_v30  ;;  %vm1253_vm9 = vweird.f32 %v5042_v60  ;;  %v6389_v30 = vld [vmem:[%s5419_s10 + $0x18] sm:$0xff] }
 0x453   : > { %vm1254_vm12 = vmor %vm1252_vm11, %vm1253_vm9 }
 0x454   : > { %v1249_v6 = vsub.f32 1.0, %v1248_v56  ;;  %v2260_v32 = vsub.f32 %v1246_v40, %v6021_v45 }
 0x456   : > { %4697 = vset.pattern.permute.xlu1 %v7899_v8  ;;  %vm2292_vm10 = vcmp.ge.f32.partialorder %v2260_v32, 0.0 }
 0x457   : > { %v6386_v57 = vsel %vm2292_vm10, %v2260_v32, 0.0 }
 0x458   : > { %3790 = vperm.xlu2 %4696, %v2978_v38   ;;  %7991 = vst [vmem:[#allocation21_spill] sm:$0xff] %v6386_v57  ;;  %v2392_v45 = vsel %vm673_vm0, %v6386_v57, 0.0 }
 0x45b   : > { %3180 = vperm.xlu0 %4693, %v2978_v38  }
 0x45f   : > { %3092 = vmatmul.bf16.gmra.mxu2 %v6379_v18 }
 0x460   : > { %4698 = vset.pattern.permute.xlu2 %v7897_v37 }
 0x461   : > { %3408 = vperm.xlu2 %4698, %v6371_v21  }
 0x463   : > { %4695 = vset.pattern.permute.xlu0 %v7904_v15 }
 0x464   : > { %3597 = vperm.xlu0 %4695, %v2978_v38   ;;  %v1250_v38 = vmul.f32 %v5042_v60, %v1249_v6  ;;  %v1259_v6 = vor.u32 1.1754944e-38, %v1258_v61 }
 0x466   : > { %v1251_v1 = vadd.f32 %v5042_v60, %v1250_v38 }
 0x468   : > { %v1255_v0 = vsel %vm1254_vm12, %v5042_v60, %v1251_v1 }
 0x469   : > { %4701 = vset.pattern.permute.xlu2 %v7899_v8  ;;  %v1260_v40 = vsel %vm1257_vm13, %v1259_v6, %v1255_v0 }
 0x46a   : > { %v1261_v48 = vmul.f32 %v5902_v25, %v1260_v40  ;;  %v6400_v25 = vld [vmem:[%s5419_s10 + $0x20] sm:$0xff] }
 0x46b   : > { %v2346_v63 = vpop.xlane.xlu2 %2345 }
 0x46c   : > { %vm2436_vm8 = vcmp.eq.f32.partialorder %v2346_v63, 0.0  ;;  %4702 = vset.pattern.permute.xlu0 %v7897_v37  ;;  %v928_v37 = vpop.xlane.xlu1 %927  ;;  %v2261_v61 = vsub.f32 %v1261_v48, %v5975_v49 }
 0x46d   : > { %v2468_v9 = vsel %vm2436_vm8, 1.0, %v2346_v63  ;;  %vm1267_vm7 = vweird.f32 %v928_v37 }
 0x46e   : > { %5043 = vrcp.f32 %v2468_v9  ;;  %v2539_v60 = vand.u32 2147483648, %v2468_v9  ;;  %vm2533_vm15 = vweird.f32 %v2468_v9  ;;  %v2537_v1 = vand.u32 2147483647, %v2468_v9 }
 0x46f   : > { %3097 = vmatmul.bf16.gmra.mxu2 %v6389_v30  ;;  %vm2293_vm3 = vcmp.ge.f32.partialorder %v2261_v61, 0.0  ;;  %5045 = vrcp.f32 %v928_v37 }
 0x470   : > { %v2540_v43 = vor.u32 1.1754944e-38, %v2539_v60  ;;  %vm2538_vm2 = vcmp.eq.f32.partialorder %v2537_v1, 8.507059e+37  ;;  %v6415_v1 = vld [vmem:[%s5419_s10 + $0x28] sm:$0xff] }
 0x473   : > { %v6397_v6 = vpop.xlane.xlu2 %930 }
 0x474   : > { %v5044_v54 = vpop.eup %5043  ;;  %v1288_v44 = vand.u32 2147483648, %v6397_v6 }
 0x475   : > { %v2529_v56 = vmul.f32 %v5044_v54, %v2468_v9  ;;  %vm2534_vm14 = vweird.f32 %v5044_v54  ;;  %v6405_v9 = vsel %vm2293_vm3, %v2261_v61, 0.0 }
 0x476   : > { %vm2535_vm1 = vmor %vm2533_vm15, %vm2534_vm14  ;;  %7992 = vst [vmem:[#allocation27_spill] sm:$0xff] %v6405_v9  ;;  %v2395_v49 = vsel %vm673_vm0, %v6405_v9, 0.0  ;;  %v5137_v9 = vld [vmem:[%s5419_s10 + $0x50] sm:$0xff] }
 0x477   : > { %v2530_v63 = vsub.f32 1.0, %v2529_v56 }
 0x478   : > { %2393 = vadd.xlane.f32.xlu1 %v2392_v45 }
 0x479   : > { %v2531_v38 = vmul.f32 %v5044_v54, %v2530_v63  ;;  %v2349_v63 = vpop.xlane.xlu1 %2348 }
 0x47a   : > { %vm2437_vm4 = vcmp.eq.f32.partialorder %v2349_v63, 0.0 }
 0x47b   : > { %v2532_v32 = vadd.f32 %v5044_v54, %v2531_v38  ;;  %v2352_v40 = vpop.xlane.xlu2 %2351 }
 0x47c   : > { %vm2438_vm5 = vcmp.eq.f32.partialorder %v2352_v40, 0.0 }
 0x47d   : > { %v2536_v56 = vsel %vm2535_vm1, %v5044_v54, %v2532_v32  ;;  %v5046_v54 = vpop.eup %5045  ;;  %v6412_v60 = vsel %vm2438_vm5, 1.0, %v2352_v40 }
 0x47e   : > { %v2541_v8 = vsel %vm2538_vm2, %v2540_v43, %v2536_v56  ;;  %vm1268_vm6 = vweird.f32 %v5046_v54  ;;  %v1273_v43 = vand.u32 2147483648, %v928_v37  ;;  %vm2563_vm2 = vweird.f32 %v6412_v60 }
 0x47f   : > { %v2542_v0 = vmul.f32 %v2541_v8, %v6197_v16  ;;  %3102 = vmatmul.bf16.gmra.mxu2 %v6400_v25  ;;  %v2469_v16 = vsel %vm2437_vm4, 1.0, %v2349_v63  ;;  %v1263_v8 = vmul.f32 %v5046_v54, %v928_v37  ;;  %vm1269_vm8 = vmor %vm1267_vm7, %vm1268_vm6 }
 0x480   : > { %5047 = vrcp.f32 %v2469_v16  ;;  %v1274_v40 = vor.u32 1.1754944e-38, %v1273_v43  ;;  %vm2548_vm11 = vweird.f32 %v2469_v16  ;;  %v2552_v43 = vand.u32 2147483647, %v2469_v16 }
 0x481   : > { %v6403_v45 = vmul.f32 0.125, %v2542_v0  ;;  %v1264_v38 = vsub.f32 1.0, %v1263_v8  ;;  %5049 = vrcp.f32 %v6412_v60  ;;  %v1271_v0 = vand.u32 2147483647, %v928_v37 }
 0x482   : > { %vm2553_vm13 = vcmp.eq.f32.partialorder %v2552_v43, 8.507059e+37 }
 0x483   : > { %3412 = vperm.xlu0 %4702, %v6403_v45   ;;  %v1265_v32 = vmul.f32 %v5046_v54, %v1264_v38  ;;  %v6421_v38 = vpop.xlane.xlu0 %933  ;;  %vm1272_vm9 = vcmp.eq.f32.partialorder %v1271_v0, 8.507059e+37 }
 0x485   : > { %v1266_v56 = vadd.f32 %v5046_v54, %v1265_v32 }
 0x486   : > { %v5048_v48 = vpop.eup %5047 }
 0x487   : > { %v2544_v61 = vmul.f32 %v5048_v48, %v2469_v16  ;;  %v5050_v8 = vpop.eup %5049  ;;  %vm2549_vm10 = vweird.f32 %v5048_v48 }
 0x488   : > { %v2559_v32 = vmul.f32 %v5050_v8, %v6412_v60  ;;  %vm2550_vm12 = vmor %vm2548_vm11, %vm2549_vm10  ;;  %vm2564_vm1 = vweird.f32 %v5050_v8  ;;  %vm1282_vm10 = vweird.f32 %v6397_v6 }
 0x489   : > { %v2545_v63 = vsub.f32 1.0, %v2544_v61  ;;  %vm2565_vm3 = vmor %vm2563_vm2, %vm2564_vm1 }
 0x48a   : > { %2396 = vadd.xlane.f32.xlu2 %v2395_v49  ;;  %v1270_v49 = vsel %vm1269_vm8, %v5046_v54, %v1266_v56  ;;  %v2554_v54 = vand.u32 2147483648, %v2469_v16  ;;  %v2560_v61 = vsub.f32 1.0, %v2559_v32  ;;  %v6429_v56 = vld [vmem:[%s5419_s10 + $0x30] sm:$0xff]  ;;  %v6442_v32 = vpop.xlane.xlu1 %936 }
 0x48b   : > { %4706 = vset.pattern.permute.xlu0 %v7904_v15  ;;  %v2546_v42 = vmul.f32 %v5048_v48, %v2545_v63  ;;  %v1275_v57 = vsel %vm1272_vm9, %v1274_v40, %v1270_v49  ;;  %v2355_v49 = vpop.xlane.xlu0 %2354 }
 0x48c   : > { %v1276_v13 = vmul.f32 %v6051_v53, %v1275_v57  ;;  %v2555_v40 = vor.u32 1.1754944e-38, %v2554_v54  ;;  %v2561_v58 = vmul.f32 %v5050_v8, %v2560_v61  ;;  %v7994_v53 = vmov 2  }
 0x48d   : > { %v2547_v37 = vadd.f32 %v5048_v48, %v2546_v42  ;;  %vm2439_vm15 = vcmp.eq.f32.partialorder %v2355_v49, 0.0  ;;  %v2569_v57 = vand.u32 2147483648, %v6412_v60 }
 0x48e   : > { %v2262_v0 = vsub.f32 %v1276_v13, %v5881_v27  ;;  %v2471_v13 = vsel %vm2439_vm15, 1.0, %v2355_v49 }
 0x48f   : > { %3107 = vmatmul.bf16.gmra.mxu2 %v6415_v1  ;;  %v2551_v63 = vsel %vm2550_vm12, %v5048_v48, %v2547_v37  ;;  %v2567_v48 = vand.u32 2147483647, %v6412_v60  ;;  %5051 = vrcp.f32 %v2471_v13  ;;  %v2570_v37 = vor.u32 1.1754944e-38, %v2569_v57  ;;  %v6449_v60 = vld [vmem:[%s5419_s10 + $0x38] sm:$0xff]  ;;  %v6458_v57 = vpop.xlane.xlu2 %939 }
 0x490   : > { %vm2294_vm14 = vcmp.ge.f32.partialorder %v2262_v0, 0.0  ;;  %v2556_v42 = vsel %vm2553_vm13, %v2555_v40, %v2551_v63  ;;  %5053 = vrcp.f32 %v6397_v6  ;;  %v7997_v40 = vmov 1  }
 0x491   : > { %3185 = vperm.xlu1 %4697, %v6371_v21   ;;  %v6437_v16 = vsel %vm2294_vm14, %v2262_v0, 0.0  ;;  %v2557_v27 = vmul.f32 %v2556_v42, %v6075_v52  ;;  %vm2568_vm4 = vcmp.eq.f32.partialorder %v2567_v48, 8.507059e+37  ;;  %v7996_v52 = vmov 0  }
 0x492   : > { %7995 = vst [vmem:[#allocation28_spill] sm:$0xff] %v6437_v16  ;;  %vm2578_vm6 = vweird.f32 %v2471_v13  ;;  %5055 = vrcp.f32 %v6421_v38  ;;  %vm1297_vm14 = vweird.f32 %v6421_v38 }
 0x493   : > { %v2981_v54 = vmul.f32 0.125, %v2557_v27  ;;  %v6461_v48 = vpop.xlane.xlu0 %942  ;;  %5057 = vrcp.f32 %v6442_v32 }
 0x495   : > { %v5052_v0 = vpop.eup %5051 }
 0x496   : > { %v2574_v63 = vmul.f32 %v5052_v0, %v2471_v13  ;;  %vm2579_vm5 = vweird.f32 %v5052_v0 }
 0x497   : > { %vm2580_vm7 = vmor %vm2578_vm6, %vm2579_vm5  ;;  %vm1312_vm5 = vweird.f32 %v6442_v32 }
 0x498   : > { %v2575_v42 = vsub.f32 1.0, %v2574_v63  ;;  %v2582_v63 = vand.u32 2147483647, %v2471_v13 }
 0x499   : > { %4699 = vset.pattern.permute.xlu1 %v7904_v15  ;;  %v7993_v15 = vmov 3  }
 0x49a   : > { %3601 = vperm.xlu1 %4699, %v6371_v21   ;;  %v2576_v27 = vmul.f32 %v5052_v0, %v2575_v42  ;;  %v6472_v42 = vpop.xlane.xlu2 %2360  ;;  %vm2583_vm8 = vcmp.eq.f32.partialorder %v2582_v63, 8.507059e+37 }
 0x49b   : > { %v6474_v26 = vpop.xlane.xlu0 %2363  ;;  %vm2441_vm6 = vcmp.eq.f32.partialorder %v6472_v42, 0.0 }
 0x49f   : > { %3112 = vmatmul.bf16.gmra.mxu2 %v6429_v56 }
 0x4a2   : > { %3190 = vperm.xlu2 %4701, %v6403_v45   ;;  %4700 = vset.pattern.permute.xlu1 %v7993_v15 }
 0x4a3   : > { %3794 = vperm.xlu1 %4700, %v6371_v21   ;;  %v2562_v21 = vadd.f32 %v5050_v8, %v2561_v58  ;;  %v6490_v63 = vpop.xlane.xlu0 %951 }
 0x4a5   : > { %v2566_v58 = vsel %vm2565_vm3, %v5050_v8, %v2562_v21  ;;  %v6453_v8 = vpop.xlane.xlu1 %2357  ;;  %v5054_v21 = vpop.eup %5053 }
 0x4a6   : > { %v2571_v61 = vsel %vm2568_vm4, %v2570_v37, %v2566_v58  ;;  %v6467_v58 = vld [vmem:[%s5419_s10 + $0x40] sm:$0xff]  ;;  %v2577_v37 = vadd.f32 %v5052_v0, %v2576_v27  ;;  %vm1283_vm9 = vweird.f32 %v5054_v21  ;;  %vm2440_vm2 = vcmp.eq.f32.partialorder %v6453_v8, 0.0 }
 0x4a7   : > { %v2572_v43 = vmul.f32 %v2571_v61, %v6249_v20  ;;  %v1278_v20 = vmul.f32 %v5054_v21, %v6397_v6  ;;  %vm1284_vm11 = vmor %vm1282_vm10, %vm1283_vm9 }
 0x4a9   : > { %v2982_v49 = vmul.f32 0.125, %v2572_v43  ;;  %v1279_v61 = vsub.f32 1.0, %v1278_v20  ;;  %v2584_v43 = vand.u32 2147483648, %v2471_v13  ;;  %v5056_v20 = vpop.eup %5055 }
 0x4aa   : > { %4703 = vset.pattern.permute.xlu2 %v7994_v53  ;;  %vm1298_vm13 = vweird.f32 %v5056_v20 }
 0x4ab   : > { %3605 = vperm.xlu2 %4703, %v6403_v45   ;;  %3798 = vperm.xlu1 %4700, %v6403_v45   ;;  %v2398_v45 = vsel %vm673_vm0, %v6437_v16, 0.0  ;;  %v1280_v5 = vmul.f32 %v5054_v21, %v1279_v61  ;;  %v2581_v16 = vsel %vm2580_vm7, %v5052_v0, %v2577_v37  ;;  %v2585_v4 = vor.u32 1.1754944e-38, %v2584_v43  ;;  %vm1299_vm1 = vmor %vm1297_vm14, %vm1298_vm13 }
 0x4ac   : > { %v1286_v37 = vand.u32 2147483647, %v6397_v6  ;;  %v1293_v61 = vmul.f32 %v5056_v20, %v6421_v38 }
 0x4ad   : > { %2399 = vadd.xlane.f32.xlu0 %v2398_v45  ;;  %v6463_v45 = vpop.xlane.xlu1 %945  ;;  %v2586_v27 = vsel %vm2583_vm8, %v2585_v4, %v2581_v16  ;;  %v1281_v13 = vadd.f32 %v5054_v21, %v1280_v5  ;;  %v6485_v4 = vpop.xlane.xlu2 %948  ;;  %v1289_v16 = vor.u32 1.1754944e-38, %v1288_v44 }
 0x4ae   : > { %v2587_v0 = vmul.f32 %v2586_v27, %v5927_v28  ;;  %vm1287_vm12 = vcmp.eq.f32.partialorder %v1286_v37, 8.507059e+37  ;;  %v1294_v6 = vsub.f32 1.0, %v1293_v61  ;;  %v1303_v61 = vand.u32 2147483648, %v6421_v38 }
 0x4af   : > { %3117 = vmatmul.bf16.gmra.mxu2 %v6449_v60  ;;  %v1285_v43 = vsel %vm1284_vm11, %v5054_v21, %v1281_v13  ;;  %v5058_v21 = vpop.eup %5057  ;;  %vm2442_vm11 = vcmp.eq.f32.partialorder %v6474_v26, 0.0 }
 0x4b0   : > { %v6487_v5 = vmul.f32 0.125, %v2587_v0  ;;  %v1290_v28 = vsel %vm1287_vm12, %v1289_v16, %v1285_v43  ;;  %v1295_v13 = vmul.f32 %v5056_v20, %v1294_v6  ;;  %v1308_v0 = vmul.f32 %v5058_v21, %v6442_v32  ;;  %v6504_v43 = vpop.xlane.xlu0 %2372 }
 0x4b1   : > { %v1291_v44 = vmul.f32 %v6219_v10, %v1290_v28  ;;  %v1301_v10 = vand.u32 2147483647, %v6421_v38  ;;  %v1304_v6 = vor.u32 1.1754944e-38, %v1303_v61  ;;  %v6517_v38 = vsel %vm2440_vm2, 1.0, %v6453_v8 }
 0x4b2   : > { %v1296_v47 = vadd.f32 %v5056_v20, %v1295_v13  ;;  %v1309_v16 = vsub.f32 1.0, %v1308_v0  ;;  %vm1313_vm4 = vweird.f32 %v5058_v21  ;;  %5059 = vrcp.f32 %v6517_v38 }
 0x4b3   : > { %4707 = vset.pattern.permute.xlu2 %v7993_v15  ;;  %4704 = vset.pattern.permute.xlu1 %v7996_v52  ;;  %v2263_v37 = vsub.f32 %v1291_v44, %v6081_v3  ;;  %vm1302_vm3 = vcmp.eq.f32.partialorder %v1301_v10, 8.507059e+37  ;;  %vm1314_vm7 = vmor %vm1312_vm5, %vm1313_vm4  ;;  %v4610_v10 = vld [vmem:[#allocation5 + $0x74] sm:$0xf0]  ;;  %vm2593_vm13 = vweird.f32 %v6517_v38 }
 0x4b4   : > { %3802 = vperm.xlu2 %4707, %v2981_v54   ;;  %3195 = vperm.xlu1 %4704, %v2981_v54   ;;  %v1300_v3 = vsel %vm1299_vm1, %v5056_v20, %v1296_v47  ;;  %v1310_v44 = vmul.f32 %v5058_v21, %v1309_v16  ;;  %v4479_v16 = vld [vmem:[#allocation5 + $0x70] sm:$0xf] }
 0x4b5   : > { %vm2295_vm15 = vcmp.ge.f32.partialorder %v2263_v37, 0.0  ;;  %v1305_v22 = vsel %vm1302_vm3, %v1304_v6, %v1300_v3  ;;  %v6532_v3 = vsel %vm2441_vm6, 1.0, %v6472_v42  ;;  %v4480_v6 = vor.u32 %v4610_v10, %v4479_v16  ;;  %v4455_v16 = vld [vmem:[#allocation5 + $0x40] sm:$0xf]  ;;  %v4604_v10 = vld [vmem:[#allocation5 + $0x44] sm:$0xf0] }
 0x4b6   : > { %v6510_v13 = vsel %vm2295_vm15, %v2263_v37, 0.0  ;;  %v1311_v47 = vadd.f32 %v5058_v21, %v1310_v44  ;;  %v1306_v20 = vmul.f32 %v5916_v23, %v1305_v22  ;;  %v1318_v37 = vand.u32 2147483648, %v6442_v32  ;;  %v4471_v44 = vld [vmem:[#allocation5 + $0x60] sm:$0xf] }
 0x4b7   : > { %7998 = vst [vmem:[#allocation29_spill] sm:$0xff] %v6510_v13  ;;  %v2401_v0 = vsel %vm673_vm0, %v6510_v13, 0.0  ;;  %495 = vmatpush.bf16.msra.mxu0 %v4480_v6  ;;  %5061 = vrcp.f32 %v6532_v3  ;;  %vm2608_vm2 = vweird.f32 %v6532_v3 }
 0x4b8   : > { %v6519_v14 = vpop.xlane.xlu0 %960  ;;  %v1315_v61 = vsel %vm1314_vm7, %v5058_v21, %v1311_v47  ;;  %v2264_v23 = vsub.f32 %v1306_v20, %v6034_v51  ;;  %v1319_v22 = vor.u32 1.1754944e-38, %v1318_v37  ;;  %v4606_v21 = vld [vmem:[#allocation5 + $0x54] sm:$0xf0]  ;;  %v6536_v47 = vpop.eup %5059 }
 0x4b9   : > { %7999 = vst [vmem:[#allocation30_spill] sm:$0xff] %v6519_v14  ;;  %v2589_v37 = vmul.f32 %v6536_v47, %v6517_v38  ;;  %vm2594_vm12 = vweird.f32 %v6536_v47 }
 0x4ba   : > { %vm2296_vm9 = vcmp.ge.f32.partialorder %v2264_v23, 0.0  ;;  %vm6591_vm14 = vmor %vm2593_vm13, %vm2594_vm12  ;;  %vm4045_vm12 = vcmask 261120  }
 0x4bc   : > { %4708 = vset.pattern.permute.xlu2 %v7996_v52  ;;  %4705 = vset.pattern.permute.xlu1 %v7997_v40 }
 0x4bd   : > { %3200 = vperm.xlu2 %4708, %v2982_v49   ;;  %3416 = vperm.xlu1 %4705, %v2981_v54   ;;  %v6553_v6 = vpop.eup %5061 }
 0x4be   : > { %vm2609_vm15 = vweird.f32 %v6553_v6 }
 0x4bf   : > { %3122 = vmatmul.bf16.gmra.mxu2 %v6467_v58  ;;  %vm2610_vm3 = vmor %vm2608_vm2, %vm2609_vm15  ;;  %vm1327_vm2 = vweird.f32 %v6458_v57 }
 0x4c0   : > { %v6538_v42 = vpop.xlane.xlu0 %2381 }
 0x4c1   : > { %3609 = vperm.xlu0 %4706, %v2981_v54   ;;  %v6476_v54 = vpop.xlane.xlu1 %2366  ;;  %8002 = vst [vmem:[#allocation33_spill] sm:$0xff] %v6538_v42 }
 0x4c5   : > { %4709 = vset.pattern.permute.xlu2 %v7997_v40  ;;  %4711 = vset.pattern.permute.xlu1 %v7996_v52 }
 0x4c6   : > { %3420 = vperm.xlu2 %4709, %v2982_v49  }
 0x4c8   : > { %v6563_v42 = vpop.xlane.xlu0 %2390 }
 0x4c9   : > { %3613 = vperm.xlu0 %4706, %v2982_v49   ;;  %v6495_v27 = vpop.xlane.xlu1 %954  ;;  %8005 = vst [vmem:[#allocation36_spill] sm:$0xff] %v6563_v42  ;;  %v2599_v42 = vand.u32 2147483648, %v6517_v38 }
 0x4ce   : > { %4710 = vset.pattern.permute.xlu2 %v7993_v15 }
 0x4cf   : > { %3806 = vperm.xlu2 %4710, %v2982_v49   ;;  %v5136_v49 = vld [vmem:[%s5419_s10 + $0x48] sm:$0xff] }
 0x4d0   : > { %3127 = vmatmul.bf16.gmra.mxu2 %v5136_v49  ;;  %v6500_v49 = vpop.xlane.xlu2 %2369 }
 0x4d1   : > { %4714 = vset.pattern.permute.xlu0 %v7993_v15  ;;  %v6508_v28 = vpop.xlane.xlu1 %2375 }
 0x4d2   : > { %3810 = vperm.xlu0 %4714, %v6487_v5  }
 0x4d7   : > { %4715 = vset.pattern.permute.xlu2 %v7996_v52 }
 0x4d8   : > { %v6521_v2 = vpop.xlane.xlu2 %957 }
 0x4d9   : > { %8000 = vst [vmem:[#allocation31_spill] sm:$0xff] %v6521_v2  ;;  %v6529_v8 = vpop.xlane.xlu1 %2384 }
 0x4da   : > { %4718 = vset.pattern.permute.xlu0 %v7996_v52  ;;  %8001 = vst [vmem:[#allocation32_spill] sm:$0xff] %v6529_v8  ;;  %v4463_v8 = vld [vmem:[#allocation5 + $0x50] sm:$0xf] }
 0x4db   : > { %v4464_v20 = vor.u32 %v4606_v21, %v4463_v8  ;;  %v2590_v8 = vsub.f32 1.0, %v2589_v37  ;;  %v2604_v21 = vmul.f32 %v6553_v6, %v6532_v3 }
 0x4e0   : > { %3132 = vmatmul.bf16.gmra.mxu2 %v5137_v9  ;;  %v1316_v9 = vand.u32 2147483647, %v6442_v32  ;;  %v6540_v14 = vpop.xlane.xlu2 %2378 }
 0x4e2   : > { %vm1317_vm8 = vcmp.eq.f32.partialorder %v1316_v9, 8.507059e+37  ;;  %v6545_v9 = vpop.permute.xlu1 %3404 }
 0x4e3   : > { %v1320_v13 = vsel %vm1317_vm8, %v1319_v22, %v1315_v61  ;;  %v6547_v61 = vsel %vm2296_vm9, %v2264_v23, 0.0  ;;  %v6550_v22 = vld [vmem:[%s5419_s10 + $0x58] sm:$0xff] }
 0x4e4   : > { %v1321_v51 = vmul.f32 %v6086_v50, %v1320_v13  ;;  %8003 = vst [vmem:[#allocation34_spill] sm:$0xff] %v6547_v61  ;;  %v2404_v50 = vsel %vm673_vm0, %v6547_v61, 0.0  ;;  %v4456_v13 = vor.u32 %v4604_v10, %v4455_v16  ;;  %v4602_v23 = vld [vmem:[#allocation5 + $0x34] sm:$0xf0]  ;;  %v4439_v16 = vld [vmem:[#allocation5 + $0x20] sm:$0xf]  ;;  %v6571_v61 = vpop.f32.mrf.mxu2 }
 0x4e5   : > { %8004 = vst [vmem:[#allocation35_spill] sm:$0xff] %v6550_v22  ;;  %v4600_v10 = vld [vmem:[#allocation5 + $0x24] sm:$0xf0] }
 0x4e7   : > { %2402 = vadd.xlane.f32.xlu1 %v2401_v0  ;;  %v4608_v0 = vld [vmem:[#allocation5 + $0x64] sm:$0xf0] }
 0x4e8   : > { %v4472_v32 = vor.u32 %v4608_v0, %v4471_v44  ;;  %v2265_v44 = vsub.f32 %v1321_v51, %v5966_v59  ;;  %v4447_v0 = vld [vmem:[#allocation5 + $0x30] sm:$0xf]  ;;  %v2591_v51 = vmul.f32 %v6536_v47, %v2590_v8  ;;  %v4440_v8 = vor.u32 %v4600_v10, %v4439_v16 }
 0x4e9   : > { %v4448_v59 = vor.u32 %v4602_v23, %v4447_v0  ;;  %v6579_v0 = vsel %vm2442_vm11, 1.0, %v6474_v26  ;;  %v2597_v26 = vand.u32 2147483647, %v6517_v38 }
 0x4ea   : > { %496 = vmatpush.bf16.msra.mxu0 %v4472_v32  ;;  %v4620_v32 = vld [vmem:[%s7884_s4 + $0x8] sm:$0xff]  ;;  %vm2297_vm10 = vcmp.ge.f32.partialorder %v2265_v44, 0.0  ;;  %v2592_v23 = vadd.f32 %v6536_v47, %v2591_v51  ;;  %5063 = vrcp.f32 %v6579_v0 }
 0x4eb   : > { %4100 = vmatpush.bf16.msra.mxu3 %v4620_v32  ;;  %v6569_v37 = vpop.xlane.xlu1 %2393  ;;  %v6573_v2 = vsel %vm2297_vm10, %v2265_v44, 0.0  ;;  %v3163_v32 = vlaneseq  ;;  %v4598_v44 = vld [vmem:[#allocation5 + $0x14] sm:$0xf0]  ;;  %vm2598_vm1 = vcmp.eq.f32.partialorder %v2597_v26, 8.507059e+37  ;;  %vm2623_vm10 = vweird.f32 %v6579_v0 }
 0x4ec   : > { %8007 = vst [vmem:[#allocation38_spill] sm:$0xff] %v6569_v37  ;;  %v4431_v37 = vld [vmem:[#allocation5 + $0x10] sm:$0xf]  ;;  %v6600_v38 = vpop.f32.mrf.mxu2  ;;  %5065 = vrcp.f32 %v6458_v57 }
 0x4ed   : > { %8008 = vst [vmem:[#allocation39_spill] sm:$0xff] %v6573_v2  ;;  %v4432_v16 = vor.u32 %v4598_v44, %v4431_v37  ;;  %v3164_v10 = vand.u32 127, %v3163_v32  ;;  %v2614_v37 = vand.u32 2147483648, %v6532_v3  ;;  %5067 = vrcp.f32 %v6461_v48 }
 0x4ee   : > { %497 = vmatpush.bf16.msra.mxu0 %v4464_v20  ;;  %v6567_v20 = vpop.xlane.xlu2 %2387  ;;  %5069 = vrcp.f32 %v6463_v45 }
 0x4ef   : > { %8006 = vst [vmem:[#allocation37_spill] sm:$0xff] %v6567_v20  ;;  %v2600_v20 = vor.u32 1.1754944e-38, %v2599_v42  ;;  %v6611_v32 = vand.u32 3, %v3164_v10  ;;  %v2615_v26 = vor.u32 1.1754944e-38, %v2614_v37 }
 0x4f0   : > { %3137 = vmatmul.bf16.gmra.mxu2 %v6550_v22 }
 0x4f1   : > { %vm3177_vm4 = vcmp.eq.s32.totalorder %v6611_v32, 0  ;;  %vm3402_vm6 = vcmp.eq.s32.totalorder %v6611_v32, 1  ;;  %vm3595_vm7 = vcmp.eq.s32.totalorder %v6611_v32, 2  ;;  %vm3788_vm8 = vcmp.eq.s32.totalorder %v6611_v32, 3 }
 0x4f2   : > { %498 = vmatpush.bf16.msra.mxu0 %v4456_v13  ;;  %v4619_v13 = vld [vmem:[%s7884_s4] sm:$0xff] }
 0x4f3   : > { %4101 = vmatpush.bf16.msra.mxu3 %v4619_v13 }
 0x4f6   : > { %499 = vmatpush.bf16.msra.mxu0 %v4448_v59  ;;  %v3181_v59 = vpop.permute.xlu0 %3180 }
 0x4f8   : > { %2405 = vadd.xlane.f32.xlu2 %v2404_v50  ;;  %v2605_v50 = vsub.f32 1.0, %v2604_v21  ;;  %v2407_v21 = vsel %vm673_vm0, %v6573_v2, 0.0  ;;  %v4596_v2 = vld [vmem:[#allocation5 + $0x4] sm:$0xf0] }
 0x4fa   : > { %v2606_v22 = vmul.f32 %v6553_v6, %v2605_v50  ;;  %500 = vmatpush.bf16.msra.mxu0 %v4440_v8  ;;  %v2596_v50 = vsel %vm6591_vm14, %v6536_v47, %v2592_v23  ;;  %v3791_v8 = vpop.permute.xlu2 %3790  ;;  %v2612_v47 = vand.u32 2147483647, %v6532_v3 }
 0x4fb   : > { %v2601_v23 = vsel %vm2598_vm1, %v2600_v20, %v2596_v50  ;;  %vm1357_vm1 = vweird.f32 %v6463_v45 }
 0x4fc   : > { %2408 = vadd.xlane.f32.xlu0 %v2407_v21  ;;  %v4423_v21 = vld [vmem:[#allocation5] sm:$0xf]  ;;  %v2607_v29 = vadd.f32 %v6553_v6, %v2606_v22  ;;  %v6609_v22 = vpop.eup %5063  ;;  %v2602_v51 = vmul.f32 %v2601_v23, %v6114_v62  ;;  %vm2613_vm5 = vcmp.eq.f32.partialorder %v2612_v47, 8.507059e+37  ;;  %v3531_v62 = vsel %vm3402_vm6, %v6545_v9, 0.0 }
 0x4fd   : > { %v4424_v42 = vor.u32 %v4596_v2, %v4423_v21  ;;  %v2619_v3 = vmul.f32 %v6609_v22, %v6579_v0  ;;  %vm2624_vm9 = vweird.f32 %v6609_v22 }
 0x4fe   : > { %501 = vmatpush.bf16.msra.mxu0 %v4432_v16  ;;  %v2611_v44 = vsel %vm2610_vm3, %v6553_v6, %v2607_v29  ;;  %v3598_v2 = vpop.permute.xlu0 %3597  ;;  %v3338_v29 = vsel %vm3177_vm4, %v3181_v59, 0.0  ;;  %v2984_v16 = vmul.f32 0.125, %v2602_v51  ;;  %vm6653_vm11 = vmor %vm2623_vm10, %vm2624_vm9  ;;  %vm2444_vm9 = vcmp.eq.f32.partialorder %v6500_v49, 0.0 }
 0x4ff   : > { %v2616_v20 = vsel %vm2613_vm5, %v2615_v26, %v2611_v44  ;;  %v2620_v10 = vsub.f32 1.0, %v2619_v3  ;;  %v3724_v50 = vsel %vm3595_vm7, %v3598_v2, 0.0  ;;  %v3563_v47 = vadd.f32 %v3531_v62, %v3338_v29  ;;  %v6641_v26 = vpop.f32.mrf.mxu2 }
 0x500   : > { %3205 = vperm.xlu1 %4711, %v6487_v5   ;;  %3142 = vmatmul.bf16.gmra.mxu2 %v6603_v46  ;;  %v2617_v21 = vmul.f32 %v2616_v20, %v6275_v34  ;;  %vm1342_vm10 = vweird.f32 %v6461_v48 }
 0x501   : > { %v3756_v23 = vadd.f32 %v3724_v50, %v3563_v47 }
 0x502   : > { %502 = vmatpush.bf16.msra.mxu0 %v4424_v42  ;;  %v3409_v37 = vpop.permute.xlu2 %3408  ;;  %v2985_v34 = vmul.f32 0.125, %v2617_v21 }
 0x503   : > { %v3186_v13 = vpop.permute.xlu1 %3185  ;;  %v3532_v9 = vsel %vm3402_vm6, %v3409_v37, 0.0 }
 0x504   : > { %v3339_v59 = vsel %vm3177_vm4, %v3186_v13, 0.0  ;;  %v3917_v13 = vsel %vm3788_vm8, %v3791_v8, 0.0  ;;  %v2627_v8 = vand.u32 2147483647, %v6579_v0 }
 0x505   : > { %503 = vmatmul.bf16.vlgmr.msra.gmra.mxu0 %v6355_v41  ;;  %v2621_v41 = vmul.f32 %v6609_v22, %v2620_v10  ;;  %v3564_v44 = vadd.f32 %v3532_v9, %v3339_v59  ;;  %v3949_v51 = vadd.f32 %v3917_v13, %v3756_v23  ;;  %v6667_v23 = vld [vmem:[%s5419_s10 + $0x68] sm:$0xff] }
 0x506   : > { %vm2628_vm13 = vcmp.eq.f32.partialorder %v2627_v8, 8.507059e+37 }
 0x507   : > { %v2622_v20 = vadd.f32 %v6609_v22, %v2621_v41  ;;  %v3981_v62 = vmul.f32 %v3949_v51, %v6571_v61 }
 0x508   : > { %4712 = vset.pattern.permute.xlu1 %v7997_v40 }
 0x509   : > { %3424 = vperm.xlu1 %4712, %v6487_v5   ;;  %v2626_v37 = vsel %vm6653_vm11, %v6609_v22, %v2622_v20 }
 0x50a   : > { %v6658_v50 = vpop.xlane.xlu2 %2396 }
 0x50c   : > { %v3602_v6 = vpop.permute.xlu1 %3601 }
 0x50d   : > { %v3725_v42 = vsel %vm3595_vm7, %v3602_v6, 0.0  ;;  %v2629_v6 = vand.u32 2147483648, %v6579_v0  ;;  %v6664_v0 = vpop.f32.mrf.mxu2 }
 0x50e   : > { %v3757_v3 = vadd.f32 %v3725_v42, %v3564_v44  ;;  %v6681_v42 = vpop.eup %5065  ;;  %v3413_v44 = vpop.permute.xlu0 %3412 }
 0x50f   : > { %v2630_v47 = vor.u32 1.1754944e-38, %v2629_v6  ;;  %v1323_v51 = vmul.f32 %v6681_v42, %v6458_v57  ;;  %vm1328_vm15 = vweird.f32 %v6681_v42 }
 0x510   : > { %3210 = vperm.xlu2 %4715, %v2984_v16   ;;  %3215 = vperm.xlu0 %4718, %v2985_v34   ;;  %vm6728_vm5 = vmor %vm1327_vm2, %vm1328_vm15 }
 0x511   : > { %4713 = vset.pattern.permute.xlu1 %v7994_v53  ;;  %3147 = vmatmul.bf16.gmra.mxu2 %v6667_v23 }
 0x512   : > { %3617 = vperm.xlu1 %4713, %v6487_v5   ;;  %v3191_v41 = vpop.permute.xlu2 %3190 }
 0x515   : > { %v3795_v2 = vpop.permute.xlu1 %3794  ;;  %508 = vmatmul.bf16.gmra.mxu0 %v6366_v35  ;;  %v6684_v35 = vpop.eup %5067 }
 0x516   : > { %v3918_v29 = vsel %vm3788_vm8, %v3795_v2, 0.0  ;;  %v1324_v2 = vsub.f32 1.0, %v1323_v51  ;;  %vm1343_vm14 = vweird.f32 %v6684_v35 }
 0x517   : > { %v3950_v5 = vadd.f32 %v3918_v29, %v3757_v3  ;;  %vm1344_vm15 = vmor %vm1342_vm10, %vm1343_vm14 }
 0x518   : > { %4716 = vset.pattern.permute.xlu2 %v7997_v40  ;;  %4719 = vset.pattern.permute.xlu0 %v7997_v40  ;;  %v1325_v8 = vmul.f32 %v6681_v42, %v1324_v2 }
 0x519   : > { %3428 = vperm.xlu2 %4716, %v2984_v16   ;;  %v3982_v21 = vmul.f32 %v3950_v5, %v6600_v38  ;;  %3432 = vperm.xlu0 %4719, %v2985_v34   ;;  %v2631_v38 = vsel %vm2628_vm13, %v2630_v47, %v2626_v37 }
 0x51a   : > { %3621 = vperm.xlu1 %4713, %v2984_v16   ;;  %v2632_v22 = vmul.f32 %v2631_v38, %v5956_v11  ;;  %v6687_v11 = vpop.eup %5069  ;;  %v3606_v29 = vpop.permute.xlu2 %3605 }
 0x51b   : > { %v4013_v59 = vpack.c.bf16 %v3982_v21, %v3981_v62  ;;  %v1353_v3 = vmul.f32 %v6687_v11, %v6463_v45  ;;  %v3340_v62 = vsel %vm3177_vm4, %v3191_v41, 0.0  ;;  %v3726_v37 = vsel %vm3595_vm7, %v3606_v29, 0.0 }
 0x51c   : > { %v6679_v9 = vmul.f32 0.125, %v2632_v22  ;;  %v1333_v22 = vand.u32 2147483648, %v6458_v57  ;;  %vm1358_vm3 = vweird.f32 %v6687_v11 }
 0x51d   : > { %v3799_v61 = vpop.permute.xlu1 %3798  ;;  %4557 = vmatmul.msk.bf16.vlgmr.msra.gmra.mxu3 %vm4045_vm12, %v4013_v59  ;;  %v1354_v6 = vsub.f32 1.0, %v1353_v3  ;;  %v1326_v59 = vadd.f32 %v6681_v42, %v1325_v8  ;;  %vm1359_vm11 = vmor %vm1357_vm1, %vm1358_vm3  ;;  %vm2443_vm3 = vcmp.eq.f32.partialorder %v6476_v54, 0.0 }
 0x51f   : > { %v1355_v21 = vmul.f32 %v6687_v11, %v1354_v6 }
 0x520   : > { %v6699_v5 = vpop.xlane.xlu0 %2399 }
 0x521   : > { %4720 = vset.pattern.permute.xlu2 %v7994_v53  ;;  %4724 = vset.pattern.permute.xlu0 %v7994_v53  ;;  %v1356_v6 = vadd.f32 %v6687_v11, %v1355_v21  ;;  %v1334_v21 = vor.u32 1.1754944e-38, %v1333_v22  ;;  %v2476_v22 = vsel %vm2444_vm9, 1.0, %v6500_v49  ;;  %vm2445_vm9 = vcmp.eq.f32.partialorder %v6504_v43, 0.0 }
 0x522   : > { %3625 = vperm.xlu2 %4720, %v2985_v34   ;;  %4717 = vset.pattern.permute.xlu1 %v7993_v15  ;;  %v3803_v2 = vpop.permute.xlu2 %3802  ;;  %5071 = vrcp.f32 %v2476_v22 }
 0x523   : > { %3814 = vperm.xlu1 %4717, %v2984_v16   ;;  %3629 = vperm.xlu0 %4724, %v6679_v9   ;;  %v1338_v16 = vmul.f32 %v6684_v35, %v6461_v48 }
 0x525   : > { %v1339_v20 = vsub.f32 1.0, %v1338_v16  ;;  %513 = vmatmul.bf16.gmra.mxu0 %v6379_v18  ;;  %v3533_v18 = vsel %vm3402_vm6, %v3413_v44, 0.0  ;;  %v3919_v44 = vsel %vm3788_vm8, %v3799_v61, 0.0  ;;  %v1331_v16 = vand.u32 2147483647, %v6458_v57 }
 0x526   : > { %v3196_v13 = vpop.permute.xlu1 %3195  ;;  %v3565_v41 = vadd.f32 %v3533_v18, %v3340_v62  ;;  %v1363_v57 = vand.u32 2147483648, %v6463_v45  ;;  %v1348_v18 = vand.u32 2147483648, %v6461_v48 }
 0x527   : > { %v1340_v10 = vmul.f32 %v6684_v35, %v1339_v20  ;;  %v3341_v51 = vsel %vm3177_vm4, %v3196_v13, 0.0  ;;  %v1361_v13 = vand.u32 2147483647, %v6463_v45  ;;  %vm1332_vm13 = vcmp.eq.f32.partialorder %v1331_v16, 8.507059e+37 }
 0x528   : > { %v3758_v3 = vadd.f32 %v3726_v37, %v3565_v41  ;;  %v3920_v37 = vsel %vm3788_vm8, %v3803_v2, 0.0  ;;  %v1349_v16 = vor.u32 1.1754944e-38, %v1348_v18 }
 0x529   : > { %v1341_v38 = vadd.f32 %v6684_v35, %v1340_v10  ;;  %v1330_v10 = vsel %vm6728_vm5, %v6681_v42, %v1326_v59  ;;  %v1360_v42 = vsel %vm1359_vm11, %v6687_v11, %v1356_v6  ;;  %vm1362_vm2 = vcmp.eq.f32.partialorder %v1361_v13, 8.507059e+37  ;;  %v5072_v6 = vpop.eup %5071 }
 0x52a   : > { %4721 = vset.pattern.permute.xlu2 %v7993_v15  ;;  %v1335_v59 = vsel %vm1332_vm13, %v1334_v21, %v1330_v10  ;;  %vm2654_vm11 = vweird.f32 %v5072_v6  ;;  %vm2653_vm13 = vweird.f32 %v2476_v22  ;;  %v2657_v21 = vand.u32 2147483647, %v2476_v22 }
 0x52b   : > { %3818 = vperm.xlu2 %4721, %v2985_v34   ;;  %4722 = vset.pattern.permute.xlu1 %v7996_v52  ;;  %v1345_v45 = vsel %vm1344_vm15, %v6684_v35, %v1341_v38  ;;  %v2649_v38 = vmul.f32 %v5072_v6, %v2476_v22  ;;  %vm2655_vm15 = vmor %vm2653_vm13, %vm2654_vm11 }
 0x52c   : > { %4729 = vset.pattern.permute.xlu0 %v7996_v52 }
 0x52f   : > { %v3417_v34 = vpop.permute.xlu1 %3416 }
 0x530   : > { %v3534_v47 = vsel %vm3402_vm6, %v3417_v34, 0.0  ;;  %v3951_v34 = vadd.f32 %v3919_v44, %v3758_v3  ;;  %v1364_v44 = vor.u32 1.1754944e-38, %v1363_v57 }
 0x531   : > { %v3566_v20 = vadd.f32 %v3534_v47, %v3341_v51  ;;  %v1346_v47 = vand.u32 2147483647, %v6461_v48  ;;  %v1336_v48 = vmul.f32 %v6261_v7, %v1335_v59  ;;  %v6783_v59 = vpop.f32.mrf.mxu2 }
 0x532   : > { %v3983_v51 = vmul.f32 %v3951_v34, %v6641_v26  ;;  %v1365_v2 = vsel %vm1362_vm2, %v1364_v44, %v1360_v42  ;;  %vm2658_vm2 = vcmp.eq.f32.partialorder %v2657_v21, 8.507059e+37 }
 0x533   : > { %v3610_v29 = vpop.permute.xlu0 %3609  ;;  %vm1347_vm1 = vcmp.eq.f32.partialorder %v1346_v47, 8.507059e+37  ;;  %v1366_v49 = vmul.f32 %v6132_v24, %v1365_v2  ;;  %v2266_v26 = vsub.f32 %v1336_v48, %v6163_v39  ;;  %v2475_v24 = vsel %vm2443_vm3, 1.0, %v6476_v54 }
 0x534   : > { %v3727_v61 = vsel %vm3595_vm7, %v3610_v29, 0.0  ;;  %v2650_v39 = vsub.f32 1.0, %v2649_v38  ;;  %5073 = vrcp.f32 %v2475_v24  ;;  %vm2638_vm3 = vweird.f32 %v2475_v24 }
 0x535   : > { %v3759_v62 = vadd.f32 %v3727_v61, %v3566_v20  ;;  %518 = vmatmul.bf16.gmra.mxu0 %v6389_v30  ;;  %v1350_v20 = vsel %vm1347_vm1, %v1349_v16, %v1345_v45  ;;  %v2268_v35 = vsub.f32 %v1366_v49, %v6104_v36  ;;  %vm2298_vm14 = vcmp.ge.f32.partialorder %v2266_v26, 0.0  ;;  %v6772_v61 = vpop.permute.xlu2 %3200 }
 0x536   : > { %v6763_v30 = vsel %vm2298_vm14, %v2266_v26, 0.0  ;;  %v2651_v54 = vmul.f32 %v5072_v6, %v2650_v39  ;;  %v2644_v26 = vand.u32 2147483648, %v2475_v24 }
 0x537   : > { %v3952_v41 = vadd.f32 %v3920_v37, %v3759_v62  ;;  %vm2300_vm5 = vcmp.ge.f32.partialorder %v2268_v35, 0.0  ;;  %v2410_v36 = vsel %vm673_vm0, %v6763_v30, 0.0  ;;  %v2659_v62 = vand.u32 2147483648, %v2476_v22 }
 0x538   : > { %v6767_v8 = vsel %vm2300_vm5, %v2268_v35, 0.0  ;;  %v2652_v34 = vadd.f32 %v5072_v6, %v2651_v54  ;;  %v2645_v35 = vor.u32 1.1754944e-38, %v2644_v26 }
 0x539   : > { %v3984_v3 = vmul.f32 %v3952_v41, %v6664_v0  ;;  %v8015_v0 = vld [vmem:[#allocation22_spill] sm:$0xff]  ;;  %v2416_v13 = vsel %vm673_vm0, %v6767_v8, 0.0  ;;  %v2660_v41 = vor.u32 1.1754944e-38, %v2659_v62 }
 0x53a   : > { %v1351_v29 = vmul.f32 %v8015_v0, %v1350_v20  ;;  %v2656_v47 = vsel %vm2655_vm15, %v5072_v6, %v2652_v34  ;;  %v6794_v20 = vld [vmem:[%s5419_s10 + $0x70] sm:$0xff]  ;;  %v8016_v34 = vld [vmem:[#allocation24_spill] sm:$0xff] }
 0x53b   : > { %v4014_v11 = vpack.c.bf16 %v3984_v3, %v3983_v51  ;;  %v2661_v44 = vsel %vm2658_vm2, %v2660_v41, %v2656_v47  ;;  %v3614_v54 = vpop.permute.xlu0 %3613  ;;  %v6820_v47 = vld [vmem:[%s5419_s10 + $0x78] sm:$0xff]  ;;  %vm1402_vm2 = vweird.f32 %v6495_v27 }
 0x53c   : > { %v2267_v7 = vsub.f32 %v1351_v29, %v6091_v19  ;;  %v2477_v19 = vsel %vm2445_vm9, 1.0, %v6504_v43  ;;  %v5074_v43 = vpop.eup %5073  ;;  %v2662_v45 = vmul.f32 %v2661_v44, %v6291_v12 }
 0x53d   : > { %4558 = vmatmul.msk.bf16.gmra.mxu3 %vm4045_vm12, %v4014_v11  ;;  %5075 = vrcp.f32 %v2477_v19  ;;  %v2634_v18 = vmul.f32 %v5074_v43, %v2475_v24  ;;  %v6781_v37 = vpop.permute.xlu2 %3420  ;;  %v6791_v11 = vpop.f32.mrf.mxu2  ;;  %3152 = vmatmul.bf16.gmra.mxu2 %v6794_v20  ;;  %vm2639_vm1 = vweird.f32 %v5074_v43  ;;  %v2674_v0 = vand.u32 2147483648, %v2477_v19 }
 0x53e   : > { %vm2299_vm10 = vcmp.ge.f32.partialorder %v2267_v7, 0.0  ;;  %v6789_v48 = vmul.f32 0.125, %v2662_v45  ;;  %vm2640_vm5 = vmor %vm2638_vm3, %vm2639_vm1  ;;  %vm2668_vm9 = vweird.f32 %v2477_v19  ;;  %v2672_v29 = vand.u32 2147483647, %v2477_v19 }
 0x53f   : > { %v6777_v57 = vsel %vm2299_vm10, %v2267_v7, 0.0  ;;  %v2635_v51 = vsub.f32 1.0, %v2634_v18  ;;  %5077 = vrcp.f32 %v6495_v27  ;;  %v3535_v44 = vsel %vm3402_vm6, %v6781_v37, 0.0 }
 0x540   : > { %v2413_v10 = vsel %vm673_vm0, %v6777_v57, 0.0  ;;  %vm2673_vm13 = vcmp.eq.f32.partialorder %v2672_v29, 8.507059e+37  ;;  %5079 = vrcp.f32 %v6485_v4  ;;  %vm2446_vm1 = vcmp.eq.f32.partialorder %v6508_v28, 0.0 }
 0x541   : > { %v2636_v22 = vmul.f32 %v5074_v43, %v2635_v51  ;;  %5081 = vrcp.f32 %v6490_v63 }
 0x543   : > { %v2637_v49 = vadd.f32 %v5074_v43, %v2636_v22  ;;  %v3342_v22 = vsel %vm3177_vm4, %v6772_v61, 0.0 }
 0x545   : > { %523 = vmatmul.bf16.gmra.mxu0 %v6400_v25  ;;  %v5076_v25 = vpop.eup %5075  ;;  %v6787_v2 = vpop.permute.xlu2 %3806  ;;  %v2641_v6 = vsel %vm2640_vm5, %v5074_v43, %v2637_v49  ;;  %v3567_v49 = vadd.f32 %v3535_v44, %v3342_v22 }
 0x546   : > { %v2664_v42 = vmul.f32 %v5076_v25, %v2477_v19  ;;  %vm2669_vm14 = vweird.f32 %v5076_v25 }
 0x547   : > { %vm2670_vm10 = vmor %vm2668_vm9, %vm2669_vm14  ;;  %vm2447_vm9 = vcmp.eq.f32.partialorder %v6540_v14, 0.0 }
 0x548   : > { %v2665_v3 = vsub.f32 1.0, %v2664_v42 }
 0x54a   : > { %v2666_v16 = vmul.f32 %v5076_v25, %v2665_v3 }
 0x54c   : > { %v2667_v12 = vadd.f32 %v5076_v25, %v2666_v16  ;;  %v3728_v16 = vsel %vm3595_vm7, %v3614_v54, 0.0 }
 0x54d   : > { %2411 = vadd.xlane.f32.xlu1 %v2410_v36  ;;  %2417 = vadd.xlane.f32.xlu0 %v2416_v13  ;;  %v2675_v36 = vor.u32 1.1754944e-38, %v2674_v0 }
 0x54e   : > { %v2671_v39 = vsel %vm2670_vm10, %v5076_v25, %v2667_v12  ;;  %vm1372_vm10 = vweird.f32 %v6485_v4 }
 0x54f   : > { %v2676_v19 = vsel %vm2673_vm13, %v2675_v36, %v2671_v39 }
 0x550   : > { %v2677_v43 = vmul.f32 %v2676_v19, %v8016_v34 }
 0x554   : > { %2414 = vadd.xlane.f32.xlu2 %v2413_v10 }
 0x555   : > { %528 = vmatmul.bf16.gmra.mxu0 %v6415_v1  ;;  %v2642_v1 = vand.u32 2147483647, %v2475_v24  ;;  %v6804_v24 = vpop.f32.mrf.mxu2 }
 0x557   : > { %vm2643_vm11 = vcmp.eq.f32.partialorder %v2642_v1, 8.507059e+37 }
 0x558   : > { %v2646_v13 = vsel %vm2643_vm11, %v2645_v35, %v2641_v6  ;;  %v3921_v6 = vsel %vm3788_vm8, %v6787_v2, 0.0  ;;  %vm1387_vm11 = vweird.f32 %v6490_v63 }
 0x559   : > { %v2647_v10 = vmul.f32 %v2646_v13, %v6173_v31  ;;  %v6823_v31 = vmul.f32 0.125, %v2677_v43 }
 0x55a   : > { %v6799_v7 = vpop.xlane.xlu1 %2402 }
 0x55b   : > { %v2987_v21 = vmul.f32 0.125, %v2647_v10  ;;  %v1408_v10 = vand.u32 2147483648, %v6495_v27 }
 0x55d   : > { %v6817_v18 = vpop.f32.mrf.mxu2  ;;  %3157 = vmatmul.bf16.gmra.mxu2 %v6820_v47  ;;  %v1409_v22 = vor.u32 1.1754944e-38, %v1408_v10  ;;  %v6907_v10 = vsel %vm2447_vm9, 1.0, %v6540_v14 }
 0x561   : > { %3230 = vperm.xlu0 %4729, %v6789_v48  }
 0x565   : > { %533 = vmatmul.bf16.gmra.mxu0 %v6429_v56  ;;  %v3811_v56 = vpop.permute.xlu0 %3810 }
 0x566   : > { %3220 = vperm.xlu1 %4722, %v6679_v9   ;;  %v3922_v34 = vsel %vm3788_vm8, %v3811_v56, 0.0  ;;  %v6872_v56 = vsel %vm2446_vm1, 1.0, %v6508_v28 }
 0x567   : > { %5083 = vrcp.f32 %v6872_v56 }
 0x568   : > { %5085 = vrcp.f32 %v6907_v10 }
 0x569   : > { %4730 = vset.pattern.permute.xlu0 %v7997_v40 }
 0x56a   : > { %3444 = vperm.xlu0 %4730, %v6789_v48  }
 0x56b   : > { %v6801_v38 = vpop.xlane.xlu2 %2405 }
 0x56c   : > { %3822 = vperm.xlu2 %4721, %v6679_v9  }
 0x56e   : > { %4723 = vset.pattern.permute.xlu1 %v7997_v40 }
 0x56f   : > { %3436 = vperm.xlu1 %4723, %v6679_v9   ;;  %v5078_v9 = vpop.eup %5077  ;;  %v6834_v45 = vpop.xlane.xlu0 %2408 }
 0x570   : > { %v1398_v41 = vmul.f32 %v5078_v9, %v6495_v27  ;;  %v6846_v26 = vpop.eup %5079  ;;  %vm1403_vm15 = vweird.f32 %v5078_v9 }
 0x571   : > { %v1368_v29 = vmul.f32 %v6846_v26, %v6485_v4  ;;  %v6858_v39 = vpop.eup %5081  ;;  %vm1404_vm14 = vmor %vm1402_vm2, %vm1403_vm15  ;;  %vm1373_vm5 = vweird.f32 %v6846_v26 }
 0x572   : > { %v3206_v62 = vpop.permute.xlu1 %3205  ;;  %4734 = vset.pattern.permute.xlu0 %v7994_v53  ;;  %v1399_v3 = vsub.f32 1.0, %v1398_v41  ;;  %vm6911_vm13 = vmor %vm1372_vm10, %vm1373_vm5  ;;  %vm1388_vm15 = vweird.f32 %v6858_v39  ;;  %vm2683_vm10 = vweird.f32 %v6872_v56 }
 0x573   : > { %v6814_v25 = vpop.permute.xlu2 %3210  ;;  %3641 = vperm.xlu0 %4734, %v6823_v31   ;;  %v3343_v1 = vsel %vm3177_vm4, %v3206_v62, 0.0  ;;  %v1406_v62 = vand.u32 2147483647, %v6495_v27  ;;  %v1369_v41 = vsub.f32 1.0, %v1368_v29 }
 0x574   : > { %4725 = vset.pattern.permute.xlu2 %v7996_v52  ;;  %v1400_v12 = vmul.f32 %v5078_v9, %v1399_v3 }
 0x575   : > { %3225 = vperm.xlu2 %4725, %v2987_v21   ;;  %538 = vmatmul.bf16.gmra.mxu0 %v6449_v60  ;;  %v3760_v60 = vadd.f32 %v3728_v16, %v3567_v49  ;;  %vm1407_vm3 = vcmp.eq.f32.partialorder %v1406_v62, 8.507059e+37  ;;  %v2687_v62 = vand.u32 2147483647, %v6872_v56 }
 0x576   : > { %v1401_v19 = vadd.f32 %v5078_v9, %v1400_v12 }
 0x577   : > { %4727 = vset.pattern.permute.xlu1 %v7994_v53  ;;  %v3953_v36 = vadd.f32 %v3921_v6, %v3760_v60  ;;  %v1378_v6 = vand.u32 2147483648, %v6485_v4 }
 0x578   : > { %3633 = vperm.xlu1 %4727, %v2987_v21   ;;  %v1405_v3 = vsel %vm1404_vm14, %v5078_v9, %v1401_v19  ;;  %v1376_v19 = vand.u32 2147483647, %v6485_v4  ;;  %vm6929_vm14 = vmor %vm1387_vm11, %vm1388_vm15  ;;  %vm2688_vm15 = vcmp.eq.f32.partialorder %v2687_v62, 8.507059e+37 }
 0x579   : > { %v1410_v12 = vsel %vm1407_vm3, %v1409_v22, %v1405_v3 }
 0x57a   : > { %v1411_v60 = vmul.f32 %v6211_v17, %v1410_v12  ;;  %vm1377_vm1 = vcmp.eq.f32.partialorder %v1376_v19, 8.507059e+37 }
 0x57b   : > { %v3425_v42 = vpop.permute.xlu1 %3424  ;;  %v3429_v51 = vpop.permute.xlu2 %3428 }
 0x57c   : > { %v3536_v37 = vsel %vm3402_vm6, %v3425_v42, 0.0  ;;  %v3985_v42 = vmul.f32 %v3953_v36, %v6783_v59  ;;  %v3537_v28 = vsel %vm3402_vm6, %v3429_v51, 0.0 }
 0x57d   : > { %4726 = vset.pattern.permute.xlu2 %v7997_v40  ;;  %v3568_v61 = vadd.f32 %v3536_v37, %v3343_v1  ;;  %v1370_v37 = vmul.f32 %v6846_v26, %v1369_v41  ;;  %v1393_v41 = vand.u32 2147483648, %v6490_v63 }
 0x57e   : > { %3440 = vperm.xlu2 %4726, %v2987_v21  }
 0x57f   : > { %v1371_v29 = vadd.f32 %v6846_v26, %v1370_v37 }
 0x580   : > { %4728 = vset.pattern.permute.xlu1 %v7993_v15 }
 0x581   : > { %3826 = vperm.xlu1 %4728, %v2987_v21   ;;  %v1383_v21 = vmul.f32 %v6858_v39, %v6490_v63  ;;  %v1375_v14 = vsel %vm6911_vm13, %v6846_v26, %v1371_v29 }
 0x582   : > { %v3216_v13 = vpop.permute.xlu0 %3215  ;;  %v504_v22 = vpop.f32.mrf.mxu0 }
 0x583   : > { %v3626_v2 = vpop.permute.xlu2 %3625  ;;  %v1384_v27 = vsub.f32 1.0, %v1383_v21  ;;  %v1391_v21 = vand.u32 2147483647, %v6490_v63 }
 0x584   : > { %v3618_v0 = vpop.permute.xlu1 %3617  ;;  %v3731_v51 = vsel %vm3595_vm7, %v3626_v2, 0.0 }
 0x585   : > { %v3729_v35 = vsel %vm3595_vm7, %v3618_v0, 0.0  ;;  %543 = vmatmul.bf16.gmra.mxu0 %v6467_v58  ;;  %v1385_v1 = vmul.f32 %v6858_v39, %v1384_v27  ;;  %v3344_v58 = vsel %vm3177_vm4, %v6814_v25, 0.0  ;;  %v6903_v25 = vpop.eup %5083  ;;  %v5143_v27 = vld [vmem:[%s7882_s2] sm:$0x3]  ;;  %vm1392_vm3 = vcmp.eq.f32.partialorder %v1391_v21, 8.507059e+37 }
 0x586   : > { %4731 = vset.pattern.permute.xlu2 %v7994_v53  ;;  %v3761_v54 = vadd.f32 %v3729_v35, %v3568_v61  ;;  %v3569_v35 = vadd.f32 %v3537_v28, %v3344_v58  ;;  %v2679_v3 = vmul.f32 %v6903_v25, %v6872_v56  ;;  %v6938_v37 = vperm.slane %v5143_v27, 0  ;;  %v8021_v58 = vld [vmem:[#allocation13_spill] sm:$0xff] }
 0x587   : > { %3637 = vperm.xlu2 %4731, %v6789_v48   ;;  %vm2684_vm5 = vweird.f32 %v6903_v25 }
 0x588   : > { %v3954_v43 = vadd.f32 %v3922_v34, %v3761_v54  ;;  %v2271_v54 = vsub.f32 %v1411_v60, %v6296_v33  ;;  %v1386_v33 = vadd.f32 %v6858_v39, %v1385_v1  ;;  %v5086_v1 = vpop.eup %5085  ;;  %vm2685_vm11 = vmor %vm2683_vm10, %vm2684_vm5  ;;  %vm2453_vm10 = vcmp.eq.f32.partialorder %v6658_v50, 0.0 }
 0x58a   : > { %v3986_v44 = vmul.f32 %v3954_v43, %v6791_v11  ;;  %v3345_v11 = vsel %vm3177_vm4, %v3216_v13, 0.0  ;;  %vm2303_vm2 = vcmp.ge.f32.partialorder %v2271_v54, 0.0  ;;  %v1390_v63 = vsel %vm6929_vm14, %v6858_v39, %v1386_v33 }
 0x58b   : > { %v3433_v59 = vpop.permute.xlu0 %3432  ;;  %v3819_v61 = vpop.permute.xlu2 %3818  ;;  %vm2698_vm14 = vweird.f32 %v6907_v10 }
 0x58c   : > { %v3622_v16 = vpop.permute.xlu1 %3621  ;;  %v4015_v49 = vpack.c.bf16 %v3986_v44, %v3985_v42  ;;  %v3538_v9 = vsel %vm3402_vm6, %v3433_v59, 0.0  ;;  %v3924_v13 = vsel %vm3788_vm8, %v3819_v61, 0.0  ;;  %v1379_v44 = vor.u32 1.1754944e-38, %v1378_v6 }
 0x58d   : > { %v3570_v0 = vadd.f32 %v3538_v9, %v3345_v11  ;;  %v3730_v17 = vsel %vm3595_vm7, %v3622_v16, 0.0  ;;  %v1394_v59 = vor.u32 1.1754944e-38, %v1393_v41  ;;  %v2680_v11 = vsub.f32 1.0, %v2679_v3  ;;  %v8024_v16 = vld [vmem:[#allocation37_spill] sm:$0xff] }
 0x58e   : > { %4559 = vmatmul.msk.bf16.gmra.mxu3 %vm4045_vm12, %v4015_v49  ;;  %v3762_v34 = vadd.f32 %v3730_v17, %v3569_v35  ;;  %v1380_v12 = vsel %vm1377_vm1, %v1379_v44, %v1375_v14  ;;  %v6943_v9 = vsel %vm2303_vm2, %v2271_v54, 0.0  ;;  %v8022_v17 = vld [vmem:[#allocation23_spill] sm:$0xff]  ;;  %v2694_v6 = vmul.f32 %v5086_v1, %v6907_v10  ;;  %v8023_v54 = vld [vmem:[#allocation18_spill] sm:$0xff] }
 0x58f   : > { %4735 = vset.pattern.permute.xlu2 %v7993_v15  ;;  %v3763_v36 = vadd.f32 %v3731_v51, %v3570_v0  ;;  %v1395_v60 = vsel %vm1392_vm3, %v1394_v59, %v1390_v63  ;;  %v2425_v61 = vsel %vm673_vm0, %v6943_v9, 0.0  ;;  %v5144_v0 = vld [vmem:[%s5419_s10 + $0x48] sm:$0xff]  ;;  %v2681_v39 = vmul.f32 %v6903_v25, %v2680_v11  ;;  %v5145_v63 = vld [vmem:[%s5419_s10 + $0x50] sm:$0xff]  ;;  %s4621_s10 = sshll.u32 %s5341_s22, 8 }
 0x590   : > { %vm2699_vm2 = vweird.f32 %v5086_v1  ;;  %vm2450_vm1 = vcmp.eq.f32.partialorder %v8024_v16, 0.0  ;;  %s4259_s24 = scalar_lea.hbm %s7885_s5, %s4621_s10 }
 0x591   : > { %v3956_v2 = vadd.f32 %v3924_v13, %v3763_v36  ;;  %v506_v36 = vpop.f32.mrf.mxu0  ;;  %v2682_v13 = vadd.f32 %v6903_v25, %v2681_v39  ;;  %vm2700_vm3 = vmor %vm2698_vm14, %vm2699_vm2  ;;  %v2482_v59 = vsel %vm2450_vm1, 1.0, %v8024_v16  ;;  %vm2454_vm2 = vcmp.eq.f32.partialorder %v6699_v5, 0.0  ;;  %s4262_s27 = sshll.u32 %s4259_s24, 4  ;;  %s4263_s27 = int_to_ptr.hbm [resolvable:$true] %s4262_s27 }
 0x592   : > { %5087 = vrcp.f32 %v2482_v59  ;;  %s5220_s22 = sshra.s32 %s4263_s27, 4  ;;  %s5221_s22 = int_to_ptr.hbm [resolvable:$true] %s5220_s22 }
 0x593   : > { %v3988_v26 = vmul.f32 %v3956_v2, %v6817_v18  ;;  %v505_v18 = vadd.f32 %v504_v22, %v6938_v37  ;;  %v2695_v2 = vsub.f32 1.0, %v2694_v6  ;;  %v2686_v14 = vsel %vm2685_vm11, %v6903_v25, %v2682_v13  ;;  %s5222_s6 = scalar_lea.hbm %s5221_s22, 256  ;;  %p5227_p11 = scmp.lt.s32.totalorder %s5221_s22, %s7885_s5 }
 0x594   : > { %v2749_v13 = vand.u32 2147483648, %v2482_v59  ;;  %vm2743_vm11 = vweird.f32 %v2482_v59  ;;  %p5223_p1 = scmp.ne.s32.totalorder %s5221_s22, %s5222_s6  ;;  %p5228_p9 = scmp.lt.s32.totalorder %s5226_s16, %s5222_s6 }
 0x595   : > { %v3815_v43 = vpop.permute.xlu1 %3814  ;;  %548 = vmatmul.bf16.gmra.mxu0 %v5144_v0  ;;  %v2696_v41 = vmul.f32 %v5086_v1, %v2695_v2 }
 0x596   : > { %v3923_v4 = vsel %vm3788_vm8, %v3815_v43, 0.0  ;;  %v507_v43 = vadd.f32 %v506_v36, %v6938_v37  ;;  %v2750_v62 = vor.u32 1.1754944e-38, %v2749_v13  ;;  %p5224_p4 = pnand %p5223_p1, %p5387_p7  ;;  %p5229_p2 = por %p5228_p9, %p5227_p11 }
 0x597   : > { %v3955_v42 = vadd.f32 %v3923_v4, %v3762_v34  ;;  %v2689_v34 = vand.u32 2147483648, %v6872_v56  ;;  %v2697_v22 = vadd.f32 %v5086_v1, %v2696_v41  ;;  %v8030_v41 = vld [vmem:[#allocation31_spill] sm:$0xff] }
 0x598   : > { %v5088_v0 = vpop.eup %5087  ;;  %p5225_p8 = pneg %p5224_p4 }
 0x599   : > { %v3987_v49 = vmul.f32 %v3955_v42, %v6804_v24  ;;  %v1381_v24 = vmul.f32 %v6281_v55, %v1380_v12  ;;  %v1396_v55 = vmul.f32 %v8022_v17, %v1395_v60  ;;  %v2690_v21 = vor.u32 1.1754944e-38, %v2689_v34  ;;  %v8026_v60 = vld [vmem:[#allocation16_spill] sm:$0xff] }
 0x59a   : > { %v2702_v12 = vand.u32 2147483647, %v6907_v10  ;;  %v2739_v39 = vmul.f32 %v5088_v0, %v2482_v59  ;;  %v7005_v34 = vsel %vm2453_vm10, 1.0, %v6658_v50  ;;  %p5230_p10 = pnand %p5229_p2, %p5225_p8 }
 0x59b   : > { %v4016_v28 = vpack.c.bf16 %v3988_v26, %v3987_v49  ;;  %v2269_v51 = vsub.f32 %v1381_v24, %v8021_v58  ;;  %v2270_v19 = vsub.f32 %v1396_v55, %v8023_v54  ;;  %v2691_v56 = vsel %vm2688_vm15, %v2690_v21, %v2686_v14  ;;  %v8025_v49 = vld [vmem:[#allocation14_spill] sm:$0xff] }
 0x59c   : > { %v2704_v26 = vand.u32 2147483648, %v6907_v10  ;;  %v2692_v27 = vmul.f32 %v2691_v56, %v8025_v49  ;;  %vm2703_vm5 = vcmp.eq.f32.partialorder %v2702_v12, 8.507059e+37  ;;  %v2740_v58 = vsub.f32 1.0, %v2739_v39  ;;  %v8032_v12 = vld [vmem:[#allocation30_spill] sm:$0xff] }
 0x59d   : > { %2426 = vadd.xlane.f32.xlu0 %v2425_v61  ;;  %vm2301_vm9 = vcmp.ge.f32.partialorder %v2269_v51, 0.0  ;;  %vm2302_vm13 = vcmp.ge.f32.partialorder %v2270_v19, 0.0  ;;  %5089 = vrcp.f32 %v7005_v34  ;;  %vm2788_vm14 = vweird.f32 %v7005_v34 }
 0x59e   : > { %4560 = vmatmul.msk.bf16.gmra.mxu3 %vm4045_vm12, %v4016_v28  ;;  %v6966_v33 = vsel %vm2301_vm9, %v2269_v51, 0.0  ;;  %v6972_v3 = vsel %vm2302_vm13, %v2270_v19, 0.0  ;;  %v2701_v28 = vsel %vm2700_vm3, %v5086_v1, %v2697_v22  ;;  %v2705_v11 = vor.u32 1.1754944e-38, %v2704_v26  ;;  %v8027_v1 = vld [vmem:[#allocation35_spill] sm:$0xff] }
 0x59f   : > { %v2419_v44 = vsel %vm673_vm0, %v6966_v33, 0.0  ;;  %v2422_v25 = vsel %vm673_vm0, %v6972_v3, 0.0  ;;  %v6983_v24 = vmul.f32 0.125, %v2692_v27  ;;  %v2741_v17 = vmul.f32 %v5088_v0, %v2740_v58 }
 0x5a0   : > { %v4103_v29 = vpop.f32.mrf.mxu3  ;;  %vm2744_vm9 = vweird.f32 %v5088_v0  ;;  %v2747_v19 = vand.u32 2147483647, %v2482_v59  ;;  %5091 = vrcp.f32 %v8030_v41 }
 0x5a1   : > { %v4183_v35 = vadd.f32 %v4103_v29, %v505_v18  ;;  %v2706_v18 = vsel %vm2703_vm5, %v2705_v11, %v2701_v28  ;;  %v509_v29 = vpop.f32.mrf.mxu0  ;;  %v2742_v36 = vadd.f32 %v5088_v0, %v2741_v17  ;;  %vm7000_vm13 = vmor %vm2743_vm11, %vm2744_vm9  ;;  %5093 = vrcp.f32 %v8032_v12 }
 0x5a2   : > { %v2707_v61 = vmul.f32 %v2706_v18, %v8026_v60  ;;  %v510_v51 = vadd.f32 %v509_v29, %v6938_v37  ;;  %vm2748_vm15 = vcmp.eq.f32.partialorder %v2747_v19, 8.507059e+37  ;;  %vm1417_vm9 = vweird.f32 %v8030_v41  ;;  %v3630_v19 = vpop.permute.xlu0 %3629 }
 0x5a3   : > { %4215 = vst [vmem:[%s6956_s26] sm:$0xff] %v4183_v35  ;;  %v5090_v56 = vpop.eup %5089  ;;  %v1421_v17 = vand.u32 2147483647, %v8030_v41  ;;  %v1436_v29 = vand.u32 2147483647, %v8032_v12 }
 0x5a4   : > { %v6987_v10 = vmul.f32 0.125, %v2707_v61  ;;  %v2784_v26 = vmul.f32 %v5090_v56, %v7005_v34  ;;  %vm2789_vm1 = vweird.f32 %v5090_v56  ;;  %v2794_v61 = vand.u32 2147483648, %v7005_v34 }
 0x5a5   : > { %553 = vmatmul.bf16.gmra.mxu0 %v5145_v63  ;;  %vm7054_vm3 = vmor %vm2788_vm14, %vm2789_vm1  ;;  %vm1432_vm1 = vweird.f32 %v8032_v12  ;;  %vm2456_vm14 = vcmp.eq.f32.partialorder %v6801_v38, 0.0 }
 0x5a6   : > { %v5092_v16 = vpop.eup %5091  ;;  %v2785_v27 = vsub.f32 1.0, %v2784_v26 }
 0x5a7   : > { %v1413_v49 = vmul.f32 %v5092_v16, %v8030_v41  ;;  %v7044_v18 = vpop.eup %5093  ;;  %vm1418_vm5 = vweird.f32 %v5092_v16 }
 0x5a8   : > { %v4105_v4 = vpop.f32.mrf.mxu3  ;;  %v2786_v63 = vmul.f32 %v5090_v56, %v2785_v27  ;;  %v1428_v39 = vmul.f32 %v7044_v18, %v8032_v12  ;;  %vm7067_vm11 = vmor %vm1417_vm9, %vm1418_vm5  ;;  %v8038_v27 = vld [vmem:[#allocation19_spill] sm:$0xff] }
 0x5a9   : > { %v4184_v42 = vadd.f32 %v4105_v4, %v507_v43  ;;  %v511_v35 = vpop.f32.mrf.mxu0  ;;  %v2746_v43 = vsel %vm7000_vm13, %v5088_v0, %v2742_v36  ;;  %v7050_v0 = vsel %vm2454_vm2, 1.0, %v6699_v5  ;;  %vm2455_vm13 = vcmp.eq.f32.partialorder %v6799_v7, 0.0 }
 0x5aa   : > { %v512_v54 = vadd.f32 %v511_v35, %v6938_v37  ;;  %v2751_v50 = vsel %vm2748_vm15, %v2750_v62, %v2746_v43  ;;  %v2787_v60 = vadd.f32 %v5090_v56, %v2786_v63  ;;  %5095 = vrcp.f32 %v7050_v0  ;;  %v3103_v43 = vpop.f32.mrf.mxu2  ;;  %v8037_v62 = vld [vmem:[#allocation27_spill] sm:$0xff] }
 0x5ab   : > { %4216 = vst [vmem:[%s6956_s26 + $0x8] sm:$0xff] %v4184_v42  ;;  %2420 = vadd.xlane.f32.xlu1 %v2419_v44  ;;  %v8031_v42 = vld [vmem:[#allocation15_spill] sm:$0xff]  ;;  %vm1422_vm15 = vcmp.eq.f32.partialorder %v1421_v17, 8.507059e+37  ;;  %vm1433_vm2 = vweird.f32 %v7044_v18  ;;  %v8042_v17 = vld [vmem:[#allocation12_spill] sm:$0xff] }
 0x5ac   : > { %v2752_v44 = vmul.f32 %v2751_v50, %v8031_v42  ;;  %v2791_v58 = vsel %vm7054_vm3, %v5090_v56, %v2787_v60  ;;  %v3732_v56 = vsel %vm3595_vm7, %v3630_v19, 0.0  ;;  %v1438_v60 = vand.u32 2147483648, %v8032_v12  ;;  %vm7112_vm3 = vmor %vm1432_vm1, %vm1433_vm2 }
 0x5ae   : > { %v7025_v22 = vmul.f32 0.125, %v2752_v44  ;;  %v7083_v44 = vsel %vm2455_vm13, 1.0, %v6799_v7 }
 0x5af   : > { %5097 = vrcp.f32 %v7083_v44 }
 0x5b0   : > { %2423 = vadd.xlane.f32.xlu2 %v2422_v25 }
 0x5b1   : > { %3645 = vperm.xlu0 %4734, %v6983_v24  }
 0x5b5   : > { %558 = vmatmul.bf16.gmra.mxu0 %v8027_v1  ;;  %v1423_v1 = vand.u32 2147483648, %v8030_v41  ;;  %v7079_v41 = vpop.eup %5095 }
 0x5b6   : > { %v2799_v63 = vmul.f32 %v7079_v41, %v7050_v0  ;;  %vm2804_vm13 = vweird.f32 %v7079_v41 }
 0x5b9   : > { %4739 = vset.pattern.permute.xlu0 %v7996_v52 }
 0x5ba   : > { %3245 = vperm.xlu0 %4739, %v6987_v10  }
 0x5c0   : > { %v4108_v55 = vpop.f32.mrf.mxu3  ;;  %v7018_v21 = vpop.xlane.xlu1 %2411 }
 0x5c1   : > { %v4185_v6 = vadd.f32 %v4108_v55, %v510_v51  ;;  %v2795_v51 = vor.u32 1.1754944e-38, %v2794_v61 }
 0x5c2   : > { %4740 = vset.pattern.permute.xlu0 %v7997_v40 }
 0x5c3   : > { %3456 = vperm.xlu0 %4740, %v6987_v10   ;;  %4217 = vst [vmem:[%s6956_s26 + $0x10] sm:$0xff] %v4185_v6  ;;  %v1429_v6 = vsub.f32 1.0, %v1428_v39 }
 0x5c4   : > { %3830 = vperm.xlu1 %4728, %v6789_v48  }
 0x5c5   : > { %563 = vmatmul.bf16.gmra.mxu0 %v6603_v46  ;;  %v1430_v42 = vmul.f32 %v7044_v18, %v1429_v6  ;;  %v1439_v6 = vor.u32 1.1754944e-38, %v1438_v60 }
 0x5c7   : > { %v7010_v4 = vpop.xlane.xlu2 %2414 }
 0x5c8   : > { %3834 = vperm.xlu2 %4735, %v6823_v31   ;;  %v4110_v2 = vpop.f32.mrf.mxu3 }
 0x5c9   : > { %v4186_v14 = vadd.f32 %v4110_v2, %v512_v54  ;;  %v1424_v2 = vor.u32 1.1754944e-38, %v1423_v1  ;;  %v3105_v1 = vpop.f32.mrf.mxu2 }
 0x5cb   : > { %4742 = vset.pattern.permute.xlu0 %v7993_v15  ;;  %4218 = vst [vmem:[%s6956_s26 + $0x18] sm:$0xff] %v4186_v14 }
 0x5cc   : > { %4732 = vset.pattern.permute.xlu1 %v7996_v52  ;;  %3842 = vperm.xlu0 %4742, %v6987_v10  }
 0x5cd   : > { %3235 = vperm.xlu1 %4732, %v6823_v31  }
 0x5cf   : > { %v7029_v25 = vpop.permute.xlu2 %3822 }
 0x5d0   : > { %4736 = vset.pattern.permute.xlu2 %v7996_v52 }
 0x5d1   : > { %3240 = vperm.xlu2 %4736, %v6983_v24  }
 0x5d4   : > { %4751 = vset.pattern.permute.xlu0 %v7996_v52 }
 0x5d5   : > { %4733 = vset.pattern.permute.xlu1 %v7997_v40  ;;  %3260 = vperm.xlu0 %4751, %v7025_v22  }
 0x5d6   : > { %3448 = vperm.xlu1 %4733, %v6823_v31   ;;  %v1414_v31 = vsub.f32 1.0, %v1413_v49  ;;  %568 = vmatmul.bf16.gmra.mxu0 %v6667_v23  ;;  %v2792_v23 = vand.u32 2147483647, %v7005_v34 }
 0x5d7   : > { %v3226_v59 = vpop.permute.xlu2 %3225 }
 0x5d8   : > { %v3221_v46 = vpop.permute.xlu1 %3220  ;;  %v1415_v11 = vmul.f32 %v5092_v16, %v1414_v31  ;;  %vm2793_vm10 = vcmp.eq.f32.partialorder %v2792_v23, 8.507059e+37 }
 0x5d9   : > { %4737 = vset.pattern.permute.xlu2 %v7997_v40  ;;  %v3346_v35 = vsel %vm3177_vm4, %v3221_v46, 0.0  ;;  %v2796_v13 = vsel %vm2793_vm10, %v2795_v51, %v2791_v58  ;;  %v3347_v46 = vsel %vm3177_vm4, %v3226_v59, 0.0  ;;  %v3925_v59 = vsel %vm3788_vm8, %v7029_v25, 0.0  ;;  %v8041_v25 = vld [vmem:[#allocation33_spill] sm:$0xff]  ;;  %v8046_v58 = vld [vmem:[#allocation28_spill] sm:$0xff] }
 0x5da   : > { %3452 = vperm.xlu2 %4737, %v6983_v24   ;;  %v2797_v14 = vmul.f32 %v2796_v13, %v8037_v62  ;;  %vm2448_vm5 = vcmp.eq.f32.partialorder %v8041_v25, 0.0  ;;  %v2800_v51 = vsub.f32 1.0, %v2799_v63  ;;  %v7125_v13 = vsel %vm2456_vm14, 1.0, %v6801_v38 }
 0x5db   : > { %vm1437_vm10 = vcmp.eq.f32.partialorder %v1436_v29, 8.507059e+37  ;;  %5099 = vrcp.f32 %v7125_v13 }
 0x5dd   : > { %4752 = vset.pattern.permute.xlu0 %v7997_v40 }
 0x5de   : > { %4741 = vset.pattern.permute.xlu1 %v7994_v53  ;;  %3468 = vperm.xlu0 %4752, %v7025_v22  }
 0x5df   : > { %v3441_v48 = vpop.permute.xlu2 %3440 }
 0x5e1   : > { %v3437_v28 = vpop.permute.xlu1 %3436 }
 0x5e2   : > { %4738 = vset.pattern.permute.xlu2 %v7993_v15  ;;  %v3539_v5 = vsel %vm3402_vm6, %v3437_v28, 0.0  ;;  %v7097_v28 = vmul.f32 0.125, %v2797_v14 }
 0x5e3   : > { %3838 = vperm.xlu2 %4738, %v6983_v24   ;;  %v1416_v24 = vadd.f32 %v5092_v16, %v1415_v11  ;;  %v3571_v34 = vadd.f32 %v3539_v5, %v3346_v35  ;;  %v1431_v11 = vadd.f32 %v7044_v18, %v1430_v42  ;;  %v7121_v35 = vpop.eup %5097 }
 0x5e4   : > { %v2814_v14 = vmul.f32 %v7121_v35, %v7083_v44 }
 0x5e5   : > { %v1420_v54 = vsel %vm7067_vm11, %v5092_v16, %v1416_v24  ;;  %v3540_v16 = vsel %vm3402_vm6, %v3441_v48, 0.0  ;;  %v3764_v26 = vadd.f32 %v3732_v56, %v3571_v34  ;;  %v1435_v12 = vsel %vm7112_vm3, %v7044_v18, %v1431_v11 }
 0x5e6   : > { %4753 = vset.pattern.permute.xlu0 %v7994_v53  ;;  %v1425_v50 = vsel %vm1422_vm15, %v1424_v2, %v1420_v54  ;;  %v3572_v7 = vadd.f32 %v3540_v16, %v3347_v46  ;;  %v7128_v48 = vsel %vm2448_vm5, 1.0, %v8041_v25  ;;  %v2801_v34 = vmul.f32 %v7079_v41, %v2800_v51 }
 0x5e7   : > { %3661 = vperm.xlu0 %4753, %v7025_v22   ;;  %v1426_v31 = vmul.f32 %v8038_v27, %v1425_v50  ;;  %v3957_v61 = vadd.f32 %v3925_v59, %v3764_v26  ;;  %v1440_v62 = vsel %vm1437_vm10, %v1439_v6, %v1435_v12  ;;  %5101 = vrcp.f32 %v7128_v48  ;;  %v8045_v27 = vld [vmem:[#allocation20_spill] sm:$0xff] }
 0x5e8   : > { %v2802_v42 = vadd.f32 %v7079_v41, %v2801_v34  ;;  %v2809_v56 = vand.u32 2147483648, %v7050_v0  ;;  %v2815_v16 = vsub.f32 1.0, %v2814_v14  ;;  %vm2803_vm15 = vweird.f32 %v7050_v0 }
 0x5e9   : > { %v2272_v55 = vsub.f32 %v1426_v31, %v8042_v17  ;;  %v3989_v54 = vmul.f32 %v3957_v61, %v3103_v43  ;;  %v8044_v43 = vld [vmem:[#allocation25_spill] sm:$0xff]  ;;  %v2807_v26 = vand.u32 2147483647, %v7050_v0  ;;  %vm2805_vm2 = vmor %vm2803_vm15, %vm2804_vm13  ;;  %v514_v61 = vpop.f32.mrf.mxu0  ;;  %vm2819_vm3 = vweird.f32 %v7121_v35 }
 0x5ea   : > { %v3634_v36 = vpop.permute.xlu1 %3633  ;;  %v1441_v50 = vmul.f32 %v8044_v43, %v1440_v62  ;;  %v2806_v63 = vsel %vm2805_vm2, %v7079_v41, %v2802_v42  ;;  %v2810_v11 = vor.u32 1.1754944e-38, %v2809_v56  ;;  %v2816_v60 = vmul.f32 %v7121_v35, %v2815_v16  ;;  %v8049_v42 = vld [vmem:[#allocation29_spill] sm:$0xff] }
 0x5eb   : > { %4747 = vset.pattern.permute.xlu2 %v7996_v52  ;;  %v3733_v49 = vsel %vm3595_vm7, %v3634_v36, 0.0  ;;  %v8043_v36 = vld [vmem:[#allocation32_spill] sm:$0xff]  ;;  %vm2304_vm11 = vcmp.ge.f32.partialorder %v2272_v55, 0.0  ;;  %vm2808_vm1 = vcmp.eq.f32.partialorder %v2807_v26, 8.507059e+37  ;;  %vm2459_vm5 = vcmp.eq.f32.partialorder %v7010_v4, 0.0 }
 0x5ec   : > { %v3765_v23 = vadd.f32 %v3733_v49, %v3572_v7  ;;  %vm2449_vm9 = vcmp.eq.f32.partialorder %v8043_v36, 0.0  ;;  %v7141_v38 = vsel %vm2304_vm11, %v2272_v55, 0.0  ;;  %v7152_v49 = vpop.eup %5099  ;;  %v2273_v31 = vsub.f32 %v1441_v50, %v8045_v27 }
 0x5ed   : > { %v7132_v18 = vsel %vm2449_vm9, 1.0, %v8043_v36  ;;  %v2428_v46 = vsel %vm673_vm0, %v7141_v38, 0.0  ;;  %v7156_v7 = vpop.eup %5101  ;;  %v2829_v0 = vmul.f32 %v7152_v49, %v7125_v13  ;;  %v2817_v29 = vadd.f32 %v7121_v35, %v2816_v60 }
 0x5ee   : > { %5103 = vrcp.f32 %v7132_v18  ;;  %vm2305_vm14 = vcmp.ge.f32.partialorder %v2273_v31, 0.0  ;;  %vm2818_vm9 = vweird.f32 %v7083_v44  ;;  %v7183_v55 = vsel %vm2459_vm5, 1.0, %v7010_v4 }
 0x5ef   : > { %4761 = vset.pattern.permute.xlu0 %v7996_v52  ;;  %v7174_v51 = vsel %vm2305_vm14, %v2273_v31, 0.0  ;;  %vm7178_vm10 = vmor %vm2818_vm9, %vm2819_vm3  ;;  %5105 = vrcp.f32 %v7183_v55  ;;  %v2839_v50 = vand.u32 2147483648, %v7125_v13  ;;  %vm2713_vm13 = vweird.f32 %v7128_v48 }
 0x5f0   : > { %3275 = vperm.xlu0 %4761, %v7097_v28   ;;  %v2431_v36 = vsel %vm673_vm0, %v7174_v51, 0.0  ;;  %vm2834_vm0 = vweird.f32 %v7152_v49  ;;  %vm2714_vm15 = vweird.f32 %v7156_v7  ;;  %vm2833_vm2 = vweird.f32 %v7125_v13 }
 0x5f1   : > { %v2837_v56 = vand.u32 2147483647, %v7125_v13  ;;  %vm7212_vm14 = vmor %vm2833_vm2, %vm2834_vm0  ;;  %v2719_v60 = vand.u32 2147483648, %v7128_v48  ;;  %v2734_v13 = vand.u32 2147483648, %v7132_v18  ;;  %vm2728_vm5 = vweird.f32 %v7132_v18 }
 0x5f2   : > { %vm7226_vm3 = vmor %vm2713_vm13, %vm2714_vm15 }
 0x5f3   : > { %v3827_v39 = vpop.permute.xlu1 %3826  ;;  %v2735_v17 = vor.u32 1.1754944e-38, %v2734_v13 }
 0x5f4   : > { %v3926_v24 = vsel %vm3788_vm8, %v3827_v39, 0.0  ;;  %v7159_v59 = vpop.eup %5103  ;;  %v2709_v39 = vmul.f32 %v7156_v7, %v7128_v48 }
 0x5f5   : > { %v3958_v5 = vadd.f32 %v3926_v24, %v3765_v23  ;;  %v2811_v23 = vsel %vm2808_vm1, %v2810_v11, %v2806_v63  ;;  %v2724_v41 = vmul.f32 %v7159_v59, %v7132_v18  ;;  %v2824_v24 = vand.u32 2147483648, %v7083_v44  ;;  %v7207_v26 = vpop.eup %5105 }
 0x5f6   : > { %v2812_v25 = vmul.f32 %v2811_v23, %v8046_v58  ;;  %v2710_v6 = vsub.f32 1.0, %v2709_v39  ;;  %vm2729_vm1 = vweird.f32 %v7159_v59  ;;  %v2717_v11 = vand.u32 2147483647, %v7128_v48 }
 0x5f7   : > { %v3990_v19 = vmul.f32 %v3958_v5, %v3105_v1  ;;  %v2830_v1 = vsub.f32 1.0, %v2829_v0  ;;  %v2822_v5 = vand.u32 2147483647, %v7083_v44  ;;  %v2725_v12 = vsub.f32 1.0, %v2724_v41  ;;  %vm7237_vm9 = vmor %vm2728_vm5, %vm2729_vm1 }
 0x5f8   : > { %4762 = vset.pattern.permute.xlu0 %v7997_v40  ;;  %v7191_v44 = vmul.f32 0.125, %v2812_v25  ;;  %v2711_v62 = vmul.f32 %v7156_v7, %v2710_v6  ;;  %v2732_v39 = vand.u32 2147483647, %v7132_v18  ;;  %v2840_v41 = vor.u32 1.1754944e-38, %v2839_v50 }
 0x5f9   : > { %v4017_v2 = vpack.c.bf16 %v3990_v19, %v3989_v54  ;;  %3480 = vperm.xlu0 %4762, %v7097_v28   ;;  %v2821_v54 = vsel %vm7178_vm10, %v7121_v35, %v2817_v29  ;;  %v2825_v19 = vor.u32 1.1754944e-38, %v2824_v24  ;;  %v2831_v34 = vmul.f32 %v7152_v49, %v2830_v1  ;;  %v2418_v29 = vpop.xlane.xlu0 %2417 }
 0x5fa   : > { %vm2823_vm11 = vcmp.eq.f32.partialorder %v2822_v5, 8.507059e+37  ;;  %v2726_v14 = vmul.f32 %v7159_v59, %v2725_v12  ;;  %v515_v35 = vadd.f32 %v514_v61, %v6938_v37  ;;  %vm2838_vm10 = vcmp.eq.f32.partialorder %v2837_v56, 8.507059e+37  ;;  %v7270_v56 = vpop.permute.xlu2 %3637 }
 0x5fb   : > { %4561 = vmatmul.msk.bf16.gmra.mxu3 %vm4045_vm12, %v4017_v2  ;;  %v516_v2 = vpop.f32.mrf.mxu0  ;;  %573 = vmatmul.bf16.gmra.mxu0 %v6794_v20  ;;  %v2826_v4 = vsel %vm2823_vm11, %v2825_v19, %v2821_v54  ;;  %v2832_v43 = vadd.f32 %v7152_v49, %v2831_v34  ;;  %v2874_v48 = vmul.f32 %v7207_v26, %v7183_v55  ;;  %v2720_v5 = vor.u32 1.1754944e-38, %v2719_v60 }
 0x5fc   : > { %v2827_v20 = vmul.f32 %v2826_v4, %v8049_v42  ;;  %v2727_v27 = vadd.f32 %v7159_v59, %v2726_v14  ;;  %v517_v18 = vadd.f32 %v516_v2, %v6938_v37  ;;  %vm2460_vm11 = vcmp.eq.f32.partialorder %v2418_v29, 0.0  ;;  %v8057_v2 = vld [vmem:[#allocation36_spill] sm:$0xff]  ;;  %v8058_v14 = vld [vmem:[#allocation11_spill] sm:$0xff] }
 0x5fd   : > { %v2836_v0 = vsel %vm7212_vm14, %v7152_v49, %v2832_v43  ;;  %vm2718_vm0 = vcmp.eq.f32.partialorder %v2717_v11, 8.507059e+37  ;;  %vm2733_vm13 = vcmp.eq.f32.partialorder %v2732_v39, 8.507059e+37  ;;  %v2875_v6 = vsub.f32 1.0, %v2874_v48  ;;  %v8059_v43 = vld [vmem:[#allocation26_spill] sm:$0xff] }
 0x5fe   : > { %v7233_v24 = vmul.f32 0.125, %v2827_v20  ;;  %v2841_v1 = vsel %vm2838_vm10, %v2840_v41, %v2836_v0  ;;  %v2731_v25 = vsel %vm7237_vm9, %v7159_v59, %v2727_v27  ;;  %vm2451_vm15 = vcmp.eq.f32.partialorder %v8057_v2, 0.0  ;;  %v8060_v11 = vld [vmem:[#allocation38_spill] sm:$0xff] }
 0x5ff   : > { %v2736_v34 = vsel %vm2733_vm13, %v2735_v17, %v2731_v25  ;;  %v7264_v50 = vsel %vm2451_vm15, 1.0, %v8057_v2  ;;  %v2876_v42 = vmul.f32 %v7207_v26, %v2875_v6  ;;  %vm2879_vm1 = vweird.f32 %v7207_v26 }
 0x600   : > { %2429 = vadd.xlane.f32.xlu1 %v2428_v46  ;;  %v2712_v46 = vadd.f32 %v7156_v7, %v2711_v62  ;;  %vm2452_vm14 = vcmp.eq.f32.partialorder %v8060_v11, 0.0  ;;  %v2884_v60 = vand.u32 2147483648, %v7183_v55 }
 0x601   : > { %4763 = vset.pattern.permute.xlu0 %v7994_v53  ;;  %v7258_v62 = vpop.permute.xlu0 %3230  ;;  %v2877_v27 = vadd.f32 %v7207_v26, %v2876_v42  ;;  %v7295_v39 = vsel %vm2452_vm14, 1.0, %v8060_v11 }
 0x602   : > { %3673 = vperm.xlu0 %4763, %v7097_v28   ;;  %v2716_v58 = vsel %vm7226_vm3, %v7156_v7, %v2712_v46  ;;  %v7255_v7 = vsel %vm2460_vm11, 1.0, %v2418_v29  ;;  %vm2878_vm3 = vweird.f32 %v7183_v55  ;;  %v2885_v48 = vor.u32 1.1754944e-38, %v2884_v60 }
 0x603   : > { %v519_v61 = vpop.f32.mrf.mxu0  ;;  %v2721_v19 = vsel %vm2718_vm0, %v2720_v5, %v2716_v58  ;;  %5107 = vrcp.f32 %v7255_v7  ;;  %vm2880_vm5 = vmor %vm2878_vm3, %vm2879_vm1  ;;  %vm2893_vm0 = vweird.f32 %v7255_v7  ;;  %v2897_v42 = vand.u32 2147483647, %v7255_v7 }
 0x604   : > { %5109 = vrcp.f32 %v7264_v50  ;;  %v2881_v41 = vsel %vm2880_vm5, %v7207_v26, %v2877_v27 }
 0x605   : > { %vm2898_vm14 = vcmp.eq.f32.partialorder %v2897_v42, 8.507059e+37 }
 0x609   : > { %v7286_v0 = vpop.eup %5107 }
 0x60a   : > { %3677 = vperm.xlu0 %4763, %v7191_v44   ;;  %v7298_v29 = vpop.eup %5109  ;;  %v2889_v49 = vmul.f32 %v7286_v0, %v7255_v7  ;;  %vm2894_vm11 = vweird.f32 %v7286_v0 }
 0x60b   : > { %v521_v59 = vpop.f32.mrf.mxu0  ;;  %578 = vmatmul.bf16.gmra.mxu0 %v6820_v47  ;;  %v2754_v58 = vmul.f32 %v7298_v29, %v7264_v50  ;;  %vm2759_vm13 = vweird.f32 %v7298_v29  ;;  %vm7348_vm15 = vmor %vm2893_vm0, %vm2894_vm11 }
 0x60c   : > { %2432 = vadd.xlane.f32.xlu2 %v2431_v36  ;;  %v8056_v36 = vld [vmem:[#allocation34_spill] sm:$0xff]  ;;  %v2890_v5 = vsub.f32 1.0, %v2889_v49 }
 0x60d   : > { %v2842_v54 = vmul.f32 %v2841_v1, %v8056_v36  ;;  %v522_v1 = vadd.f32 %v521_v59, %v6938_v37 }
 0x60f   : > { %v7268_v20 = vmul.f32 0.125, %v2842_v54  ;;  %v2755_v54 = vsub.f32 1.0, %v2754_v58 }
 0x611   : > { %v4113_v16 = vpop.f32.mrf.mxu3  ;;  %v2756_v59 = vmul.f32 %v7298_v29, %v2755_v54 }
 0x612   : > { %v4187_v63 = vadd.f32 %v4113_v16, %v515_v35  ;;  %4770 = vset.pattern.permute.xlu0 %v7993_v15  ;;  %v2722_v35 = vmul.f32 %v2721_v19, %v8058_v14  ;;  %v520_v16 = vadd.f32 %v519_v61, %v6938_v37  ;;  %v2882_v61 = vand.u32 2147483647, %v7183_v55 }
 0x613   : > { %3874 = vperm.xlu0 %4770, %v7233_v24   ;;  %v2891_v19 = vmul.f32 %v7286_v0, %v2890_v5 }
 0x614   : > { %4219 = vst [vmem:[%s6956_s26 + $0x20] sm:$0xff] %v4187_v63  ;;  %v7276_v46 = vmul.f32 0.125, %v2722_v35  ;;  %vm2883_vm9 = vcmp.eq.f32.partialorder %v2882_v61, 8.507059e+37 }
 0x615   : > { %v2886_v26 = vsel %vm2883_vm9, %v2885_v48, %v2881_v41  ;;  %v2892_v35 = vadd.f32 %v7286_v0, %v2891_v19 }
 0x616   : > { %v2887_v6 = vmul.f32 %v2886_v26, %v6777_v57 }
 0x617   : > { %v2896_v60 = vsel %vm7348_vm15, %v7286_v0, %v2892_v35  ;;  %v2777_v35 = vand.u32 2147483647, %v7295_v39 }
 0x619   : > { %3649 = vperm.xlu1 %4741, %v6987_v10   ;;  %v4115_v12 = vpop.f32.mrf.mxu3  ;;  %v2737_v10 = vmul.f32 %v2736_v34, %v8059_v43  ;;  %v2899_v43 = vand.u32 2147483648, %v7255_v7 }
 0x61a   : > { %v4188_v4 = vadd.f32 %v4115_v12, %v517_v18  ;;  %v7302_v18 = vpop.permute.xlu0 %3444 }
 0x61b   : > { %4771 = vset.pattern.permute.xlu0 %v7996_v52  ;;  %v7281_v63 = vmul.f32 0.125, %v2737_v10  ;;  %v2900_v61 = vor.u32 1.1754944e-38, %v2899_v43 }
 0x61c   : > { %4220 = vst [vmem:[%s6956_s26 + $0x28] sm:$0xff] %v4188_v4  ;;  %3290 = vperm.xlu0 %4771, %v7268_v20   ;;  %v7327_v4 = vmul.f32 0.125, %v2887_v6 }
 0x61e   : > { %v2421_v47 = vpop.xlane.xlu1 %2420 }
 0x61f   : > { %vm2461_vm2 = vcmp.eq.f32.partialorder %v2421_v47, 0.0 }
 0x620   : > { %v7290_v23 = vsel %vm2461_vm2, 1.0, %v2421_v47  ;;  %vm2758_vm2 = vweird.f32 %v7264_v50 }
 0x621   : > { %4743 = vset.pattern.permute.xlu1 %v7996_v52  ;;  %v4118_v31 = vpop.f32.mrf.mxu3  ;;  %5111 = vrcp.f32 %v7290_v23  ;;  %vm7362_vm1 = vmor %vm2758_vm2, %vm2759_vm13  ;;  %vm2773_vm13 = vweird.f32 %v7295_v39 }
 0x622   : > { %v4189_v13 = vadd.f32 %v4118_v31, %v520_v16  ;;  %3250 = vperm.xlu1 %4743, %v7276_v46   ;;  %5113 = vrcp.f32 %v7295_v39  ;;  %v7329_v57 = vpop.permute.xlu0 %3641  ;;  %v2757_v16 = vadd.f32 %v7298_v29, %v2756_v59  ;;  %v2764_v31 = vand.u32 2147483648, %v7264_v50 }
 0x623   : > { %v2424_v55 = vpop.xlane.xlu2 %2423 }
 0x624   : > { %3255 = vperm.xlu2 %4747, %v7281_v63   ;;  %4221 = vst [vmem:[%s6956_s26 + $0x30] sm:$0xff] %v4189_v13  ;;  %4772 = vset.pattern.permute.xlu0 %v7997_v40  ;;  %vm2462_vm10 = vcmp.eq.f32.partialorder %v2424_v55, 0.0  ;;  %v2762_v13 = vand.u32 2147483647, %v7264_v50  ;;  %v2761_v0 = vsel %vm7362_vm1, %v7298_v29, %v2757_v16  ;;  %v2765_v50 = vor.u32 1.1754944e-38, %v2764_v31 }
 0x625   : > { %3492 = vperm.xlu0 %4772, %v7268_v20   ;;  %v7317_v36 = vsel %vm2462_vm10, 1.0, %v2424_v55  ;;  %vm2908_vm10 = vweird.f32 %v7290_v23  ;;  %v2912_v29 = vand.u32 2147483647, %v7290_v23  ;;  %vm2778_vm1 = vcmp.eq.f32.partialorder %v2777_v35, 8.507059e+37 }
 0x626   : > { %5115 = vrcp.f32 %v7317_v36  ;;  %vm2763_vm3 = vcmp.eq.f32.partialorder %v2762_v13, 8.507059e+37  ;;  %v3108_v13 = vpop.f32.mrf.mxu2 }
 0x627   : > { %v7315_v12 = vpop.eup %5111  ;;  %v2766_v6 = vsel %vm2763_vm3, %v2765_v50, %v2761_v0  ;;  %vm2913_vm2 = vcmp.eq.f32.partialorder %v2912_v29, 8.507059e+37  ;;  %vm2923_vm3 = vweird.f32 %v7317_v36  ;;  %v8072_v0 = vld [vmem:[#allocation21_spill] sm:$0xff] }
 0x628   : > { %v7322_v34 = vpop.eup %5113  ;;  %v2904_v2 = vmul.f32 %v7315_v12, %v7290_v23  ;;  %vm2909_vm9 = vweird.f32 %v7315_v12 }
 0x629   : > { %v4120_v25 = vpop.f32.mrf.mxu3  ;;  %v2769_v14 = vmul.f32 %v7322_v34, %v7295_v39  ;;  %vm2774_vm11 = vweird.f32 %v7322_v34  ;;  %vm7387_vm0 = vmor %vm2908_vm10, %vm2909_vm9 }
 0x62a   : > { %v4190_v17 = vadd.f32 %v4120_v25, %v522_v1  ;;  %4744 = vset.pattern.permute.xlu1 %v7997_v40  ;;  %v2905_v10 = vsub.f32 1.0, %v2904_v2  ;;  %v2427_v48 = vpop.xlane.xlu0 %2426  ;;  %v2901_v1 = vsel %vm2898_vm14, %v2900_v61, %v2896_v60  ;;  %v2914_v25 = vand.u32 2147483648, %v7290_v23  ;;  %vm7402_vm15 = vmor %vm2773_vm13, %vm2774_vm11 }
 0x62b   : > { %3460 = vperm.xlu1 %4744, %v7276_v46   ;;  %v2770_v11 = vsub.f32 1.0, %v2769_v14  ;;  %vm2463_vm5 = vcmp.eq.f32.partialorder %v2427_v48, 0.0  ;;  %v3541_v60 = vsel %vm3402_vm6, %v7302_v18, 0.0  ;;  %v3734_v18 = vsel %vm3595_vm7, %v7270_v56, 0.0 }
 0x62c   : > { %4748 = vset.pattern.permute.xlu2 %v7997_v40  ;;  %4222 = vst [vmem:[%s6956_s26 + $0x38] sm:$0xff] %v4190_v17  ;;  %v7344_v47 = vpop.eup %5115  ;;  %v2906_v41 = vmul.f32 %v7315_v12, %v2905_v10  ;;  %v2902_v17 = vmul.f32 %v2901_v1, %v6767_v8  ;;  %v7385_v19 = vsel %vm2463_vm5, 1.0, %v2427_v48  ;;  %v2779_v8 = vand.u32 2147483648, %v7295_v39 }
 0x62d   : > { %3464 = vperm.xlu2 %4748, %v7281_v63   ;;  %4782 = vset.pattern.permute.xlu0 %v7996_v52  ;;  %v2919_v55 = vmul.f32 %v7344_v47, %v7317_v36  ;;  %v2771_v26 = vmul.f32 %v7322_v34, %v2770_v11  ;;  %v2915_v43 = vor.u32 1.1754944e-38, %v2914_v25  ;;  %5117 = vrcp.f32 %v7385_v19 }
 0x62e   : > { %3305 = vperm.xlu0 %4782, %v7327_v4   ;;  %v2907_v58 = vadd.f32 %v7315_v12, %v2906_v41  ;;  %v7400_v42 = vmul.f32 0.125, %v2902_v17  ;;  %v2780_v39 = vor.u32 1.1754944e-38, %v2779_v8  ;;  %vm2924_vm14 = vweird.f32 %v7344_v47  ;;  %v3835_v17 = vpop.permute.xlu2 %3834 }
 0x62f   : > { %v2920_v5 = vsub.f32 1.0, %v2919_v55  ;;  %v2772_v54 = vadd.f32 %v7322_v34, %v2771_v26  ;;  %v2929_v11 = vand.u32 2147483648, %v7317_v36  ;;  %v2927_v41 = vand.u32 2147483647, %v7317_v36  ;;  %vm7431_vm5 = vmor %vm2923_vm3, %vm2924_vm14 }
 0x630   : > { %v2911_v14 = vsel %vm7387_vm0, %v7315_v12, %v2907_v58  ;;  %v3348_v48 = vsel %vm3177_vm4, %v7258_v62, 0.0  ;;  %v3928_v2 = vsel %vm3788_vm8, %v3835_v17, 0.0  ;;  %vm2938_vm11 = vweird.f32 %v7385_v19 }
 0x631   : > { %v2921_v10 = vmul.f32 %v7344_v47, %v2920_v5  ;;  %v2916_v16 = vsel %vm2913_vm2, %v2915_v43, %v2911_v14  ;;  %v2776_v12 = vsel %vm7402_vm15, %v7322_v34, %v2772_v54  ;;  %v3573_v55 = vadd.f32 %v3541_v60, %v3348_v48  ;;  %v3110_v14 = vpop.f32.mrf.mxu2 }
 0x632   : > { %v2917_v61 = vmul.f32 %v2916_v16, %v6966_v33  ;;  %v2781_v34 = vsel %vm2778_vm1, %v2780_v39, %v2776_v12  ;;  %v2930_v1 = vor.u32 1.1754944e-38, %v2929_v11  ;;  %vm2928_vm9 = vcmp.eq.f32.partialorder %v2927_v41, 8.507059e+37  ;;  %v3646_v41 = vpop.permute.xlu0 %3645 }
 0x633   : > { %4745 = vset.pattern.permute.xlu1 %v7994_v53  ;;  %v2922_v31 = vadd.f32 %v7344_v47, %v2921_v10  ;;  %v5118_v49 = vpop.eup %5117  ;;  %v2782_v50 = vmul.f32 %v2781_v34, %v8072_v0  ;;  %v3766_v25 = vadd.f32 %v3734_v18, %v3573_v55  ;;  %v2942_v12 = vand.u32 2147483647, %v7385_v19  ;;  %v524_v18 = vpop.f32.mrf.mxu0 }
 0x634   : > { %3653 = vperm.xlu1 %4745, %v7276_v46   ;;  %v7444_v26 = vmul.f32 0.125, %v2917_v61  ;;  %v2934_v5 = vmul.f32 %v5118_v49, %v7385_v19  ;;  %vm2939_vm10 = vweird.f32 %v5118_v49  ;;  %vm2457_vm15 = vcmp.eq.f32.partialorder %v6834_v45, 0.0 }
 0x635   : > { %4749 = vset.pattern.permute.xlu2 %v7994_v53  ;;  %v2996_v8 = vmul.f32 0.125, %v2782_v50  ;;  %vm2940_vm0 = vmor %vm2938_vm11, %vm2939_vm10  ;;  %vm2943_vm13 = vcmp.eq.f32.partialorder %v2942_v12, 8.507059e+37  ;;  %vm2458_vm2 = vcmp.eq.f32.partialorder %v7018_v21, 0.0 }
 0x636   : > { %3657 = vperm.xlu2 %4749, %v7281_v63   ;;  %v7354_v7 = vpop.permute.xlu1 %3830  ;;  %4783 = vset.pattern.permute.xlu0 %v7997_v40  ;;  %v7491_v48 = vsel %vm2458_vm2, 1.0, %v7018_v21  ;;  %v525_v21 = vadd.f32 %v524_v18, %v6938_v37 }
 0x637   : > { %3504 = vperm.xlu0 %4783, %v7327_v4   ;;  %v3927_v62 = vsel %vm3788_vm8, %v7354_v7, 0.0  ;;  %v3735_v7 = vsel %vm3595_vm7, %v7329_v57, 0.0 }
 0x638   : > { %v3959_v29 = vadd.f32 %v3927_v62, %v3766_v25 }
 0x63a   : > { %v3991_v57 = vmul.f32 %v3959_v29, %v3108_v13  ;;  %v2489_v13 = vsel %vm2457_vm15, 1.0, %v6834_v45  ;;  %v3246_v33 = vpop.permute.xlu0 %3245 }
 0x63b   : > { %5119 = vrcp.f32 %v2489_v13  ;;  %v2854_v0 = vand.u32 2147483648, %v2489_v13  ;;  %vm2848_vm3 = vweird.f32 %v2489_v13  ;;  %v2852_v50 = vand.u32 2147483647, %v2489_v13  ;;  %v526_v17 = vpop.f32.mrf.mxu0 }
 0x63c   : > { %4746 = vset.pattern.permute.xlu1 %v7993_v15  ;;  %5121 = vrcp.f32 %v7491_v48 }
 0x63d   : > { %3846 = vperm.xlu1 %4746, %v7276_v46   ;;  %v8067_v46 = vld [vmem:[#allocation17_spill] sm:$0xff]  ;;  %vm2853_vm10 = vcmp.eq.f32.partialorder %v2852_v50, 8.507059e+37 }
 0x63e   : > { %4750 = vset.pattern.permute.xlu2 %v7993_v15  ;;  %v2767_v59 = vmul.f32 %v2766_v6, %v8067_v46 }
 0x63f   : > { %3850 = vperm.xlu2 %4750, %v7281_v63   ;;  %v3236_v23 = vpop.permute.xlu1 %3235  ;;  %3508 = vperm.xlu0 %4783, %v7400_v42  }
 0x640   : > { %v7411_v27 = vmul.f32 0.125, %v2767_v59  ;;  %v3349_v56 = vsel %vm3177_vm4, %v3236_v23, 0.0  ;;  %v2935_v23 = vsub.f32 1.0, %v2934_v5 }
 0x641   : > { %v5120_v34 = vpop.eup %5119 }
 0x642   : > { %v2936_v43 = vmul.f32 %v5118_v49, %v2935_v23  ;;  %vm2849_vm14 = vweird.f32 %v5120_v34 }
 0x644   : > { %v2937_v16 = vadd.f32 %v5118_v49, %v2936_v43 }
 0x645   : > { %4754 = vset.pattern.permute.xlu1 %v7996_v52 }
 0x646   : > { %3265 = vperm.xlu1 %4754, %v7411_v27   ;;  %v2941_v39 = vsel %vm2940_vm0, %v5118_v49, %v2937_v16 }
 0x647   : > { %3854 = vperm.xlu2 %4750, %v7025_v22   ;;  %v2926_v22 = vsel %vm7431_vm5, %v7344_v47, %v2922_v31  ;;  %4791 = vset.pattern.permute.xlu0 %v7994_v53  ;;  %vm7504_vm5 = vmor %vm2848_vm3, %vm2849_vm14  ;;  %vm2863_vm3 = vweird.f32 %v7491_v48 }
 0x648   : > { %v3449_v36 = vpop.permute.xlu1 %3448  ;;  %3705 = vperm.xlu0 %4791, %v7444_v26   ;;  %v2931_v6 = vsel %vm2928_vm9, %v2930_v1, %v2926_v22 }
 0x649   : > { %v3542_v58 = vsel %vm3402_vm6, %v3449_v36, 0.0  ;;  %v2932_v59 = vmul.f32 %v2931_v6, %v6972_v3  ;;  %v2944_v3 = vand.u32 2147483648, %v7385_v19  ;;  %v3241_v19 = vpop.permute.xlu2 %3240  ;;  %v3457_v6 = vpop.permute.xlu0 %3456 }
 0x64a   : > { %v3574_v47 = vadd.f32 %v3542_v58, %v3349_v56  ;;  %v7502_v56 = vpop.eup %5121 }
 0x64b   : > { %v7460_v10 = vmul.f32 0.125, %v2932_v59  ;;  %v2945_v31 = vor.u32 1.1754944e-38, %v2944_v3  ;;  %v2859_v29 = vmul.f32 %v7502_v56, %v7491_v48  ;;  %vm2864_vm0 = vweird.f32 %v7502_v56 }
 0x64c   : > { %v3767_v54 = vadd.f32 %v3735_v7, %v3574_v47  ;;  %v2855_v7 = vor.u32 1.1754944e-38, %v2854_v0 }
 0x64d   : > { %v2946_v11 = vsel %vm2943_vm13, %v2945_v31, %v2941_v39  ;;  %v3736_v31 = vsel %vm3595_vm7, %v3646_v41, 0.0 }
 0x64e   : > { %v3960_v46 = vadd.f32 %v3928_v2, %v3767_v54  ;;  %4755 = vset.pattern.permute.xlu1 %v7997_v40  ;;  %v2947_v60 = vmul.f32 %v2946_v11, %v6943_v9  ;;  %v3544_v11 = vsel %vm3402_vm6, %v3457_v6, 0.0 }
 0x64f   : > { %4758 = vset.pattern.permute.xlu2 %v7996_v52  ;;  %3472 = vperm.xlu1 %4755, %v7411_v27  }
 0x650   : > { %3270 = vperm.xlu2 %4758, %v2996_v8   ;;  %v3992_v35 = vmul.f32 %v3960_v46, %v3110_v14  ;;  %4793 = vset.pattern.permute.xlu0 %v7996_v52  ;;  %v7479_v61 = vmul.f32 0.125, %v2947_v60  ;;  %v3350_v46 = vsel %vm3177_vm4, %v3241_v19, 0.0  ;;  %v3113_v14 = vpop.f32.mrf.mxu2 }
 0x651   : > { %3320 = vperm.xlu0 %4793, %v7460_v10   ;;  %v3453_v9 = vpop.permute.xlu2 %3452  ;;  %v3843_v41 = vpop.permute.xlu0 %3842 }
 0x652   : > { %v4018_v63 = vpack.c.bf16 %v3992_v35, %v3991_v57  ;;  %v3543_v54 = vsel %vm3402_vm6, %v3453_v9, 0.0  ;;  %v2860_v57 = vsub.f32 1.0, %v2859_v29  ;;  %v3351_v9 = vsel %vm3177_vm4, %v3246_v33, 0.0 }
 0x653   : > { %v3575_v59 = vadd.f32 %v3543_v54, %v3350_v46  ;;  %v2869_v33 = vand.u32 2147483648, %v7491_v48  ;;  %v2867_v46 = vand.u32 2147483647, %v7491_v48 }
 0x654   : > { %4562 = vmatmul.msk.bf16.gmra.mxu3 %vm4045_vm12, %v4018_v63  ;;  %v8075_v63 = vld [vmem:[#allocation39_spill] sm:$0xff] }
 0x655   : > { %v3768_v19 = vadd.f32 %v3736_v31, %v3575_v59 }
 0x657   : > { %4756 = vset.pattern.permute.xlu1 %v7994_v53 }
 0x658   : > { %4759 = vset.pattern.permute.xlu2 %v7997_v40  ;;  %3665 = vperm.xlu1 %4756, %v7411_v27  }
 0x659   : > { %3476 = vperm.xlu2 %4759, %v2996_v8   ;;  %4794 = vset.pattern.permute.xlu0 %v7994_v53 }
 0x65a   : > { %3709 = vperm.xlu0 %4794, %v7460_v10  }
 0x660   : > { %4757 = vset.pattern.permute.xlu1 %v7993_v15 }
 0x661   : > { %4760 = vset.pattern.permute.xlu2 %v7994_v53  ;;  %3858 = vperm.xlu1 %4757, %v7411_v27   ;;  %v2844_v27 = vmul.f32 %v5120_v34, %v2489_v13  ;;  %v2861_v13 = vmul.f32 %v7502_v56, %v2860_v57 }
 0x662   : > { %3669 = vperm.xlu2 %4760, %v2996_v8   ;;  %4798 = vset.pattern.permute.xlu0 %v7993_v15 }
 0x663   : > { %3906 = vperm.xlu0 %4798, %v7479_v61   ;;  %v2845_v49 = vsub.f32 1.0, %v2844_v27 }
 0x665   : > { %v2846_v1 = vmul.f32 %v5120_v34, %v2845_v49 }
 0x667   : > { %v2847_v36 = vadd.f32 %v5120_v34, %v2846_v1 }
 0x669   : > { %3862 = vperm.xlu1 %4757, %v2996_v8   ;;  %v2851_v47 = vsel %vm7504_vm5, %v5120_v34, %v2847_v36  ;;  %v527_v8 = vadd.f32 %v526_v17, %v6938_v37  ;;  %v3115_v17 = vpop.f32.mrf.mxu2 }
 0x66a   : > { %4764 = vset.pattern.permute.xlu2 %v7993_v15  ;;  %v2856_v23 = vsel %vm2853_vm10, %v2855_v7, %v2851_v47 }
 0x66b   : > { %3866 = vperm.xlu2 %4764, %v7097_v28   ;;  %4802 = vset.pattern.permute.xlu0 %v7996_v52  ;;  %v3839_v28 = vpop.permute.xlu2 %3838  ;;  %v2857_v16 = vmul.f32 %v2856_v23, %v8075_v63 }
 0x66d   : > { %v7543_v27 = vmul.f32 0.125, %v2857_v16 }
 0x671   : > { %4765 = vset.pattern.permute.xlu1 %v7996_v52 }
 0x672   : > { %3280 = vperm.xlu1 %4765, %v7191_v44  }
 0x673   : > { %3870 = vperm.xlu2 %4764, %v7191_v44   ;;  %v2430_v45 = vpop.xlane.xlu1 %2429 }
 0x674   : > { %vm2464_vm1 = vcmp.eq.f32.partialorder %v2430_v45, 0.0 }
 0x675   : > { %v7493_v55 = vsel %vm2464_vm1, 1.0, %v2430_v45  ;;  %v3576_v45 = vadd.f32 %v3544_v11, %v3351_v9  ;;  %v3261_v9 = vpop.permute.xlu0 %3260 }
 0x676   : > { %5123 = vrcp.f32 %v7493_v55  ;;  %v2959_v54 = vand.u32 2147483648, %v7493_v55  ;;  %vm2953_vm14 = vweird.f32 %v7493_v55  ;;  %v3354_v59 = vsel %vm3177_vm4, %v3261_v9, 0.0 }
 0x678   : > { %v2960_v63 = vor.u32 1.1754944e-38, %v2959_v54 }
 0x67a   : > { %4766 = vset.pattern.permute.xlu1 %v7997_v40 }
 0x67b   : > { %4767 = vset.pattern.permute.xlu2 %v7996_v52  ;;  %3484 = vperm.xlu1 %4766, %v7191_v44  }
 0x67c   : > { %3285 = vperm.xlu2 %4767, %v7233_v24   ;;  %v7508_v44 = vpop.eup %5123 }
 0x67d   : > { %v2949_v2 = vmul.f32 %v7508_v44, %v7493_v55  ;;  %vm2954_vm15 = vweird.f32 %v7508_v44 }
 0x67e   : > { %v4123_v22 = vpop.f32.mrf.mxu3  ;;  %vm7567_vm5 = vmor %vm2953_vm14, %vm2954_vm15 }
 0x67f   : > { %v2433_v62 = vpop.xlane.xlu2 %2432  ;;  %v4191_v25 = vadd.f32 %v4123_v22, %v525_v21  ;;  %v2950_v12 = vsub.f32 1.0, %v2949_v2  ;;  %v2862_v22 = vadd.f32 %v7502_v56, %v2861_v13 }
 0x680   : > { %vm2465_vm9 = vcmp.eq.f32.partialorder %v2433_v62, 0.0 }
 0x681   : > { %v7510_v5 = vsel %vm2465_vm9, 1.0, %v2433_v62  ;;  %4223 = vst [vmem:[%s6956_s26 + $0x40] sm:$0xff] %v4191_v25  ;;  %v2951_v18 = vmul.f32 %v7508_v44, %v2950_v12  ;;  %v3930_v62 = vsel %vm3788_vm8, %v3843_v41, 0.0  ;;  %vm7574_vm9 = vmor %vm2863_vm3, %vm2864_vm0 }
 0x682   : > { %5125 = vrcp.f32 %v7510_v5  ;;  %v2974_v1 = vand.u32 2147483648, %v7510_v5  ;;  %v2972_v36 = vand.u32 2147483647, %v7510_v5  ;;  %vm2968_vm13 = vweird.f32 %v7510_v5 }
 0x683   : > { %4769 = vset.pattern.permute.xlu1 %v7994_v53  ;;  %v2952_v47 = vadd.f32 %v7508_v44, %v2951_v18 }
 0x684   : > { %4768 = vset.pattern.permute.xlu2 %v7997_v40  ;;  %3681 = vperm.xlu1 %4769, %v7233_v24   ;;  %v2975_v7 = vor.u32 1.1754944e-38, %v2974_v1  ;;  %vm2973_vm1 = vcmp.eq.f32.partialorder %v2972_v36, 8.507059e+37 }
 0x685   : > { %3488 = vperm.xlu2 %4768, %v7233_v24   ;;  %v3929_v24 = vsel %vm3788_vm8, %v3839_v28, 0.0 }
 0x686   : > { %v4125_v35 = vpop.f32.mrf.mxu3  ;;  %v3961_v49 = vadd.f32 %v3929_v24, %v3768_v19  ;;  %v3118_v19 = vpop.f32.mrf.mxu2 }
 0x687   : > { %v7529_v43 = vpop.permute.xlu2 %3255  ;;  %v4192_v39 = vadd.f32 %v4125_v35, %v527_v8  ;;  %v2957_v8 = vand.u32 2147483647, %v7493_v55  ;;  %v2956_v55 = vsel %vm7567_vm5, %v7508_v44, %v2952_v47 }
 0x688   : > { %v5126_v3 = vpop.eup %5125  ;;  %v3993_v29 = vmul.f32 %v3961_v49, %v3113_v14 }
 0x689   : > { %v2964_v60 = vmul.f32 %v5126_v3, %v7510_v5  ;;  %4224 = vst [vmem:[%s6956_s26 + $0x48] sm:$0xff] %v4192_v39  ;;  %vm2969_vm11 = vweird.f32 %v5126_v3  ;;  %vm2958_vm10 = vcmp.eq.f32.partialorder %v2957_v8, 8.507059e+37 }
 0x68a   : > { %vm2970_vm2 = vmor %vm2968_vm13, %vm2969_vm11  ;;  %vm2868_vm11 = vcmp.eq.f32.partialorder %v2867_v46, 8.507059e+37  ;;  %v2961_v12 = vsel %vm2958_vm10, %v2960_v63, %v2956_v55  ;;  %v529_v55 = vpop.f32.mrf.mxu0 }
 0x68b   : > { %v2965_v34 = vsub.f32 1.0, %v2964_v60  ;;  %v3650_v28 = vpop.permute.xlu1 %3649  ;;  %v2962_v31 = vmul.f32 %v2961_v12, %v7141_v38 }
 0x68c   : > { %v3737_v0 = vsel %vm3595_vm7, %v3650_v28, 0.0  ;;  %3685 = vperm.xlu1 %4769, %v7268_v20  }
 0x68d   : > { %v2966_v21 = vmul.f32 %v5126_v3, %v2965_v34  ;;  %4776 = vset.pattern.permute.xlu2 %v7994_v53  ;;  %v3769_v50 = vadd.f32 %v3737_v0, %v3576_v45  ;;  %v3353_v34 = vsel %vm3177_vm4, %v7529_v43, 0.0 }
 0x68e   : > { %3689 = vperm.xlu2 %4776, %v7543_v27  }
 0x68f   : > { %v2967_v58 = vadd.f32 %v5126_v3, %v2966_v21  ;;  %v3465_v25 = vpop.permute.xlu2 %3464  ;;  %v3962_v6 = vadd.f32 %v3930_v62, %v3769_v50  ;;  %v3120_v50 = vpop.f32.mrf.mxu2 }
 0x690   : > { %v3546_v13 = vsel %vm3402_vm6, %v3465_v25, 0.0 }
 0x691   : > { %v2971_v2 = vsel %vm2970_vm2, %v5126_v3, %v2967_v58  ;;  %v3994_v5 = vmul.f32 %v3962_v6, %v3115_v17  ;;  %v2870_v3 = vor.u32 1.1754944e-38, %v2869_v33  ;;  %v3578_v49 = vadd.f32 %v3546_v13, %v3353_v34  ;;  %v3469_v58 = vpop.permute.xlu0 %3468 }
 0x692   : > { %v2976_v23 = vsel %vm2973_vm1, %v2975_v7, %v2971_v2 }
 0x693   : > { %v2977_v14 = vmul.f32 %v2976_v23, %v7174_v51  ;;  %v4019_v35 = vpack.c.bf16 %v3994_v5, %v3993_v29  ;;  %v2866_v51 = vsel %vm7574_vm9, %v7502_v56, %v2862_v22 }
 0x694   : > { %v3251_v16 = vpop.permute.xlu1 %3250  ;;  %4773 = vset.pattern.permute.xlu1 %v7993_v15  ;;  %v2871_v39 = vsel %vm2868_vm11, %v2870_v3, %v2866_v51 }
 0x695   : > { %v7582_v48 = vmul.f32 0.125, %v2977_v14  ;;  %3878 = vperm.xlu1 %4773, %v7268_v20   ;;  %4563 = vmatmul.msk.bf16.gmra.mxu3 %vm4045_vm12, %v4019_v35  ;;  %v2872_v56 = vmul.f32 %v2871_v39, %v6763_v30  ;;  %v7595_v20 = vmul.f32 0.125, %v2962_v31 }
 0x696   : > { %4777 = vset.pattern.permute.xlu2 %v7993_v15 }
 0x697   : > { %v3658_v44 = vpop.permute.xlu2 %3657  ;;  %3335 = vperm.xlu0 %4802, %v7582_v48   ;;  %3882 = vperm.xlu2 %4777, %v7543_v27   ;;  %v3002_v60 = vmul.f32 0.125, %v2872_v56  ;;  %v3123_v5 = vpop.f32.mrf.mxu2 }
 0x698   : > { %v3739_v45 = vsel %vm3595_vm7, %v3658_v44, 0.0 }
 0x699   : > { %v3771_v28 = vadd.f32 %v3739_v45, %v3578_v49  ;;  %v3662_v29 = vpop.permute.xlu0 %3661  ;;  %v531_v45 = vpop.f32.mrf.mxu0 }
 0x69a   : > { %v3740_v14 = vsel %vm3595_vm7, %v3662_v29, 0.0 }
 0x69d   : > { %v3461_v11 = vpop.permute.xlu1 %3460  ;;  %4774 = vset.pattern.permute.xlu1 %v7996_v52 }
 0x69e   : > { %3295 = vperm.xlu1 %4774, %v7543_v27   ;;  %v3545_v41 = vsel %vm3402_vm6, %v3461_v11, 0.0 }
 0x69f   : > { %v3851_v24 = vpop.permute.xlu2 %3850  ;;  %4805 = vset.pattern.permute.xlu0 %v7993_v15  ;;  %4778 = vset.pattern.permute.xlu2 %v7996_v52 }
 0x6a0   : > { %3910 = vperm.xlu0 %4805, %v7595_v20   ;;  %3300 = vperm.xlu2 %4778, %v3002_v60   ;;  %v3932_v18 = vsel %vm3788_vm8, %v3851_v24, 0.0  ;;  %v530_v24 = vadd.f32 %v529_v55, %v6938_v37 }
 0x6a1   : > { %v3964_v43 = vadd.f32 %v3932_v18, %v3771_v28  ;;  %v3276_v8 = vpop.permute.xlu0 %3275 }
 0x6a3   : > { %v3996_v25 = vmul.f32 %v3964_v43, %v3120_v50 }
 0x6a6   : > { %v3654_v38 = vpop.permute.xlu1 %3653  ;;  %4775 = vset.pattern.permute.xlu1 %v7997_v40 }
 0x6a7   : > { %v3855_v30 = vpop.permute.xlu2 %3854  ;;  %3496 = vperm.xlu1 %4775, %v7543_v27   ;;  %v3352_v27 = vsel %vm3177_vm4, %v3251_v16, 0.0  ;;  %v3738_v1 = vsel %vm3595_vm7, %v3654_v38, 0.0  ;;  %v3125_v16 = vpop.f32.mrf.mxu2 }
 0x6a8   : > { %4779 = vset.pattern.permute.xlu2 %v7997_v40  ;;  %v3577_v21 = vadd.f32 %v3545_v41, %v3352_v27 }
 0x6a9   : > { %3500 = vperm.xlu2 %4779, %v3002_v60   ;;  %v3481_v44 = vpop.permute.xlu0 %3480 }
 0x6aa   : > { %v3770_v0 = vadd.f32 %v3738_v1, %v3577_v21  ;;  %v3550_v1 = vsel %vm3402_vm6, %v3481_v44, 0.0  ;;  %v532_v21 = vadd.f32 %v531_v45, %v6938_v37 }
 0x6af   : > { %v7619_v36 = vpop.permute.xlu2 %3270  ;;  %v3847_v33 = vpop.permute.xlu1 %3846  ;;  %4780 = vset.pattern.permute.xlu1 %v7994_v53 }
 0x6b0   : > { %v3931_v22 = vsel %vm3788_vm8, %v3847_v33, 0.0  ;;  %3693 = vperm.xlu1 %4780, %v3002_v60   ;;  %v3128_v49 = vpop.f32.mrf.mxu2 }
 0x6b1   : > { %v3963_v62 = vadd.f32 %v3931_v22, %v3770_v0  ;;  %4784 = vset.pattern.permute.xlu2 %v7994_v53  ;;  %v3674_v27 = vpop.permute.xlu0 %3673  ;;  %v3357_v0 = vsel %vm3177_vm4, %v3276_v8, 0.0 }
 0x6b2   : > { %3697 = vperm.xlu2 %4784, %v7327_v4   ;;  %v3743_v33 = vsel %vm3595_vm7, %v3674_v27, 0.0 }
 0x6b3   : > { %v3995_v17 = vmul.f32 %v3963_v62, %v3118_v19 }
 0x6b5   : > { %v4020_v47 = vpack.c.bf16 %v3996_v25, %v3995_v17 }
 0x6b7   : > { %v3477_v7 = vpop.permute.xlu2 %3476  ;;  %4564 = vmatmul.msk.bf16.gmra.mxu3 %vm4045_vm12, %v4020_v47 }
 0x6b8   : > { %v3266_v6 = vpop.permute.xlu1 %3265  ;;  %4781 = vset.pattern.permute.xlu1 %v7993_v15  ;;  %v3549_v41 = vsel %vm3402_vm6, %v3477_v7, 0.0  ;;  %v3130_v29 = vpop.f32.mrf.mxu2 }
 0x6b9   : > { %3886 = vperm.xlu1 %4781, %v3002_v60   ;;  %v3355_v63 = vsel %vm3177_vm4, %v3266_v6, 0.0 }
 0x6ba   : > { %4785 = vset.pattern.permute.xlu2 %v7993_v15 }
 0x6bb   : > { %3890 = vperm.xlu2 %4785, %v7327_v4   ;;  %v3547_v4 = vsel %vm3402_vm6, %v3469_v58, 0.0 }
 0x6bc   : > { %v3579_v35 = vadd.f32 %v3547_v4, %v3354_v59 }
 0x6be   : > { %v3772_v3 = vadd.f32 %v3740_v14, %v3579_v35 }
 0x6bf   : > { %v3670_v54 = vpop.permute.xlu2 %3669 }
 0x6c0   : > { %v3742_v28 = vsel %vm3595_vm7, %v3670_v54, 0.0 }
 0x6c1   : > { %v3473_v2 = vpop.permute.xlu1 %3472  ;;  %4786 = vset.pattern.permute.xlu1 %v7996_v52 }
 0x6c2   : > { %3310 = vperm.xlu1 %4786, %v7400_v42   ;;  %v3548_v57 = vsel %vm3402_vm6, %v3473_v2, 0.0 }
 0x6c3   : > { %4787 = vset.pattern.permute.xlu2 %v7994_v53  ;;  %v3580_v12 = vadd.f32 %v3548_v57, %v3355_v63  ;;  %v3133_v57 = vpop.f32.mrf.mxu2 }
 0x6c4   : > { %3701 = vperm.xlu2 %4787, %v7400_v42  }
 0x6c7   : > { %v3867_v46 = vpop.permute.xlu2 %3866 }
 0x6c8   : > { %v3936_v25 = vsel %vm3788_vm8, %v3867_v46, 0.0 }
 0x6ca   : > { %v3666_v23 = vpop.permute.xlu1 %3665  ;;  %4788 = vset.pattern.permute.xlu1 %v7993_v15 }
 0x6cb   : > { %3894 = vperm.xlu1 %4788, %v7400_v42   ;;  %v3933_v42 = vsel %vm3788_vm8, %v3855_v30, 0.0  ;;  %v3741_v51 = vsel %vm3595_vm7, %v3666_v23, 0.0  ;;  %v3678_v23 = vpop.permute.xlu0 %3677 }
 0x6cc   : > { %4789 = vset.pattern.permute.xlu2 %v7996_v52  ;;  %v3965_v39 = vadd.f32 %v3933_v42, %v3772_v3  ;;  %v3773_v31 = vadd.f32 %v3741_v51, %v3580_v12  ;;  %v3744_v35 = vsel %vm3595_vm7, %v3678_v23, 0.0 }
 0x6cd   : > { %3315 = vperm.xlu2 %4789, %v7444_v26  }
 0x6ce   : > { %v3997_v38 = vmul.f32 %v3965_v39, %v3123_v5 }
 0x6cf   : > { %v7657_v60 = vpop.permute.xlu2 %3870 }
 0x6d3   : > { %v3859_v56 = vpop.permute.xlu1 %3858  ;;  %4790 = vset.pattern.permute.xlu1 %v7997_v40 }
 0x6d4   : > { %v3934_v11 = vsel %vm3788_vm8, %v3859_v56, 0.0  ;;  %3512 = vperm.xlu1 %4790, %v7444_v26  }
 0x6d5   : > { %v3966_v19 = vadd.f32 %v3934_v11, %v3773_v31  ;;  %4792 = vset.pattern.permute.xlu2 %v7993_v15  ;;  %v3135_v11 = vpop.f32.mrf.mxu2 }
 0x6d6   : > { %3898 = vperm.xlu2 %4792, %v7444_v26   ;;  %v3356_v26 = vsel %vm3177_vm4, %v7619_v36, 0.0  ;;  %v3582_v36 = vadd.f32 %v3550_v1, %v3357_v0 }
 0x6d7   : > { %v3998_v30 = vmul.f32 %v3966_v19, %v3125_v16  ;;  %v4128_v13 = vpop.f32.mrf.mxu3  ;;  %v3581_v43 = vadd.f32 %v3549_v41, %v3356_v26  ;;  %v3286_v62 = vpop.permute.xlu2 %3285 }
 0x6d8   : > { %v4193_v9 = vadd.f32 %v4128_v13, %v530_v24  ;;  %v3775_v47 = vadd.f32 %v3743_v33, %v3582_v36  ;;  %v3875_v16 = vpop.permute.xlu0 %3874 }
 0x6d9   : > { %v4021_v34 = vpack.c.bf16 %v3998_v30, %v3997_v38  ;;  %v3774_v22 = vadd.f32 %v3742_v28, %v3581_v43  ;;  %v3938_v31 = vsel %vm3788_vm8, %v3875_v16, 0.0 }
 0x6da   : > { %4225 = vst [vmem:[%s6956_s26 + $0x50] sm:$0xff] %v4193_v9  ;;  %v3968_v6 = vadd.f32 %v3936_v25, %v3775_v47 }
 0x6db   : > { %v3863_v18 = vpop.permute.xlu1 %3862  ;;  %4565 = vmatmul.msk.bf16.gmra.mxu3 %vm4045_vm12, %v4021_v34 }
 0x6dc   : > { %3516 = vperm.xlu1 %4790, %v7460_v10   ;;  %v3935_v50 = vsel %vm3788_vm8, %v3863_v18, 0.0 }
 0x6dd   : > { %v3967_v7 = vadd.f32 %v3935_v50, %v3774_v22  ;;  %v3138_v45 = vpop.f32.mrf.mxu2 }
 0x6de   : > { %3902 = vperm.xlu2 %4792, %v7460_v10   ;;  %v4000_v10 = vmul.f32 %v3968_v6, %v3130_v29 }
 0x6df   : > { %v4130_v58 = vpop.f32.mrf.mxu3  ;;  %v3999_v2 = vmul.f32 %v3967_v7, %v3128_v49  ;;  %v3489_v8 = vpop.permute.xlu2 %3488 }
 0x6e0   : > { %v4194_v17 = vadd.f32 %v4130_v58, %v532_v21  ;;  %v3552_v55 = vsel %vm3402_vm6, %v3489_v8, 0.0  ;;  %v534_v49 = vpop.f32.mrf.mxu0 }
 0x6e1   : > { %v4022_v5 = vpack.c.bf16 %v4000_v10, %v3999_v2 }
 0x6e2   : > { %4226 = vst [vmem:[%s6956_s26 + $0x58] sm:$0xff] %v4194_v17 }
 0x6e4   : > { %v3281_v54 = vpop.permute.xlu1 %3280  ;;  %4795 = vset.pattern.permute.xlu1 %v7996_v52 }
 0x6e5   : > { %3325 = vperm.xlu1 %4795, %v7479_v61   ;;  %v3358_v59 = vsel %vm3177_vm4, %v3281_v54, 0.0  ;;  %v3140_v0 = vpop.f32.mrf.mxu2 }
 0x6e6   : > { %4796 = vset.pattern.permute.xlu2 %v7997_v40 }
 0x6e7   : > { %3520 = vperm.xlu2 %4796, %v7479_v61  }
 0x6e8   : > { %v3690_v42 = vpop.permute.xlu2 %3689  ;;  %v536_v36 = vpop.f32.mrf.mxu0 }
 0x6e9   : > { %v3747_v25 = vsel %vm3595_vm7, %v3690_v42, 0.0  ;;  %v537_v7 = vadd.f32 %v536_v36, %v6938_v37 }
 0x6eb   : > { %4566 = vmatmul.msk.bf16.gmra.mxu3 %vm4045_vm12, %v4022_v5 }
 0x6ed   : > { %v3485_v46 = vpop.permute.xlu1 %3484  ;;  %4797 = vset.pattern.permute.xlu1 %v7994_v53 }
 0x6ee   : > { %v3551_v4 = vsel %vm3402_vm6, %v3485_v46, 0.0  ;;  %3713 = vperm.xlu1 %4797, %v7479_v61   ;;  %v3359_v61 = vsel %vm3177_vm4, %v3286_v62, 0.0 }
 0x6ef   : > { %4799 = vset.pattern.permute.xlu2 %v7996_v52  ;;  %v3583_v14 = vadd.f32 %v3551_v4, %v3358_v59  ;;  %v3584_v51 = vadd.f32 %v3552_v55, %v3359_v61  ;;  %v3937_v52 = vsel %vm3788_vm8, %v7657_v60, 0.0  ;;  %v3143_v4 = vpop.f32.mrf.mxu2 }
 0x6f0   : > { %3330 = vperm.xlu2 %4799, %v7595_v20  }
 0x6f1   : > { %v3776_v63 = vadd.f32 %v3744_v35, %v3583_v14  ;;  %v3883_v38 = vpop.permute.xlu2 %3882 }
 0x6f2   : > { %v3940_v6 = vsel %vm3788_vm8, %v3883_v38, 0.0  ;;  %v539_v38 = vpop.f32.mrf.mxu0 }
 0x6f3   : > { %v3969_v12 = vadd.f32 %v3937_v52, %v3776_v63 }
 0x6f5   : > { %v4001_v24 = vmul.f32 %v3969_v12, %v3133_v57 }
 0x6f6   : > { %v3682_v3 = vpop.permute.xlu1 %3681  ;;  %4800 = vset.pattern.permute.xlu1 %v7997_v40 }
 0x6f7   : > { %v3745_v44 = vsel %vm3595_vm7, %v3682_v3, 0.0  ;;  %3524 = vperm.xlu1 %4800, %v7595_v20  }
 0x6f8   : > { %v3777_v39 = vadd.f32 %v3745_v44, %v3584_v51  ;;  %4803 = vset.pattern.permute.xlu2 %v7997_v40  ;;  %v3291_v40 = vpop.permute.xlu0 %3290 }
 0x6f9   : > { %3528 = vperm.xlu2 %4803, %v7582_v48   ;;  %v3360_v18 = vsel %vm3177_vm4, %v3291_v40, 0.0  ;;  %v540_v40 = vadd.f32 %v539_v38, %v6938_v37 }
 0x6fa   : > { %v3970_v56 = vadd.f32 %v3938_v31, %v3777_v39  ;;  %v3301_v13 = vpop.permute.xlu2 %3300 }
 0x6fb   : > { %v3362_v55 = vsel %vm3177_vm4, %v3301_v13, 0.0 }
 0x6fc   : > { %v4002_v19 = vmul.f32 %v3970_v56, %v3135_v11  ;;  %v3145_v56 = vpop.f32.mrf.mxu2 }
 0x6fe   : > { %v4023_v60 = vpack.c.bf16 %v4002_v19, %v4001_v24  ;;  %v3686_v30 = vpop.permute.xlu1 %3685 }
 0x6ff   : > { %4801 = vset.pattern.permute.xlu1 %v7994_v53  ;;  %v3746_v1 = vsel %vm3595_vm7, %v3686_v30, 0.0 }
 0x700   : > { %3717 = vperm.xlu1 %4801, %v7595_v20   ;;  %4567 = vmatmul.msk.bf16.gmra.mxu3 %vm4045_vm12, %v4023_v60  ;;  %v3493_v34 = vpop.permute.xlu0 %3492  ;;  %v535_v20 = vadd.f32 %v534_v49, %v6938_v37 }
 0x701   : > { %4804 = vset.pattern.permute.xlu2 %v7994_v53  ;;  %v3553_v53 = vsel %vm3402_vm6, %v3493_v34, 0.0 }
 0x702   : > { %3721 = vperm.xlu2 %4804, %v7582_v48   ;;  %v3585_v26 = vadd.f32 %v3553_v53, %v3360_v18 }
 0x703   : > { %v3501_v27 = vpop.permute.xlu2 %3500 }
 0x704   : > { %v3778_v22 = vadd.f32 %v3746_v1, %v3585_v26  ;;  %v3555_v57 = vsel %vm3402_vm6, %v3501_v27, 0.0  ;;  %v3148_v26 = vpop.f32.mrf.mxu2 }
 0x705   : > { %v3587_v16 = vadd.f32 %v3555_v57, %v3362_v55 }
 0x707   : > { %v3879_v9 = vpop.permute.xlu1 %3878 }
 0x708   : > { %4806 = vset.pattern.permute.xlu1 %v7993_v15  ;;  %v3939_v43 = vsel %vm3788_vm8, %v3879_v9, 0.0 }
 0x709   : > { %3914 = vperm.xlu1 %4806, %v7582_v48   ;;  %v3306_v48 = vpop.permute.xlu0 %3305  ;;  %v3971_v17 = vadd.f32 %v3939_v43, %v3778_v22 }
 0x70a   : > { %v3363_v35 = vsel %vm3177_vm4, %v3306_v48, 0.0 }
 0x70b   : > { %v4003_v2 = vmul.f32 %v3971_v17, %v3138_v45 }
 0x70c   : > { %v3698_v62 = vpop.permute.xlu2 %3697 }
 0x70d   : > { %v3749_v42 = vsel %vm3595_vm7, %v3698_v62, 0.0 }
 0x710   : > { %v3296_v41 = vpop.permute.xlu1 %3295 }
 0x711   : > { %v3361_v33 = vsel %vm3177_vm4, %v3296_v41, 0.0  ;;  %v3505_v23 = vpop.permute.xlu0 %3504  ;;  %v541_v41 = vpop.f32.mrf.mxu0 }
 0x712   : > { %v3556_v14 = vsel %vm3402_vm6, %v3505_v23, 0.0  ;;  %v542_v27 = vadd.f32 %v541_v41, %v6938_v37 }
 0x713   : > { %v3588_v61 = vadd.f32 %v3556_v14, %v3363_v35 }
 0x715   : > { %v3891_v59 = vpop.permute.xlu2 %3890  ;;  %v3781_v3 = vadd.f32 %v3749_v42, %v3588_v61 }
 0x716   : > { %v3942_v51 = vsel %vm3788_vm8, %v3891_v59, 0.0 }
 0x717   : > { %v3974_v39 = vadd.f32 %v3942_v51, %v3781_v3 }
 0x718   : > { %v4133_v15 = vpop.f32.mrf.mxu3 }
 0x719   : > { %v4195_v28 = vadd.f32 %v4133_v15, %v535_v20  ;;  %v3497_v21 = vpop.permute.xlu1 %3496  ;;  %v4006_v19 = vmul.f32 %v3974_v39, %v3145_v56  ;;  %v3509_v13 = vpop.permute.xlu0 %3508 }
 0x71a   : > { %v3554_v50 = vsel %vm3402_vm6, %v3497_v21, 0.0  ;;  %v3557_v1 = vsel %vm3402_vm6, %v3509_v13, 0.0 }
 0x71b   : > { %4227 = vst [vmem:[%s6956_s26 + $0x60] sm:$0xff] %v4195_v28  ;;  %v3586_v58 = vadd.f32 %v3554_v50, %v3361_v33 }
 0x71d   : > { %v3779_v47 = vadd.f32 %v3747_v25, %v3586_v58 }
 0x71e   : > { %v3702_v11 = vpop.permute.xlu2 %3701 }
 0x71f   : > { %v3972_v29 = vadd.f32 %v3940_v6, %v3779_v47  ;;  %v3750_v43 = vsel %vm3595_vm7, %v3702_v11, 0.0  ;;  %v3150_v47 = vpop.f32.mrf.mxu2 }
 0x720   : > { %v4135_v54 = vpop.f32.mrf.mxu3 }
 0x721   : > { %v4196_v10 = vadd.f32 %v4135_v54, %v537_v7  ;;  %v4004_v8 = vmul.f32 %v3972_v29, %v3140_v0  ;;  %v3706_v53 = vpop.permute.xlu0 %3705 }
 0x722   : > { %v3694_v5 = vpop.permute.xlu1 %3693  ;;  %v3751_v62 = vsel %vm3595_vm7, %v3706_v53, 0.0 }
 0x723   : > { %4228 = vst [vmem:[%s6956_s26 + $0x68] sm:$0xff] %v4196_v10  ;;  %v4024_v46 = vpack.c.bf16 %v4004_v8, %v4003_v2  ;;  %v3748_v63 = vsel %vm3595_vm7, %v3694_v5, 0.0  ;;  %v544_v5 = vpop.f32.mrf.mxu0 }
 0x724   : > { %v3780_v52 = vadd.f32 %v3748_v63, %v3587_v16  ;;  %v545_v55 = vadd.f32 %v544_v5, %v6938_v37 }
 0x725   : > { %4568 = vmatmul.msk.bf16.gmra.mxu3 %vm4045_vm12, %v4024_v46 }
 0x727   : > { %v3316_v9 = vpop.permute.xlu2 %3315  ;;  %v3153_v35 = vpop.f32.mrf.mxu2 }
 0x728   : > { %v3365_v0 = vsel %vm3177_vm4, %v3316_v9, 0.0 }
 0x729   : > { %v3321_v7 = vpop.permute.xlu0 %3320 }
 0x72a   : > { %v3366_v14 = vsel %vm3177_vm4, %v3321_v7, 0.0 }
 0x72b   : > { %v3887_v44 = vpop.permute.xlu1 %3886  ;;  %v546_v42 = vpop.f32.mrf.mxu0 }
 0x72c   : > { %v3941_v12 = vsel %vm3788_vm8, %v3887_v44, 0.0 }
 0x72d   : > { %v3973_v31 = vadd.f32 %v3941_v12, %v3780_v52 }
 0x72f   : > { %v4005_v24 = vmul.f32 %v3973_v31, %v3143_v4 }
 0x730   : > { %v3899_v15 = vpop.permute.xlu2 %3898 }
 0x731   : > { %v4025_v60 = vpack.c.bf16 %v4006_v19, %v4005_v24  ;;  %v3944_v17 = vsel %vm3788_vm8, %v3899_v15, 0.0  ;;  %v3710_v23 = vpop.permute.xlu0 %3709 }
 0x732   : > { %v3752_v63 = vsel %vm3595_vm7, %v3710_v23, 0.0 }
 0x734   : > { %v3311_v30 = vpop.permute.xlu1 %3310 }
 0x735   : > { %4569 = vmatmul.msk.bf16.gmra.mxu3 %vm4045_vm12, %v4025_v60  ;;  %v3364_v20 = vsel %vm3177_vm4, %v3311_v30, 0.0  ;;  %v547_v60 = vadd.f32 %v546_v42, %v6938_v37  ;;  %v3155_v30 = vpop.f32.mrf.mxu2 }
 0x736   : > { %v3589_v28 = vadd.f32 %v3557_v1, %v3364_v20 }
 0x738   : > { %v3782_v36 = vadd.f32 %v3750_v43, %v3589_v28  ;;  %v3903_v29 = vpop.permute.xlu2 %3902 }
 0x739   : > { %v3907_v44 = vpop.permute.xlu0 %3906  ;;  %v3945_v31 = vsel %vm3788_vm8, %v3903_v29, 0.0 }
 0x73a   : > { %v4138_v34 = vpop.f32.mrf.mxu3  ;;  %v3946_v38 = vsel %vm3788_vm8, %v3907_v44, 0.0 }
 0x73b   : > { %v4197_v45 = vadd.f32 %v4138_v34, %v540_v40 }
 0x73d   : > { %4229 = vst [vmem:[%s6956_s26 + $0x70] sm:$0xff] %v4197_v45  ;;  %v3895_v49 = vpop.permute.xlu1 %3894  ;;  %v549_v45 = vpop.f32.mrf.mxu0 }
 0x73e   : > { %v3943_v33 = vsel %vm3788_vm8, %v3895_v49, 0.0  ;;  %v550_v53 = vadd.f32 %v549_v45, %v6938_v37 }
 0x73f   : > { %v3975_v58 = vadd.f32 %v3943_v33, %v3782_v36 }
 0x741   : > { %v4007_v54 = vmul.f32 %v3975_v58, %v3148_v26  ;;  %v3521_v46 = vpop.permute.xlu2 %3520 }
 0x742   : > { %v4140_v18 = vpop.f32.mrf.mxu3  ;;  %v3560_v3 = vsel %vm3402_vm6, %v3521_v46, 0.0 }
 0x743   : > { %v4198_v48 = vadd.f32 %v4140_v18, %v542_v27  ;;  %v3336_v18 = vpop.permute.xlu0 %3335 }
 0x745   : > { %4230 = vst [vmem:[%s6956_s26 + $0x78] sm:$0xff] %v4198_v48  ;;  %v551_v26 = vpop.f32.mrf.mxu0 }
 0x746   : > { %v3513_v21 = vpop.permute.xlu1 %3512 }
 0x747   : > { %v3558_v50 = vsel %vm3402_vm6, %v3513_v21, 0.0  ;;  %v552_v21 = vadd.f32 %v551_v26, %v6938_v37 }
 0x748   : > { %v3590_v22 = vadd.f32 %v3558_v50, %v3365_v0  ;;  %v3158_v0 = vpop.f32.mrf.mxu2 }
 0x74a   : > { %v3783_v25 = vadd.f32 %v3751_v62, %v3590_v22  ;;  %v3331_v56 = vpop.permute.xlu2 %3330 }
 0x74b   : > { %v3368_v43 = vsel %vm3177_vm4, %v3331_v56, 0.0  ;;  %v3911_v58 = vpop.permute.xlu0 %3910 }
 0x74c   : > { %v3976_v6 = vadd.f32 %v3944_v17, %v3783_v25  ;;  %v3947_v29 = vsel %vm3788_vm8, %v3911_v58, 0.0 }
 0x74e   : > { %v4008_v2 = vmul.f32 %v3976_v6, %v3150_v47  ;;  %v3517_v10 = vpop.permute.xlu1 %3516  ;;  %v3369_v47 = vsel %vm3177_vm4, %v3336_v18, 0.0 }
 0x74f   : > { %v3559_v4 = vsel %vm3402_vm6, %v3517_v10, 0.0 }
 0x750   : > { %v4026_v8 = vpack.c.bf16 %v4008_v2, %v4007_v54  ;;  %v3591_v57 = vadd.f32 %v3559_v4, %v3366_v14  ;;  %v3160_v46 = vpop.f32.mrf.mxu2 }
 0x752   : > { %4570 = vmatmul.msk.bf16.gmra.mxu3 %vm4045_vm12, %v4026_v8  ;;  %v3784_v16 = vadd.f32 %v3752_v63, %v3591_v57  ;;  %v554_v8 = vpop.f32.mrf.mxu0 }
 0x753   : > { %v3529_v20 = vpop.permute.xlu2 %3528  ;;  %v555_v14 = vadd.f32 %v554_v8, %v6938_v37 }
 0x754   : > { %v3977_v24 = vadd.f32 %v3945_v31, %v3784_v16  ;;  %v3562_v22 = vsel %vm3402_vm6, %v3529_v20, 0.0 }
 0x755   : > { %v3594_v6 = vadd.f32 %v3562_v22, %v3369_v47 }
 0x756   : > { %v4009_v13 = vmul.f32 %v3977_v24, %v3153_v35 }
 0x757   : > { %v3326_v59 = vpop.permute.xlu1 %3325 }
 0x758   : > { %v3367_v61 = vsel %vm3177_vm4, %v3326_v59, 0.0 }
 0x759   : > { %v3592_v12 = vadd.f32 %v3560_v3, %v3367_v61 }
 0x75a   : > { %v556_v42 = vpop.f32.mrf.mxu0 }
 0x75b   : > { %v557_v63 = vadd.f32 %v556_v42, %v6938_v37 }
 0x75c   : > { %v3722_v50 = vpop.permute.xlu2 %3721 }
 0x75d   : > { %v3755_v7 = vsel %vm3595_vm7, %v3722_v50, 0.0 }
 0x75e   : > { %v4143_v51 = vpop.f32.mrf.mxu3  ;;  %v3787_v54 = vadd.f32 %v3755_v7, %v3594_v6 }
 0x75f   : > { %v4199_v52 = vadd.f32 %v4143_v51, %v545_v55 }
 0x760   : > { %v3714_v39 = vpop.permute.xlu1 %3713 }
 0x761   : > { %4231 = vst [vmem:[%s6956_s26 + $0x80] sm:$0xff] %v4199_v52  ;;  %v3753_v11 = vsel %vm3595_vm7, %v3714_v39, 0.0 }
 0x762   : > { %v3785_v19 = vadd.f32 %v3753_v11, %v3592_v12  ;;  %v559_v16 = vpop.f32.mrf.mxu0 }
 0x763   : > { %v560_v51 = vadd.f32 %v559_v16, %v6938_v37 }
 0x764   : > { %v3978_v40 = vadd.f32 %v3946_v38, %v3785_v19 }
 0x766   : > { %v4010_v9 = vmul.f32 %v3978_v40, %v3155_v30  ;;  %v4145_v34 = vpop.f32.mrf.mxu3 }
 0x767   : > { %v4200_v41 = vadd.f32 %v4145_v34, %v547_v60 }
 0x768   : > { %v4027_v49 = vpack.c.bf16 %v4010_v9, %v4009_v13 }
 0x769   : > { %4232 = vst [vmem:[%s6956_s26 + $0x88] sm:$0xff] %v4200_v41  ;;  %v3525_v27 = vpop.permute.xlu1 %3524 }
 0x76a   : > { %4571 = vmatmul.msk.bf16.gmra.mxu3 %vm4045_vm12, %v4027_v49  ;;  %v3561_v48 = vsel %vm3402_vm6, %v3525_v27, 0.0  ;;  %v561_v3 = vpop.f32.mrf.mxu0 }
 0x76b   : > { %v3593_v36 = vadd.f32 %v3561_v48, %v3368_v43  ;;  %v562_v12 = vadd.f32 %v561_v3, %v6938_v37 }
 0x76e   : > { %v4148_v1 = vpop.f32.mrf.mxu3 }
 0x76f   : > { %v4201_v15 = vadd.f32 %v4148_v1, %v550_v53 }
 0x771   : > { %4233 = vst [vmem:[%s6956_s26 + $0x90] sm:$0xff] %v4201_v15 }
 0x772   : > { %v3718_v28 = vpop.permute.xlu1 %3717  ;;  %v564_v31 = vpop.f32.mrf.mxu0 }
 0x773   : > { %v3754_v33 = vsel %vm3595_vm7, %v3718_v28, 0.0  ;;  %v565_v11 = vadd.f32 %v564_v31, %v6938_v37 }
 0x774   : > { %v3786_v25 = vadd.f32 %v3754_v33, %v3593_v36 }
 0x776   : > { %v4150_v62 = vpop.f32.mrf.mxu3  ;;  %v3979_v2 = vadd.f32 %v3947_v29, %v3786_v25 }
 0x777   : > { %v4202_v17 = vadd.f32 %v4150_v62, %v552_v21 }
 0x778   : > { %v4011_v4 = vmul.f32 %v3979_v2, %v3158_v0 }
 0x779   : > { %4234 = vst [vmem:[%s6956_s26 + $0x98] sm:$0xff] %v4202_v17 }
 0x77a   : > { %v566_v38 = vpop.f32.mrf.mxu0 }
 0x77b   : > { %v3915_v10 = vpop.permute.xlu1 %3914  ;;  %v567_v60 = vadd.f32 %v566_v38, %v6938_v37 }
 0x77c   : > { %v3948_v5 = vsel %vm3788_vm8, %v3915_v10, 0.0 }
 0x77d   : > { %v3980_v23 = vadd.f32 %v3948_v5, %v3787_v54 }
 0x77f   : > { %v4012_v59 = vmul.f32 %v3980_v23, %v3160_v46 }
 0x781   : > { %v4028_v57 = vpack.c.bf16 %v4012_v59, %v4011_v4 }
 0x782   : > { %v569_v13 = vpop.f32.mrf.mxu0 }
 0x783   : > { %v4153_v35 = vpop.f32.mrf.mxu3  ;;  %4572 = vmatmul.msk.bf16.gmra.mxu3 %vm4045_vm12, %v4028_v57  ;;  %v570_v9 = vadd.f32 %v569_v13, %v6938_v37 }
 0x784   : > { %v4203_v55 = vadd.f32 %v4153_v35, %v555_v14 }
 0x786   : > { %4235 = vst [vmem:[%s6956_s26 + $0xa0] sm:$0xff] %v4203_v55 }
 0x78a   : > { %v571_v41 = vpop.f32.mrf.mxu0 }
 0x78b   : > { %v4155_v32 = vpop.f32.mrf.mxu3  ;;  %v572_v49 = vadd.f32 %v571_v41, %v6938_v37 }
 0x78c   : > { %v4204_v61 = vadd.f32 %v4155_v32, %v557_v63 }
 0x78e   : > { %4236 = vst [vmem:[%s6956_s26 + $0xa8] sm:$0xff] %v4204_v61 }
 0x792   : > { %v574_v53 = vpop.f32.mrf.mxu0 }
 0x793   : > { %v575_v18 = vadd.f32 %v574_v53, %v6938_v37 }
 0x79a   : > { %v576_v26 = vpop.f32.mrf.mxu0 }
 0x79b   : > { %v577_v48 = vadd.f32 %v576_v26, %v6938_v37 }
 0x7a2   : > { %v579_v43 = vpop.f32.mrf.mxu0 }
 0x7a3   : > { %v580_v0 = vadd.f32 %v579_v43, %v6938_v37 }
 0x7a8   : > { %v4158_v52 = vpop.f32.mrf.mxu3 }
 0x7a9   : > { %v4205_v44 = vadd.f32 %v4158_v52, %v560_v51 }
 0x7aa   : > { %v581_v36 = vpop.f32.mrf.mxu0 }
 0x7ab   : > { %4237 = vst [vmem:[%s6956_s26 + $0xb0] sm:$0xff] %v4205_v44  ;;  %v582_v22 = vadd.f32 %v581_v36, %v6938_v37 }
 0x7b0   : > { %v4160_v39 = vpop.f32.mrf.mxu3 }
 0x7b1   : > { %v4206_v56 = vadd.f32 %v4160_v39, %v562_v12 }
 0x7b3   : > { %4238 = vst [vmem:[%s6956_s26 + $0xb8] sm:$0xff] %v4206_v56 }
 0x7b8   : > { %v4163_v24 = vpop.f32.mrf.mxu3 }
 0x7b9   : > { %v4207_v19 = vadd.f32 %v4163_v24, %v565_v11 }
 0x7bb   : > { %4239 = vst [vmem:[%s6956_s26 + $0xc0] sm:$0xff] %v4207_v19 }
 0x7c0   : > { %v4165_v30 = vpop.f32.mrf.mxu3 }
 0x7c1   : > { %v4208_v40 = vadd.f32 %v4165_v30, %v567_v60 }
 0x7c3   : > { %4240 = vst [vmem:[%s6956_s26 + $0xc8] sm:$0xff] %v4208_v40 }
 0x7d5   : > { %v4168_v34 = vpop.f32.mrf.mxu3 }
 0x7d6   : > { %v4209_v45 = vadd.f32 %v4168_v34, %v570_v9 }
 0x7d8   : > { %4241 = vst [vmem:[%s6956_s26 + $0xd0] sm:$0xff] %v4209_v45 }
 0x7dd   : > { %v4170_v27 = vpop.f32.mrf.mxu3 }
 0x7de   : > { %v4210_v20 = vadd.f32 %v4170_v27, %v572_v49 }
 0x7e0   : > { %4242 = vst [vmem:[%s6956_s26 + $0xd8] sm:$0xff] %v4210_v20 }
 0x7ed   : > { %v4173_v1 = vpop.f32.mrf.mxu3 }
 0x7ee   : > { %v4211_v15 = vadd.f32 %v4173_v1, %v575_v18 }
 0x7f0   : > { %4243 = vst [vmem:[%s6956_s26 + $0xe0] sm:$0xff] %v4211_v15 }
 0x7f5   : > { %v4175_v28 = vpop.f32.mrf.mxu3 }
 0x7f6   : > { %v4212_v21 = vadd.f32 %v4175_v28, %v577_v48 }
 0x7f8   : > { %4244 = vst [vmem:[%s6956_s26 + $0xe8] sm:$0xff] %v4212_v21 }
 0x806   : > { %v4178_v33 = vpop.f32.mrf.mxu3 }
 0x807   : > { %v4213_v50 = vadd.f32 %v4178_v33, %v580_v0 }
 0x809   : > { %4245 = vst [vmem:[%s6956_s26 + $0xf0] sm:$0xff] %v4213_v50 }
 0x80e   : > { %v4180_v62 = vpop.f32.mrf.mxu3 }
 0x80f   : > { %v4214_v58 = vadd.f32 %v4180_v62, %v582_v22 }
 0x811   : > { %4246 = vst [vmem:[%s6956_s26 + $0xf8] sm:$0xff] %v4214_v58 }
 0x812   : > { %5233 = shalt.err (!%p5230_p10)
}
 0x813   : > { %s5288_s28 = smov 128   ;;  %s5289_s14 = smov 8  }
 0x814   : > { %4628 = dma.vmem_to_hbm [thread:$0]  (%p5387_p7), %s4261_s29, 4096, %s4263_s27, %s4248_s30, %s5288_s28, %s5288_s28, %s5289_s14  }
 0x815 PF: > { %s4277_s26 = sand.u32 1, %s5264_s18   ;;  %p8080_p12 = scmp.ge.s32.totalorder %s5276_s21, 2 }
 0x816   : > { %s4278_s10 = scalar_lea.sflag [#allocation4], %s4277_s26 }
 0x817   : > { %p4639_p13 = pnand %p8080_p12, %p5355_p6 }
 0x819   : > { %p4640_p0 = pneg %p4639_p13 }
 0x81b   : > { %5259 = dma.done.wait (%p4640_p0), %s4278_s10, 4096  }
 0x81c   : > { %5261 = vsyncadd (%p4640_p0), %s4278_s10, 4294963200  ;;  %p19_p3 = scmp.ge.s32.totalorder %s5373_s7, 4   ;;  %s8081_s18 = smov %s5268_s19 }
 0x81d   : > { %s8082_s19 = smov %s5272_s20  ;;  %s8083_s20 = smov %s5383_s12 }
 0x81e   : > { %s8084_s21 = smov %s5373_s7  ;;  %21 = sbr.rel (!%p19_p3) target bundleno = 6 (0x6), region = 89 }
 0x823   :  { %4284 = vsyncpa [#allocation3], 1 }
 0x824   :  { %4286 = vsyncpa [#allocation3 + $0x1], 1 }
 0x825   :  { %4287 = vsyncpa [#allocation6], 1 }
 0x826   :  { %4288 = vsyncpa [#allocation4], 1 }
 0x827   :  { %4290 = vsyncpa [#allocation4 + $0x1], 1 }

</bundles_post_ra>
